<compile_context>
chip_gen: v6e
topology: v6e:2x2x1
jax: 0.10.0
libtpu: 0.0.40
codegen_flags: <defaults>
</compile_context>

<pallas_src>
import functools
import math

import jax
import jax.numpy as jnp
from jax import lax
from jax.experimental import pallas as pl
from jax.experimental.pallas import tpu as pltpu


# ----------------------------------------------------------------------------
# Parameter packing: everything lives in ONE f32 slab (static layout dict).
# ----------------------------------------------------------------------------

def _pack_slab(entries, width, align=8):
    """Stack 2-D params into a (rows, width) slab; each entry starts on an 8-row boundary."""
    layout = {}
    blocks = []
    r = 0
    for name, a in entries:
        a = jnp.asarray(a, jnp.float32)
        h, w = a.shape
        pad = (-r) % align
        if pad:
            blocks.append(jnp.zeros((pad, width), jnp.float32))
            r += pad
        layout[name] = (r, h, w)
        blocks.append(jnp.pad(a, ((0, 0), (0, width - w))))
        r += h
    tail = (-r) % align
    if tail:
        blocks.append(jnp.zeros((tail, width), jnp.float32))
    return jnp.concatenate(blocks, axis=0), layout


def init_params(key, feats, n_window=10, batch=1, dim_feedforward=16):
    """Weights pre-transposed, QKV pre-fused to (E, 3E), PE pre-broadcast to the
    interleaved (seq*batch, E) row layout (row = s*B + b). Packed once, here."""
    E, F = feats, dim_feedforward
    ks = iter(jax.random.split(key, 32))

    def uniform(shape, bound):
        return jax.random.uniform(next(ks), shape, jnp.float32, -bound, bound)

    def attn_params():
        # torch MHA: xavier_uniform_ on the stacked (3E, E) in_proj_weight, zero in_proj_bias;
        # out_proj: kaiming-uniform weight (bound 1/sqrt(E)), zero bias.
        in_proj = uniform((3 * E, E), math.sqrt(6.0 / (4.0 * E)))
        wqkvT = in_proj.T                                  # (E, 3E) = [Wq.T | Wk.T | Wv.T]
        bqkv = jnp.zeros((1, 3 * E), jnp.float32)
        woT = uniform((E, E), 1.0 / math.sqrt(E)).T        # (E, E)
        bo = jnp.zeros((1, E), jnp.float32)
        return wqkvT, bqkv, woT, bo

    def ln_params():                                       # (2, E) = [gamma; beta]
        return jnp.concatenate([jnp.ones((1, E), jnp.float32),
                                jnp.zeros((1, E), jnp.float32)], axis=0)

    def ffn_params():
        b1, b2 = 1.0 / math.sqrt(E), 1.0 / math.sqrt(F)
        return (uniform((F, E), b1).T, uniform((1, F), b1),
                uniform((E, F), b2).T, uniform((1, E), b2))

    # PositionalEncoding buffer exactly as the PyTorch code: pe[p, d] = sin(p*w_d) + cos(p*w_d).
    pos = jnp.arange(n_window, dtype=jnp.float32)[:, None]
    div = jnp.exp(jnp.arange(E, dtype=jnp.float32) * (-math.log(10000.0) / E))
    pe = jnp.sin(pos * div) + jnp.cos(pos * div)
    pe_rep = jnp.repeat(pe, batch, axis=0)                 # interleaved (S*B, E)

    e_qkvT, e_qkvb, e_woT, e_wob = attn_params()
    e_w1T, e_b1, e_w2T, e_b2 = ffn_params()
    d_sqkvT, d_sqkvb, d_swoT, d_swob = attn_params()
    d_cqkvT, d_cqkvb, d_cwoT, d_cwob = attn_params()
    d_w1T, d_b1, d_w2T, d_b2 = ffn_params()

    entries = [
        ("pe", pe_rep),
        ("e_qkvT", e_qkvT), ("e_qkvb", e_qkvb), ("e_woT", e_woT), ("e_wob", e_wob),
        ("e_ln1", ln_params()),
        ("e_w1T", e_w1T), ("e_b1", e_b1), ("e_w2T", e_w2T), ("e_b2", e_b2),
        ("e_ln2", ln_params()),
        ("d_sqkvT", d_sqkvT), ("d_sqkvb", d_sqkvb), ("d_swoT", d_swoT), ("d_swob", d_swob),
        ("d_ln1", ln_params()),
        ("d_cqkvT", d_cqkvT), ("d_cqkvb", d_cqkvb), ("d_cwoT", d_cwoT), ("d_cwob", d_cwob),
        ("d_ln2", ln_params()),
        ("d_w1T", d_w1T), ("d_b1", d_b1), ("d_w2T", d_w2T), ("d_b2", d_b2),
        ("d_ln3", ln_params()),
    ]
    width = max(3 * E, F, E)
    return _pack_slab(entries, width)


# ----------------------------------------------------------------------------
# The single fused Pallas kernel
# ----------------------------------------------------------------------------

def _tranad_kernel(layout, B, E, sqrt_e, src_ref, tgt_ref, slab_ref, out_ref):
    N = out_ref.shape[0]                                   # = seq * batch (interleaved rows)

    def p(name):                                           # load a param at point of use (free)
        r, h, w = layout[name]
        return slab_ref[r:r + h, 0:w]

    def layer_norm(x, name, eps=1e-5):
        gb = p(name)                                       # (2, E) = [gamma; beta]
        mu = jnp.mean(x, axis=-1, keepdims=True)
        xc = x - mu
        var = jnp.mean(xc * xc, axis=-1, keepdims=True)
        return xc * lax.rsqrt(var + eps) * gb[0:1, :] + gb[1:2, :]

    # Rows are interleaved over batch (row = s*B + b); attention must not mix batches, so add a
    # large negative bias to cross-batch (query, key) pairs before the softmax.
    qi = lax.broadcasted_iota(jnp.int32, (N, N), 0)
    kj = lax.broadcasted_iota(jnp.int32, (N, N), 1)
    bias = jnp.where((qi % B) == (kj % B), 0.0, -1e9).astype(jnp.float32)[:, None, :]

    def attention(q, kT, vT):
        # head_dim == 1  =>  scale = 1 and per-head scores are rank-1 outer products.
        # q: (N, E); kT, vT: (E, N).  Scores laid out (N, E, N): softmax over keys = lane axis.
        s = q[:, :, None] * kT[None, :, :] + bias
        s = s - jnp.max(s, axis=-1, keepdims=True)
        pexp = jnp.exp(s)
        inv = pl.reciprocal(jnp.sum(pexp, axis=-1), approx=False)      # (N, E)
        return jnp.sum(pexp * vT[None, :, :], axis=-1) * inv           # (N, E)

    def self_attention(x, wn, bn, won, bon):
        qkv = jnp.dot(x, p(wn), preferred_element_type=jnp.float32) + p(bn)   # (N, 3E), fused QKV
        kvT = qkv[:, E:3 * E].T                                                # (2E, N)
        o = attention(qkv[:, 0:E], kvT[0:E, :], kvT[E:2 * E, :])
        return jnp.dot(o, p(won), preferred_element_type=jnp.float32) + p(bon)

    def cross_attention(x, mem, wn, bn, won, bon):
        w, b = p(wn), p(bn)
        q = jnp.dot(x, w[:, 0:E], preferred_element_type=jnp.float32) + b[:, 0:E]
        kv = jnp.dot(mem, w[:, E:3 * E], preferred_element_type=jnp.float32) + b[:, E:3 * E]
        kvT = kv.T
        o = attention(q, kvT[0:E, :], kvT[E:2 * E, :])
        return jnp.dot(o, p(won), preferred_element_type=jnp.float32) + p(bon)

    def ffn(x, w1n, b1n, w2n, b2n):
        h = jnp.maximum(jnp.dot(x, p(w1n), preferred_element_type=jnp.float32) + p(b1n), 0.0)
        return jnp.dot(h, p(w2n), preferred_element_type=jnp.float32) + p(b2n)

    # ---- positional encoding (dropout = identity at inference) ----
    x = src_ref[...] * sqrt_e + p("pe")                                # (N, E)

    # ---- TransformerEncoderLayer (post-norm, relu, no mask) ----
    x = layer_norm(x + self_attention(x, "e_qkvT", "e_qkvb", "e_woT", "e_wob"), "e_ln1")
    mem = layer_norm(x + ffn(x, "e_w1T", "e_b1", "e_w2T", "e_b2"), "e_ln2")

    # ---- TransformerDecoderLayer (post-norm, relu, no masks) ----
    y = tgt_ref[...]
    y = layer_norm(y + self_attention(y, "d_sqkvT", "d_sqkvb", "d_swoT", "d_swob"), "d_ln1")
    y = layer_norm(y + cross_attention(y, mem, "d_cqkvT", "d_cqkvb", "d_cwoT", "d_cwob"), "d_ln2")
    y = layer_norm(y + ffn(y, "d_w1T", "d_b1", "d_w2T", "d_b2"), "d_ln3")

    out_ref[...] = 1.0 / (1.0 + jnp.exp(-y))               # sigmoid; single full store


# ----------------------------------------------------------------------------
# Wrapper: one grid-less pallas_call, 3 inputs (src, tgt, slab), no boundary transposes.
# ----------------------------------------------------------------------------

def tranad_basic_forward(slab, layout, src, tgt):
    """src, tgt: (seq, batch, feats) — torch batch_first=False layout. Returns the same layout.
    (S, B, E) -> (S*B, E) is a free contiguous reshape; the kernel works directly in that
    interleaved row layout (batch isolation handled inside the attention)."""
    S, B, E = src.shape
    assert tgt.shape == (S, B, E), "TranAD uses equal-length src/tgt windows"
    assert layout["pe"][1] == S * B, "params were packed for a different (n_window, batch)"
    src2d = src.reshape(S * B, E).astype(jnp.float32)
    tgt2d = tgt.reshape(S * B, E).astype(jnp.float32)

    kernel = functools.partial(_tranad_kernel, layout, B, E, float(math.sqrt(E)))
    vmem = lambda: pl.BlockSpec(memory_space=pltpu.MemorySpace.VMEM)
    out2d = pl.pallas_call(
        kernel,
        out_shape=jax.ShapeDtypeStruct((S * B, E), jnp.float32),
        in_specs=[vmem(), vmem(), vmem()],
        out_specs=vmem(),
    )(src2d, tgt2d, slab)
    return out2d.reshape(S, B, E)


# ----------------------------------------------------------------------------
# Pure-JAX per-batch reference (same packed params) for a correctness check
# ----------------------------------------------------------------------------

def reference_forward(slab, layout, src, tgt):
    S, B, E = src.shape

    def g(name):
        r, h, w = layout[name]
        return slab[r:r + h, :w]

    pe = g("pe").reshape(S, B, E)[:, 0, :]                 # de-interleave (all batches identical)

    def ln(x, gb):
        mu = x.mean(-1, keepdims=True)
        xc = x - mu
        return xc / jnp.sqrt((xc * xc).mean(-1, keepdims=True) + 1e-5) * gb[0:1] + gb[1:2]

    def mha(q_in, kv_in, wqkvT, bqkv, woT, bo):
        q = q_in @ wqkvT[:, 0:E] + bqkv[:, 0:E]
        k = kv_in @ wqkvT[:, E:2 * E] + bqkv[:, E:2 * E]
        v = kv_in @ wqkvT[:, 2 * E:3 * E] + bqkv[:, 2 * E:3 * E]
        a = jax.nn.softmax(q[:, None, :] * k[None, :, :], axis=1)     # softmax over keys
        return jnp.sum(a * v[None, :, :], axis=1) @ woT + bo

    def ffn(x, w1T, b1, w2T, b2):
        return jnp.maximum(x @ w1T + b1, 0.0) @ w2T + b2

    sig = lambda z: 1.0 / (1.0 + jnp.exp(-z))
    outs = []
    for b in range(B):
        x = src[:, b, :] * math.sqrt(E) + pe
        x = ln(x + mha(x, x, g("e_qkvT"), g("e_qkvb"), g("e_woT"), g("e_wob")), g("e_ln1"))
        mem = ln(x + ffn(x, g("e_w1T"), g("e_b1"), g("e_w2T"), g("e_b2")), g("e_ln2"))
        y = tgt[:, b, :]
        y = ln(y + mha(y, y, g("d_sqkvT"), g("d_sqkvb"), g("d_swoT"), g("d_swob")), g("d_ln1"))
        y = ln(y + mha(y, mem, g("d_cqkvT"), g("d_cqkvb"), g("d_cwoT"), g("d_cwob")), g("d_ln2"))
        y = ln(y + ffn(y, g("d_w1T"), g("d_b1"), g("d_w2T"), g("d_b2")), g("d_ln3"))
        outs.append(sig(y))
    return jnp.stack(outs, axis=1)                         # (S, B, E)


# ----------------------------------------------------------------------------
if __name__ == "__main__":
    jax.config.update("jax_default_matmul_precision", "highest")

    feats = 8            # d_model = nhead = 8  -> head_dim = 1 (as in TranAD_Basic)
    n_window = 10        # TranAD_Basic.n_window
    batch = 2

    key = jax.random.PRNGKey(0)
    pkey, skey, tkey = jax.random.split(key, 3)
    slab, layout = init_params(pkey, feats, n_window=n_window, batch=batch)

    src = jax.random.normal(skey, (n_window, batch, feats), jnp.float32)
    tgt = jax.random.normal(tkey, (n_window, batch, feats), jnp.float32)

    fwd = jax.jit(lambda sl, s, t: tranad_basic_forward(sl, layout, s, t))
    out = fwd(slab, src, tgt)
    jax.block_until_ready(out)

    assert out.shape == (n_window, batch, feats)
    ref = reference_forward(slab, layout, src, tgt)
    err = float(jnp.max(jnp.abs(out - ref)))
    # f32 end-to-end; 1e-3 budget covers EUP exp/rsqrt approximation differences between the
    # Mosaic and XLA lowerings (previous 5e-2 tolerance was too loose to catch real bugs).
    assert err < 1e-3, f"kernel vs reference mismatch: max abs err = {err}"
    print("KERNEL_OK")
</pallas_src>

<mosaic_0001>
module attributes {stable_mosaic.version = 11 : i64} {
  func.func @_tranad_kernel(%arg0: memref<20x8xf32, #tpu.memory_space<vmem>>, %arg1: memref<20x8xf32, #tpu.memory_space<vmem>>, %arg2: memref<240x24xf32, #tpu.memory_space<vmem>>, %arg3: memref<20x8xf32, #tpu.memory_space<vmem>>) attributes {dimension_semantics = [], scalar_prefetch = 0 : i64, scratch_operands = 0 : i64, tpu.core_type = #tpu.core_type<tc>} {
    %0 = tpu.iota {dimensions = array<i32: 0>} : vector<20x20xi32>
    %1 = tpu.iota {dimensions = array<i32: 1>} : vector<20x20xi32>
    %c2_i32 = arith.constant 2 : i32
    %c0_i32 = arith.constant 0 : i32
    %2 = arith.cmpi eq, %c2_i32, %c0_i32 : i32
    %c1_i32 = arith.constant 1 : i32
    %3 = arith.select %2, %c1_i32, %c2_i32 : i32
    %4 = vector.broadcast %3 : i32 to vector<20x20xi32>
    %5 = arith.remsi %0, %4 : vector<20x20xi32>
    %c0_i32_0 = arith.constant 0 : i32
    %6 = vector.broadcast %c0_i32_0 : i32 to vector<20x20xi32>
    %7 = arith.cmpi ne, %5, %6 : vector<20x20xi32>
    %c0_i32_1 = arith.constant 0 : i32
    %8 = vector.broadcast %c0_i32_1 : i32 to vector<20x20xi32>
    %9 = arith.cmpi slt, %5, %8 : vector<20x20xi32>
    %c0_i32_2 = arith.constant 0 : i32
    %10 = arith.cmpi slt, %3, %c0_i32_2 : i32
    %11 = vector.broadcast %10 : i1 to vector<20x20xi1>
    %12 = vector.broadcast %11 : vector<20x20xi1> to vector<20x20xi1>
    %13 = arith.xori %9, %12 : vector<20x20xi1>
    %14 = arith.andi %13, %7 : vector<20x20xi1>
    %15 = vector.broadcast %3 : i32 to vector<20x20xi32>
    %16 = arith.addi %5, %15 : vector<20x20xi32>
    %17 = arith.select %14, %16, %5 : vector<20x20xi1>, vector<20x20xi32>
    %c2_i32_3 = arith.constant 2 : i32
    %c0_i32_4 = arith.constant 0 : i32
    %18 = arith.cmpi eq, %c2_i32_3, %c0_i32_4 : i32
    %c1_i32_5 = arith.constant 1 : i32
    %19 = arith.select %18, %c1_i32_5, %c2_i32_3 : i32
    %20 = vector.broadcast %19 : i32 to vector<20x20xi32>
    %21 = arith.remsi %1, %20 : vector<20x20xi32>
    %c0_i32_6 = arith.constant 0 : i32
    %22 = vector.broadcast %c0_i32_6 : i32 to vector<20x20xi32>
    %23 = arith.cmpi ne, %21, %22 : vector<20x20xi32>
    %c0_i32_7 = arith.constant 0 : i32
    %24 = vector.broadcast %c0_i32_7 : i32 to vector<20x20xi32>
    %25 = arith.cmpi slt, %21, %24 : vector<20x20xi32>
    %c0_i32_8 = arith.constant 0 : i32
    %26 = arith.cmpi slt, %19, %c0_i32_8 : i32
    %27 = vector.broadcast %26 : i1 to vector<20x20xi1>
    %28 = vector.broadcast %27 : vector<20x20xi1> to vector<20x20xi1>
    %29 = arith.xori %25, %28 : vector<20x20xi1>
    %30 = arith.andi %29, %23 : vector<20x20xi1>
    %31 = vector.broadcast %19 : i32 to vector<20x20xi32>
    %32 = arith.addi %21, %31 : vector<20x20xi32>
    %33 = arith.select %30, %32, %21 : vector<20x20xi1>, vector<20x20xi32>
    %34 = arith.cmpi eq, %17, %33 : vector<20x20xi32>
    %cst = arith.constant 0.000000e+00 : f32
    %cst_9 = arith.constant -1.000000e+09 : f32
    %35 = vector.broadcast %cst : f32 to vector<20x20xf32>
    %36 = vector.broadcast %cst_9 : f32 to vector<20x20xf32>
    %37 = arith.select %34, %35, %36 : vector<20x20xi1>, vector<20x20xf32>
    %38 = vector.shape_cast %37 : vector<20x20xf32> to vector<20x1x20xf32>
    %c0 = arith.constant 0 : index
    %c0_10 = arith.constant 0 : index
    %39 = vector.load %arg0[%c0, %c0_10] : memref<20x8xf32, #tpu.memory_space<vmem>>, vector<20x8xf32>
    %cst_11 = arith.constant 2.82842708 : f32
    %40 = vector.broadcast %cst_11 : f32 to vector<20x8xf32>
    %41 = arith.mulf %39, %40 : vector<20x8xf32>
    %c0_12 = arith.constant 0 : index
    %c0_13 = arith.constant 0 : index
    %42 = vector.load %arg2[%c0_12, %c0_13] : memref<240x24xf32, #tpu.memory_space<vmem>>, vector<20x8xf32>
    %43 = arith.addf %41, %42 : vector<20x8xf32>
    %c24 = arith.constant 24 : index
    %c0_14 = arith.constant 0 : index
    %44 = vector.load %arg2[%c24, %c0_14] : memref<240x24xf32, #tpu.memory_space<vmem>>, vector<8x24xf32>
    %cst_15 = arith.constant dense<0.000000e+00> : vector<20x24xf32>
    %45 = tpu.matmul %43, %44, %cst_15 {dimension_numbers = #tpu.dot_dimension_numbers<[1], [0], [0], [1], [0, 0, 1, 1], [], []>, precision = #tpu.contract_precision<fp32>} : vector<20x8xf32>, vector<8x24xf32>, vector<20x24xf32> -> vector<20x24xf32>
    %c32 = arith.constant 32 : index
    %c0_16 = arith.constant 0 : index
    %46 = vector.load %arg2[%c32, %c0_16] : memref<240x24xf32, #tpu.memory_space<vmem>>, vector<1x24xf32>
    %47 = vector.broadcast %46 : vector<1x24xf32> to vector<20x24xf32>
    %48 = arith.addf %45, %47 : vector<20x24xf32>
    %49 = vector.extract_strided_slice %48 {offsets = [0, 8], sizes = [20, 16], strides = [1, 1]} : vector<20x24xf32> to vector<20x16xf32>
    %50 = tpu.transpose %49, [1, 0] : vector<20x16xf32> -> vector<16x20xf32>
    %51 = vector.extract_strided_slice %48 {offsets = [0, 0], sizes = [20, 8], strides = [1, 1]} : vector<20x24xf32> to vector<20x8xf32>
    %52 = vector.extract_strided_slice %50 {offsets = [0, 0], sizes = [8, 20], strides = [1, 1]} : vector<16x20xf32> to vector<8x20xf32>
    %53 = vector.extract_strided_slice %50 {offsets = [8, 0], sizes = [8, 20], strides = [1, 1]} : vector<16x20xf32> to vector<8x20xf32>
    %54 = vector.shape_cast %51 : vector<20x8xf32> to vector<20x8x1xf32>
    %55 = vector.shape_cast %52 : vector<8x20xf32> to vector<1x8x20xf32>
    %56 = vector.broadcast %54 : vector<20x8x1xf32> to vector<20x8x20xf32>
    %57 = vector.broadcast %55 : vector<1x8x20xf32> to vector<20x8x20xf32>
    %58 = arith.mulf %56, %57 : vector<20x8x20xf32>
    %59 = vector.broadcast %38 : vector<20x1x20xf32> to vector<20x8x20xf32>
    %60 = arith.addf %58, %59 : vector<20x8x20xf32>
    %cst_17 = arith.constant dense<0xFF800000> : vector<20x8xf32>
    %61 = vector.multi_reduction <maximumf>, %60, %cst_17 [2] : vector<20x8x20xf32> to vector<20x8xf32>
    %62 = vector.shape_cast %61 : vector<20x8xf32> to vector<20x8x1xf32>
    %63 = vector.broadcast %62 : vector<20x8x1xf32> to vector<20x8x20xf32>
    %64 = arith.subf %60, %63 : vector<20x8x20xf32>
    %65 = math.exp %64 : vector<20x8x20xf32>
    %cst_18 = arith.constant dense<0.000000e+00> : vector<20x8xf32>
    %66 = vector.multi_reduction <add>, %65, %cst_18 [2] : vector<20x8x20xf32> to vector<20x8xf32>
    %67 = tpu.reciprocal %66 : vector<20x8xf32> -> vector<20x8xf32>
    %68 = vector.shape_cast %53 : vector<8x20xf32> to vector<1x8x20xf32>
    %69 = vector.broadcast %68 : vector<1x8x20xf32> to vector<20x8x20xf32>
    %70 = arith.mulf %65, %69 : vector<20x8x20xf32>
    %cst_19 = arith.constant dense<0.000000e+00> : vector<20x8xf32>
    %71 = vector.multi_reduction <add>, %70, %cst_19 [2] : vector<20x8x20xf32> to vector<20x8xf32>
    %72 = arith.mulf %71, %67 : vector<20x8xf32>
    %c40 = arith.constant 40 : index
    %c0_20 = arith.constant 0 : index
    %73 = vector.load %arg2[%c40, %c0_20] : memref<240x24xf32, #tpu.memory_space<vmem>>, vector<8x8xf32>
    %cst_21 = arith.constant dense<0.000000e+00> : vector<20x8xf32>
    %74 = tpu.matmul %72, %73, %cst_21 {dimension_numbers = #tpu.dot_dimension_numbers<[1], [0], [0], [1], [0, 0, 1, 1], [], []>, precision = #tpu.contract_precision<fp32>} : vector<20x8xf32>, vector<8x8xf32>, vector<20x8xf32> -> vector<20x8xf32>
    %c48 = arith.constant 48 : index
    %c0_22 = arith.constant 0 : index
    %75 = vector.load %arg2[%c48, %c0_22] : memref<240x24xf32, #tpu.memory_space<vmem>>, vector<1x8xf32>
    %76 = vector.broadcast %75 : vector<1x8xf32> to vector<20x8xf32>
    %77 = arith.addf %74, %76 : vector<20x8xf32>
    %78 = arith.addf %43, %77 : vector<20x8xf32>
    %c56 = arith.constant 56 : index
    %c0_23 = arith.constant 0 : index
    %79 = vector.load %arg2[%c56, %c0_23] : memref<240x24xf32, #tpu.memory_space<vmem>>, vector<2x8xf32>
    %cst_24 = arith.constant dense<0.000000e+00> : vector<20xf32>
    %80 = vector.multi_reduction <add>, %78, %cst_24 [1] : vector<20x8xf32> to vector<20xf32>
    %81 = vector.shape_cast %80 : vector<20xf32> to vector<20x1xf32>
    %cst_25 = arith.constant 8.000000e+00 : f32
    %82 = vector.broadcast %cst_25 : f32 to vector<20x1xf32>
    %83 = arith.divf %81, %82 : vector<20x1xf32>
    %84 = vector.broadcast %83 : vector<20x1xf32> to vector<20x8xf32>
    %85 = arith.subf %78, %84 : vector<20x8xf32>
    %86 = arith.mulf %85, %85 : vector<20x8xf32>
    %cst_26 = arith.constant dense<0.000000e+00> : vector<20xf32>
    %87 = vector.multi_reduction <add>, %86, %cst_26 [1] : vector<20x8xf32> to vector<20xf32>
    %88 = vector.shape_cast %87 : vector<20xf32> to vector<20x1xf32>
    %cst_27 = arith.constant 8.000000e+00 : f32
    %89 = vector.broadcast %cst_27 : f32 to vector<20x1xf32>
    %90 = arith.divf %88, %89 : vector<20x1xf32>
    %cst_28 = arith.constant 9.99999974E-6 : f32
    %91 = vector.broadcast %cst_28 : f32 to vector<20x1xf32>
    %92 = arith.addf %90, %91 : vector<20x1xf32>
    %93 = math.rsqrt %92 : vector<20x1xf32>
    %94 = vector.broadcast %93 : vector<20x1xf32> to vector<20x8xf32>
    %95 = arith.mulf %85, %94 : vector<20x8xf32>
    %96 = vector.extract_strided_slice %79 {offsets = [0, 0], sizes = [1, 8], strides = [1, 1]} : vector<2x8xf32> to vector<1x8xf32>
    %97 = vector.broadcast %96 : vector<1x8xf32> to vector<20x8xf32>
    %98 = arith.mulf %95, %97 : vector<20x8xf32>
    %99 = vector.extract_strided_slice %79 {offsets = [1, 0], sizes = [1, 8], strides = [1, 1]} : vector<2x8xf32> to vector<1x8xf32>
    %100 = vector.broadcast %99 : vector<1x8xf32> to vector<20x8xf32>
    %101 = arith.addf %98, %100 : vector<20x8xf32>
    %c64 = arith.constant 64 : index
    %c0_29 = arith.constant 0 : index
    %102 = vector.load %arg2[%c64, %c0_29] : memref<240x24xf32, #tpu.memory_space<vmem>>, vector<8x16xf32>
    %cst_30 = arith.constant dense<0.000000e+00> : vector<20x16xf32>
    %103 = tpu.matmul %101, %102, %cst_30 {dimension_numbers = #tpu.dot_dimension_numbers<[1], [0], [0], [1], [0, 0, 1, 1], [], []>, precision = #tpu.contract_precision<fp32>} : vector<20x8xf32>, vector<8x16xf32>, vector<20x16xf32> -> vector<20x16xf32>
    %c72 = arith.constant 72 : index
    %c0_31 = arith.constant 0 : index
    %104 = vector.load %arg2[%c72, %c0_31] : memref<240x24xf32, #tpu.memory_space<vmem>>, vector<1x16xf32>
    %105 = vector.broadcast %104 : vector<1x16xf32> to vector<20x16xf32>
    %106 = arith.addf %103, %105 : vector<20x16xf32>
    %cst_32 = arith.constant 0.000000e+00 : f32
    %107 = vector.broadcast %cst_32 : f32 to vector<20x16xf32>
    %108 = arith.maximumf %106, %107 : vector<20x16xf32>
    %c80 = arith.constant 80 : index
    %c0_33 = arith.constant 0 : index
    %109 = vector.load %arg2[%c80, %c0_33] : memref<240x24xf32, #tpu.memory_space<vmem>>, vector<16x8xf32>
    %cst_34 = arith.constant dense<0.000000e+00> : vector<20x8xf32>
    %110 = tpu.matmul %108, %109, %cst_34 {dimension_numbers = #tpu.dot_dimension_numbers<[1], [0], [0], [1], [0, 0, 1, 1], [], []>, precision = #tpu.contract_precision<fp32>} : vector<20x16xf32>, vector<16x8xf32>, vector<20x8xf32> -> vector<20x8xf32>
    %c96 = arith.constant 96 : index
    %c0_35 = arith.constant 0 : index
    %111 = vector.load %arg2[%c96, %c0_35] : memref<240x24xf32, #tpu.memory_space<vmem>>, vector<1x8xf32>
    %112 = vector.broadcast %111 : vector<1x8xf32> to vector<20x8xf32>
    %113 = arith.addf %110, %112 : vector<20x8xf32>
    %114 = arith.addf %101, %113 : vector<20x8xf32>
    %c104 = arith.constant 104 : index
    %c0_36 = arith.constant 0 : index
    %115 = vector.load %arg2[%c104, %c0_36] : memref<240x24xf32, #tpu.memory_space<vmem>>, vector<2x8xf32>
    %cst_37 = arith.constant dense<0.000000e+00> : vector<20xf32>
    %116 = vector.multi_reduction <add>, %114, %cst_37 [1] : vector<20x8xf32> to vector<20xf32>
    %117 = vector.shape_cast %116 : vector<20xf32> to vector<20x1xf32>
    %cst_38 = arith.constant 8.000000e+00 : f32
    %118 = vector.broadcast %cst_38 : f32 to vector<20x1xf32>
    %119 = arith.divf %117, %118 : vector<20x1xf32>
    %120 = vector.broadcast %119 : vector<20x1xf32> to vector<20x8xf32>
    %121 = arith.subf %114, %120 : vector<20x8xf32>
    %122 = arith.mulf %121, %121 : vector<20x8xf32>
    %cst_39 = arith.constant dense<0.000000e+00> : vector<20xf32>
    %123 = vector.multi_reduction <add>, %122, %cst_39 [1] : vector<20x8xf32> to vector<20xf32>
    %124 = vector.shape_cast %123 : vector<20xf32> to vector<20x1xf32>
    %cst_40 = arith.constant 8.000000e+00 : f32
    %125 = vector.broadcast %cst_40 : f32 to vector<20x1xf32>
    %126 = arith.divf %124, %125 : vector<20x1xf32>
    %cst_41 = arith.constant 9.99999974E-6 : f32
    %127 = vector.broadcast %cst_41 : f32 to vector<20x1xf32>
    %128 = arith.addf %126, %127 : vector<20x1xf32>
    %129 = math.rsqrt %128 : vector<20x1xf32>
    %130 = vector.broadcast %129 : vector<20x1xf32> to vector<20x8xf32>
    %131 = arith.mulf %121, %130 : vector<20x8xf32>
    %132 = vector.extract_strided_slice %115 {offsets = [0, 0], sizes = [1, 8], strides = [1, 1]} : vector<2x8xf32> to vector<1x8xf32>
    %133 = vector.broadcast %132 : vector<1x8xf32> to vector<20x8xf32>
    %134 = arith.mulf %131, %133 : vector<20x8xf32>
    %135 = vector.extract_strided_slice %115 {offsets = [1, 0], sizes = [1, 8], strides = [1, 1]} : vector<2x8xf32> to vector<1x8xf32>
    %136 = vector.broadcast %135 : vector<1x8xf32> to vector<20x8xf32>
    %137 = arith.addf %134, %136 : vector<20x8xf32>
    %c0_42 = arith.constant 0 : index
    %c0_43 = arith.constant 0 : index
    %138 = vector.load %arg1[%c0_42, %c0_43] : memref<20x8xf32, #tpu.memory_space<vmem>>, vector<20x8xf32>
    %c112 = arith.constant 112 : index
    %c0_44 = arith.constant 0 : index
    %139 = vector.load %arg2[%c112, %c0_44] : memref<240x24xf32, #tpu.memory_space<vmem>>, vector<8x24xf32>
    %cst_45 = arith.constant dense<0.000000e+00> : vector<20x24xf32>
    %140 = tpu.matmul %138, %139, %cst_45 {dimension_numbers = #tpu.dot_dimension_numbers<[1], [0], [0], [1], [0, 0, 1, 1], [], []>, precision = #tpu.contract_precision<fp32>} : vector<20x8xf32>, vector<8x24xf32>, vector<20x24xf32> -> vector<20x24xf32>
    %c120 = arith.constant 120 : index
    %c0_46 = arith.constant 0 : index
    %141 = vector.load %arg2[%c120, %c0_46] : memref<240x24xf32, #tpu.memory_space<vmem>>, vector<1x24xf32>
    %142 = vector.broadcast %141 : vector<1x24xf32> to vector<20x24xf32>
    %143 = arith.addf %140, %142 : vector<20x24xf32>
    %144 = vector.extract_strided_slice %143 {offsets = [0, 8], sizes = [20, 16], strides = [1, 1]} : vector<20x24xf32> to vector<20x16xf32>
    %145 = tpu.transpose %144, [1, 0] : vector<20x16xf32> -> vector<16x20xf32>
    %146 = vector.extract_strided_slice %143 {offsets = [0, 0], sizes = [20, 8], strides = [1, 1]} : vector<20x24xf32> to vector<20x8xf32>
    %147 = vector.extract_strided_slice %145 {offsets = [0, 0], sizes = [8, 20], strides = [1, 1]} : vector<16x20xf32> to vector<8x20xf32>
    %148 = vector.extract_strided_slice %145 {offsets = [8, 0], sizes = [8, 20], strides = [1, 1]} : vector<16x20xf32> to vector<8x20xf32>
    %149 = vector.shape_cast %146 : vector<20x8xf32> to vector<20x8x1xf32>
    %150 = vector.shape_cast %147 : vector<8x20xf32> to vector<1x8x20xf32>
    %151 = vector.broadcast %149 : vector<20x8x1xf32> to vector<20x8x20xf32>
    %152 = vector.broadcast %150 : vector<1x8x20xf32> to vector<20x8x20xf32>
    %153 = arith.mulf %151, %152 : vector<20x8x20xf32>
    %154 = vector.broadcast %38 : vector<20x1x20xf32> to vector<20x8x20xf32>
    %155 = arith.addf %153, %154 : vector<20x8x20xf32>
    %cst_47 = arith.constant dense<0xFF800000> : vector<20x8xf32>
    %156 = vector.multi_reduction <maximumf>, %155, %cst_47 [2] : vector<20x8x20xf32> to vector<20x8xf32>
    %157 = vector.shape_cast %156 : vector<20x8xf32> to vector<20x8x1xf32>
    %158 = vector.broadcast %157 : vector<20x8x1xf32> to vector<20x8x20xf32>
    %159 = arith.subf %155, %158 : vector<20x8x20xf32>
    %160 = math.exp %159 : vector<20x8x20xf32>
    %cst_48 = arith.constant dense<0.000000e+00> : vector<20x8xf32>
    %161 = vector.multi_reduction <add>, %160, %cst_48 [2] : vector<20x8x20xf32> to vector<20x8xf32>
    %162 = tpu.reciprocal %161 : vector<20x8xf32> -> vector<20x8xf32>
    %163 = vector.shape_cast %148 : vector<8x20xf32> to vector<1x8x20xf32>
    %164 = vector.broadcast %163 : vector<1x8x20xf32> to vector<20x8x20xf32>
    %165 = arith.mulf %160, %164 : vector<20x8x20xf32>
    %cst_49 = arith.constant dense<0.000000e+00> : vector<20x8xf32>
    %166 = vector.multi_reduction <add>, %165, %cst_49 [2] : vector<20x8x20xf32> to vector<20x8xf32>
    %167 = arith.mulf %166, %162 : vector<20x8xf32>
    %c128 = arith.constant 128 : index
    %c0_50 = arith.constant 0 : index
    %168 = vector.load %arg2[%c128, %c0_50] : memref<240x24xf32, #tpu.memory_space<vmem>>, vector<8x8xf32>
    %cst_51 = arith.constant dense<0.000000e+00> : vector<20x8xf32>
    %169 = tpu.matmul %167, %168, %cst_51 {dimension_numbers = #tpu.dot_dimension_numbers<[1], [0], [0], [1], [0, 0, 1, 1], [], []>, precision = #tpu.contract_precision<fp32>} : vector<20x8xf32>, vector<8x8xf32>, vector<20x8xf32> -> vector<20x8xf32>
    %c136 = arith.constant 136 : index
    %c0_52 = arith.constant 0 : index
    %170 = vector.load %arg2[%c136, %c0_52] : memref<240x24xf32, #tpu.memory_space<vmem>>, vector<1x8xf32>
    %171 = vector.broadcast %170 : vector<1x8xf32> to vector<20x8xf32>
    %172 = arith.addf %169, %171 : vector<20x8xf32>
    %173 = arith.addf %138, %172 : vector<20x8xf32>
    %c144 = arith.constant 144 : index
    %c0_53 = arith.constant 0 : index
    %174 = vector.load %arg2[%c144, %c0_53] : memref<240x24xf32, #tpu.memory_space<vmem>>, vector<2x8xf32>
    %cst_54 = arith.constant dense<0.000000e+00> : vector<20xf32>
    %175 = vector.multi_reduction <add>, %173, %cst_54 [1] : vector<20x8xf32> to vector<20xf32>
    %176 = vector.shape_cast %175 : vector<20xf32> to vector<20x1xf32>
    %cst_55 = arith.constant 8.000000e+00 : f32
    %177 = vector.broadcast %cst_55 : f32 to vector<20x1xf32>
    %178 = arith.divf %176, %177 : vector<20x1xf32>
    %179 = vector.broadcast %178 : vector<20x1xf32> to vector<20x8xf32>
    %180 = arith.subf %173, %179 : vector<20x8xf32>
    %181 = arith.mulf %180, %180 : vector<20x8xf32>
    %cst_56 = arith.constant dense<0.000000e+00> : vector<20xf32>
    %182 = vector.multi_reduction <add>, %181, %cst_56 [1] : vector<20x8xf32> to vector<20xf32>
    %183 = vector.shape_cast %182 : vector<20xf32> to vector<20x1xf32>
    %cst_57 = arith.constant 8.000000e+00 : f32
    %184 = vector.broadcast %cst_57 : f32 to vector<20x1xf32>
    %185 = arith.divf %183, %184 : vector<20x1xf32>
    %cst_58 = arith.constant 9.99999974E-6 : f32
    %186 = vector.broadcast %cst_58 : f32 to vector<20x1xf32>
    %187 = arith.addf %185, %186 : vector<20x1xf32>
    %188 = math.rsqrt %187 : vector<20x1xf32>
    %189 = vector.broadcast %188 : vector<20x1xf32> to vector<20x8xf32>
    %190 = arith.mulf %180, %189 : vector<20x8xf32>
    %191 = vector.extract_strided_slice %174 {offsets = [0, 0], sizes = [1, 8], strides = [1, 1]} : vector<2x8xf32> to vector<1x8xf32>
    %192 = vector.broadcast %191 : vector<1x8xf32> to vector<20x8xf32>
    %193 = arith.mulf %190, %192 : vector<20x8xf32>
    %194 = vector.extract_strided_slice %174 {offsets = [1, 0], sizes = [1, 8], strides = [1, 1]} : vector<2x8xf32> to vector<1x8xf32>
    %195 = vector.broadcast %194 : vector<1x8xf32> to vector<20x8xf32>
    %196 = arith.addf %193, %195 : vector<20x8xf32>
    %c152 = arith.constant 152 : index
    %c0_59 = arith.constant 0 : index
    %197 = vector.load %arg2[%c152, %c0_59] : memref<240x24xf32, #tpu.memory_space<vmem>>, vector<8x24xf32>
    %c160 = arith.constant 160 : index
    %c0_60 = arith.constant 0 : index
    %198 = vector.load %arg2[%c160, %c0_60] : memref<240x24xf32, #tpu.memory_space<vmem>>, vector<1x24xf32>
    %199 = vector.extract_strided_slice %197 {offsets = [0, 0], sizes = [8, 8], strides = [1, 1]} : vector<8x24xf32> to vector<8x8xf32>
    %cst_61 = arith.constant dense<0.000000e+00> : vector<20x8xf32>
    %200 = tpu.matmul %196, %199, %cst_61 {dimension_numbers = #tpu.dot_dimension_numbers<[1], [0], [0], [1], [0, 0, 1, 1], [], []>, precision = #tpu.contract_precision<fp32>} : vector<20x8xf32>, vector<8x8xf32>, vector<20x8xf32> -> vector<20x8xf32>
    %201 = vector.extract_strided_slice %198 {offsets = [0, 0], sizes = [1, 8], strides = [1, 1]} : vector<1x24xf32> to vector<1x8xf32>
    %202 = vector.broadcast %201 : vector<1x8xf32> to vector<20x8xf32>
    %203 = arith.addf %200, %202 : vector<20x8xf32>
    %204 = vector.extract_strided_slice %197 {offsets = [0, 8], sizes = [8, 16], strides = [1, 1]} : vector<8x24xf32> to vector<8x16xf32>
    %cst_62 = arith.constant dense<0.000000e+00> : vector<20x16xf32>
    %205 = tpu.matmul %137, %204, %cst_62 {dimension_numbers = #tpu.dot_dimension_numbers<[1], [0], [0], [1], [0, 0, 1, 1], [], []>, precision = #tpu.contract_precision<fp32>} : vector<20x8xf32>, vector<8x16xf32>, vector<20x16xf32> -> vector<20x16xf32>
    %206 = vector.extract_strided_slice %198 {offsets = [0, 8], sizes = [1, 16], strides = [1, 1]} : vector<1x24xf32> to vector<1x16xf32>
    %207 = vector.broadcast %206 : vector<1x16xf32> to vector<20x16xf32>
    %208 = arith.addf %205, %207 : vector<20x16xf32>
    %209 = tpu.transpose %208, [1, 0] : vector<20x16xf32> -> vector<16x20xf32>
    %210 = vector.extract_strided_slice %209 {offsets = [0, 0], sizes = [8, 20], strides = [1, 1]} : vector<16x20xf32> to vector<8x20xf32>
    %211 = vector.extract_strided_slice %209 {offsets = [8, 0], sizes = [8, 20], strides = [1, 1]} : vector<16x20xf32> to vector<8x20xf32>
    %212 = vector.shape_cast %203 : vector<20x8xf32> to vector<20x8x1xf32>
    %213 = vector.shape_cast %210 : vector<8x20xf32> to vector<1x8x20xf32>
    %214 = vector.broadcast %212 : vector<20x8x1xf32> to vector<20x8x20xf32>
    %215 = vector.broadcast %213 : vector<1x8x20xf32> to vector<20x8x20xf32>
    %216 = arith.mulf %214, %215 : vector<20x8x20xf32>
    %217 = vector.broadcast %38 : vector<20x1x20xf32> to vector<20x8x20xf32>
    %218 = arith.addf %216, %217 : vector<20x8x20xf32>
    %cst_63 = arith.constant dense<0xFF800000> : vector<20x8xf32>
    %219 = vector.multi_reduction <maximumf>, %218, %cst_63 [2] : vector<20x8x20xf32> to vector<20x8xf32>
    %220 = vector.shape_cast %219 : vector<20x8xf32> to vector<20x8x1xf32>
    %221 = vector.broadcast %220 : vector<20x8x1xf32> to vector<20x8x20xf32>
    %222 = arith.subf %218, %221 : vector<20x8x20xf32>
    %223 = math.exp %222 : vector<20x8x20xf32>
    %cst_64 = arith.constant dense<0.000000e+00> : vector<20x8xf32>
    %224 = vector.multi_reduction <add>, %223, %cst_64 [2] : vector<20x8x20xf32> to vector<20x8xf32>
    %225 = tpu.reciprocal %224 : vector<20x8xf32> -> vector<20x8xf32>
    %226 = vector.shape_cast %211 : vector<8x20xf32> to vector<1x8x20xf32>
    %227 = vector.broadcast %226 : vector<1x8x20xf32> to vector<20x8x20xf32>
    %228 = arith.mulf %223, %227 : vector<20x8x20xf32>
    %cst_65 = arith.constant dense<0.000000e+00> : vector<20x8xf32>
    %229 = vector.multi_reduction <add>, %228, %cst_65 [2] : vector<20x8x20xf32> to vector<20x8xf32>
    %230 = arith.mulf %229, %225 : vector<20x8xf32>
    %c168 = arith.constant 168 : index
    %c0_66 = arith.constant 0 : index
    %231 = vector.load %arg2[%c168, %c0_66] : memref<240x24xf32, #tpu.memory_space<vmem>>, vector<8x8xf32>
    %cst_67 = arith.constant dense<0.000000e+00> : vector<20x8xf32>
    %232 = tpu.matmul %230, %231, %cst_67 {dimension_numbers = #tpu.dot_dimension_numbers<[1], [0], [0], [1], [0, 0, 1, 1], [], []>, precision = #tpu.contract_precision<fp32>} : vector<20x8xf32>, vector<8x8xf32>, vector<20x8xf32> -> vector<20x8xf32>
    %c176 = arith.constant 176 : index
    %c0_68 = arith.constant 0 : index
    %233 = vector.load %arg2[%c176, %c0_68] : memref<240x24xf32, #tpu.memory_space<vmem>>, vector<1x8xf32>
    %234 = vector.broadcast %233 : vector<1x8xf32> to vector<20x8xf32>
    %235 = arith.addf %232, %234 : vector<20x8xf32>
    %236 = arith.addf %196, %235 : vector<20x8xf32>
    %c184 = arith.constant 184 : index
    %c0_69 = arith.constant 0 : index
    %237 = vector.load %arg2[%c184, %c0_69] : memref<240x24xf32, #tpu.memory_space<vmem>>, vector<2x8xf32>
    %cst_70 = arith.constant dense<0.000000e+00> : vector<20xf32>
    %238 = vector.multi_reduction <add>, %236, %cst_70 [1] : vector<20x8xf32> to vector<20xf32>
    %239 = vector.shape_cast %238 : vector<20xf32> to vector<20x1xf32>
    %cst_71 = arith.constant 8.000000e+00 : f32
    %240 = vector.broadcast %cst_71 : f32 to vector<20x1xf32>
    %241 = arith.divf %239, %240 : vector<20x1xf32>
    %242 = vector.broadcast %241 : vector<20x1xf32> to vector<20x8xf32>
    %243 = arith.subf %236, %242 : vector<20x8xf32>
    %244 = arith.mulf %243, %243 : vector<20x8xf32>
    %cst_72 = arith.constant dense<0.000000e+00> : vector<20xf32>
    %245 = vector.multi_reduction <add>, %244, %cst_72 [1] : vector<20x8xf32> to vector<20xf32>
    %246 = vector.shape_cast %245 : vector<20xf32> to vector<20x1xf32>
    %cst_73 = arith.constant 8.000000e+00 : f32
    %247 = vector.broadcast %cst_73 : f32 to vector<20x1xf32>
    %248 = arith.divf %246, %247 : vector<20x1xf32>
    %cst_74 = arith.constant 9.99999974E-6 : f32
    %249 = vector.broadcast %cst_74 : f32 to vector<20x1xf32>
    %250 = arith.addf %248, %249 : vector<20x1xf32>
    %251 = math.rsqrt %250 : vector<20x1xf32>
    %252 = vector.broadcast %251 : vector<20x1xf32> to vector<20x8xf32>
    %253 = arith.mulf %243, %252 : vector<20x8xf32>
    %254 = vector.extract_strided_slice %237 {offsets = [0, 0], sizes = [1, 8], strides = [1, 1]} : vector<2x8xf32> to vector<1x8xf32>
    %255 = vector.broadcast %254 : vector<1x8xf32> to vector<20x8xf32>
    %256 = arith.mulf %253, %255 : vector<20x8xf32>
    %257 = vector.extract_strided_slice %237 {offsets = [1, 0], sizes = [1, 8], strides = [1, 1]} : vector<2x8xf32> to vector<1x8xf32>
    %258 = vector.broadcast %257 : vector<1x8xf32> to vector<20x8xf32>
    %259 = arith.addf %256, %258 : vector<20x8xf32>
    %c192 = arith.constant 192 : index
    %c0_75 = arith.constant 0 : index
    %260 = vector.load %arg2[%c192, %c0_75] : memref<240x24xf32, #tpu.memory_space<vmem>>, vector<8x16xf32>
    %cst_76 = arith.constant dense<0.000000e+00> : vector<20x16xf32>
    %261 = tpu.matmul %259, %260, %cst_76 {dimension_numbers = #tpu.dot_dimension_numbers<[1], [0], [0], [1], [0, 0, 1, 1], [], []>, precision = #tpu.contract_precision<fp32>} : vector<20x8xf32>, vector<8x16xf32>, vector<20x16xf32> -> vector<20x16xf32>
    %c200 = arith.constant 200 : index
    %c0_77 = arith.constant 0 : index
    %262 = vector.load %arg2[%c200, %c0_77] : memref<240x24xf32, #tpu.memory_space<vmem>>, vector<1x16xf32>
    %263 = vector.broadcast %262 : vector<1x16xf32> to vector<20x16xf32>
    %264 = arith.addf %261, %263 : vector<20x16xf32>
    %cst_78 = arith.constant 0.000000e+00 : f32
    %265 = vector.broadcast %cst_78 : f32 to vector<20x16xf32>
    %266 = arith.maximumf %264, %265 : vector<20x16xf32>
    %c208 = arith.constant 208 : index
    %c0_79 = arith.constant 0 : index
    %267 = vector.load %arg2[%c208, %c0_79] : memref<240x24xf32, #tpu.memory_space<vmem>>, vector<16x8xf32>
    %cst_80 = arith.constant dense<0.000000e+00> : vector<20x8xf32>
    %268 = tpu.matmul %266, %267, %cst_80 {dimension_numbers = #tpu.dot_dimension_numbers<[1], [0], [0], [1], [0, 0, 1, 1], [], []>, precision = #tpu.contract_precision<fp32>} : vector<20x16xf32>, vector<16x8xf32>, vector<20x8xf32> -> vector<20x8xf32>
    %c224 = arith.constant 224 : index
    %c0_81 = arith.constant 0 : index
    %269 = vector.load %arg2[%c224, %c0_81] : memref<240x24xf32, #tpu.memory_space<vmem>>, vector<1x8xf32>
    %270 = vector.broadcast %269 : vector<1x8xf32> to vector<20x8xf32>
    %271 = arith.addf %268, %270 : vector<20x8xf32>
    %272 = arith.addf %259, %271 : vector<20x8xf32>
    %c232 = arith.constant 232 : index
    %c0_82 = arith.constant 0 : index
    %273 = vector.load %arg2[%c232, %c0_82] : memref<240x24xf32, #tpu.memory_space<vmem>>, vector<2x8xf32>
    %cst_83 = arith.constant dense<0.000000e+00> : vector<20xf32>
    %274 = vector.multi_reduction <add>, %272, %cst_83 [1] : vector<20x8xf32> to vector<20xf32>
    %275 = vector.shape_cast %274 : vector<20xf32> to vector<20x1xf32>
    %cst_84 = arith.constant 8.000000e+00 : f32
    %276 = vector.broadcast %cst_84 : f32 to vector<20x1xf32>
    %277 = arith.divf %275, %276 : vector<20x1xf32>
    %278 = vector.broadcast %277 : vector<20x1xf32> to vector<20x8xf32>
    %279 = arith.subf %272, %278 : vector<20x8xf32>
    %280 = arith.mulf %279, %279 : vector<20x8xf32>
    %cst_85 = arith.constant dense<0.000000e+00> : vector<20xf32>
    %281 = vector.multi_reduction <add>, %280, %cst_85 [1] : vector<20x8xf32> to vector<20xf32>
    %282 = vector.shape_cast %281 : vector<20xf32> to vector<20x1xf32>
    %cst_86 = arith.constant 8.000000e+00 : f32
    %283 = vector.broadcast %cst_86 : f32 to vector<20x1xf32>
    %284 = arith.divf %282, %283 : vector<20x1xf32>
    %cst_87 = arith.constant 9.99999974E-6 : f32
    %285 = vector.broadcast %cst_87 : f32 to vector<20x1xf32>
    %286 = arith.addf %284, %285 : vector<20x1xf32>
    %287 = math.rsqrt %286 : vector<20x1xf32>
    %288 = vector.broadcast %287 : vector<20x1xf32> to vector<20x8xf32>
    %289 = arith.mulf %279, %288 : vector<20x8xf32>
    %290 = vector.extract_strided_slice %273 {offsets = [0, 0], sizes = [1, 8], strides = [1, 1]} : vector<2x8xf32> to vector<1x8xf32>
    %291 = vector.broadcast %290 : vector<1x8xf32> to vector<20x8xf32>
    %292 = arith.mulf %289, %291 : vector<20x8xf32>
    %293 = vector.extract_strided_slice %273 {offsets = [1, 0], sizes = [1, 8], strides = [1, 1]} : vector<2x8xf32> to vector<1x8xf32>
    %294 = vector.broadcast %293 : vector<1x8xf32> to vector<20x8xf32>
    %295 = arith.addf %292, %294 : vector<20x8xf32>
    %cst_88 = arith.constant 0.000000e+00 : f32
    %296 = vector.broadcast %cst_88 : f32 to vector<20x8xf32>
    %297 = arith.subf %296, %295 : vector<20x8xf32>
    %298 = math.exp %297 : vector<20x8xf32>
    %cst_89 = arith.constant 1.000000e+00 : f32
    %299 = vector.broadcast %cst_89 : f32 to vector<20x8xf32>
    %300 = arith.addf %299, %298 : vector<20x8xf32>
    %cst_90 = arith.constant 1.000000e+00 : f32
    %301 = vector.broadcast %cst_90 : f32 to vector<20x8xf32>
    %302 = arith.divf %301, %300 : vector<20x8xf32>
    %c0_91 = arith.constant 0 : index
    %c0_92 = arith.constant 0 : index
    %303 = vector.load %arg3[%c0_91, %c0_92] : memref<20x8xf32, #tpu.memory_space<vmem>>, vector<20x8xf32>
    tpu.vector_store %arg3[%c0_91, %c0_92], %302 {strides = array<i32>} : memref<20x8xf32, #tpu.memory_space<vmem>>, vector<20x8xf32>,
    return
  }
}

</mosaic_0001>

<bundles_post_ra>
// kernel: _lambda_.1
= control target key start
LH: loop header
LB: loop body
LE: loop exit
PB: predicated region body
PF: predicated region fallthrough
CT: control target
= control target key end

     0   :  { %v12092_v0 = vmov 0.0   ;;  %vm9918_vm0 = vmmov 0   ;;  %vm217_vm1 = vcmask 64512   ;;  %v14_v60 = vlaneseq  ;;  %s9919_s27 = smov 120   ;;  %s12088_s2 = inlined_call_operand.vmem [shape: f32[240,24], index: 2, kind: input, shape index: {}]   ;;  %s12089_s0 = inlined_call_operand.vmem [shape: f32[20,8], index: 0, kind: input, shape index: {}]   ;;  %s12090_s1 = inlined_call_operand.vmem [shape: f32[20,8], index: 1, kind: input, shape index: {}]   ;;  %s12091_s3 = inlined_call_operand.vmem [shape: f32[20,8], index: 3, kind: output, shape index: {}]  }
   0x1   :  { %8877 = vmatprep.subr.mxu0 %v12092_v0  ;;  %v211_v1 = vld [vmem:[%s12088_s2 + $0x18] sm:$0xff]  ;;  %8888 = vmatprep.subr.mxu1 %v12092_v0  ;;  %v199_v2 = vld [vmem:[%s12089_s0] sm:$0xff]  ;;  %v200_v6 = vld [vmem:[%s12089_s0 + $0x8] sm:$0xff]  ;;  %vm1083_vm4 = vcmask 162816   ;;  %vm1490_vm6 = vcmask 1041409   ;;  %vm1492_vm7 = vcmask 1042434  }
   0x2   :  { %v205_v3 = vld [vmem:[%s12088_s2] sm:$0xff]  ;;  %v258_v4 = vand.u32 4294901760, %v211_v1  ;;  %8879 = vmatprep.mubr.msk.f32.mxu0 %vm9918_vm0, %v12092_v0  ;;  %8890 = vmatprep.mubr.msk.f32.mxu1 %vm9918_vm0, %v12092_v0  ;;  %v202_v5 = vmul.f32 2.828427, %v199_v2  ;;  %v206_v7 = vld [vmem:[%s12088_s2 + $0x8] sm:$0xff]  ;;  %vm1494_vm8 = vcmask 1043459  }
   0x3   :  { %v203_v8 = vmul.f32 2.828427, %v200_v6  ;;  %v201_v9 = vld [vmem:[%s12089_s0 + $0x10] sm:$0xf]  ;;  %v8591_v49 = vld [vmem:[%s12088_s2 + $0x20] ss:$0 sm:$0xff] }
   0x4   :  { %v207_v10 = vld [vmem:[%s12088_s2 + $0x10] sm:$0xf]  ;;  %8878 = vmatpush3.msra.mxu0 %v258_v4  ;;  %v355_v11 = vsub.f32 %v211_v1, %v258_v4  ;;  %v9969_v12 = vadd.f32 %v205_v3, %v202_v5  ;;  %v204_v13 = vmul.f32 2.828427, %v201_v9  ;;  %v10031_v3 = vshrl.u32 %v14_v60, 7 }
   0x5   :  { %8899 = vmatprep.subr.mxu0 %v12092_v0  ;;  %v9972_v14 = vadd.f32 %v206_v7, %v203_v8  ;;  %vm1496_vm9 = vcmask 1044484   ;;  %vm1498_vm10 = vcmask 1045509   ;;  %vm1500_vm11 = vcmask 1046534  }
   0x6   :  { %v356_v15 = vand.u32 4294901760, %v355_v11  ;;  %v219_v16 = vsel %vm217_vm1, %v9969_v12, 0  ;;  %v9976_v17 = vadd.f32 %v207_v10, %v204_v13  ;;  %v10034_v10 = vsub.s32 0, %v10031_v3 }
   0x7   :  { %v293_v18 = vand.u32 4294901760, %v219_v16  ;;  %v222_v19 = vsel %vm217_vm1, %v9972_v14, 0  ;;  %vm1502_vm12 = vcmask 1047559   ;;  %vm2062_vm13 = vcmask 60416  }
   0x8   :  { %v357_v20 = vsub.f32 %v355_v11, %v356_v15  ;;  %v303_v21 = vand.u32 4294901760, %v222_v19  ;;  %v225_v22 = vsel %vm217_vm1, %v9976_v17, 0  ;;  %vm2668_vm14 = vcmask 130048  }
   0x9   :  { %v294_v23 = vsub.f32 %v219_v16, %v293_v18  ;;  %v313_v24 = vand.u32 4294901760, %v225_v22 }
   0xa   :  { %v358_v25 = vand.u32 4294901760, %v357_v20  ;;  %v304_v26 = vsub.f32 %v222_v19, %v303_v21 }
   0xb   :  { %v295_v27 = vand.u32 4294901760, %v294_v23  ;;  %v314_v28 = vsub.f32 %v225_v22, %v313_v24  ;;  %v10042_v22 = vsub.s32 2, %v10031_v3 }
   0xc   :  { %8889 = vmatpush3.msra.mxu1 %v358_v25  ;;  %v305_v29 = vand.u32 4294901760, %v304_v26 }
   0xd   :  { %v296_v30 = vsub.f32 %v294_v23, %v295_v27  ;;  %8891 = vmatmul.mubr.f32.vlgmr.msra.gmra.mxu1 %v293_v18  ;;  %8910 = vmatprep.subr.mxu1 %v12092_v0  ;;  %v315_v31 = vand.u32 4294901760, %v314_v28 }
   0xe   :  { %8911 = vmatpush3.msra.mxu1 %v258_v4  ;;  %8893 = vmatprep.mubr.msk.f32.mxu1 %vm9918_vm0, %v12092_v0  ;;  %v306_v32 = vsub.f32 %v304_v26, %v305_v29 }
   0xf   :  { %v297_v33 = vand.u32 4294901760, %v296_v30  ;;  %8932 = vmatprep.subr.mxu1 %v12092_v0  ;;  %v316_v35 = vsub.f32 %v314_v28, %v315_v31 }
  0x10   :  { %v307_v34 = vand.u32 4294901760, %v306_v32 }
  0x11   :  { %8880 = vmatmul.mubr.f32.vlgmr.msra.gmra.mxu0 %v297_v33  ;;  %8894 = vmatmul.mubr.f32.gmra.mxu1 %v303_v21  ;;  %v317_v36 = vand.u32 4294901760, %v316_v35 }
  0x12   :  { %8900 = vmatpush3.msra.mxu0 %v355_v11  ;;  %8882 = vmatprep.mubr.msk.f32.mxu0 %vm9918_vm0, %v12092_v0 }
  0x13   :  { %8896 = vmatprep.mubr.msk.f32.mxu1 %vm9918_vm0, %v12092_v0  ;;  %8921 = vmatprep.subr.mxu0 %v12092_v0 }
  0x15   :  { %8883 = vmatmul.mubr.f32.gmra.mxu0 %v307_v34  ;;  %8897 = vmatmul.mubr.f32.gmra.mxu1 %v313_v24  ;;  %v10054_v34 = vsub.s32 5, %v10031_v3 }
  0x16   :  { %8885 = vmatprep.mubr.msk.f32.mxu0 %vm9918_vm0, %v12092_v0  ;;  %8912 = vmatprep.mubr.msk.f32.mxu1 %vm9918_vm0, %v12092_v0 }
  0x19   :  { %8886 = vmatmul.mubr.f32.gmra.mxu0 %v317_v36  ;;  %8913 = vmatmul.mubr.f32.vlgmr.msra.gmra.mxu1 %v295_v27  ;;  %v10046_v27 = vsub.s32 3, %v10031_v3 }
  0x1a   :  { %8901 = vmatprep.mubr.msk.f32.mxu0 %vm9918_vm0, %v12092_v0  ;;  %8933 = vmatpush3.msra.mxu1 %v258_v4 }
  0x1b   :  { %8915 = vmatprep.mubr.msk.f32.mxu1 %vm9918_vm0, %v12092_v0  ;;  %8954 = vmatprep.subr.mxu1 %v12092_v0 }
  0x1d   :  { %8902 = vmatmul.mubr.f32.vlgmr.msra.gmra.mxu0 %v294_v23  ;;  %8916 = vmatmul.mubr.f32.gmra.mxu1 %v305_v29 }
  0x1e   :  { %8922 = vmatpush3.msra.mxu0 %v356_v15  ;;  %8904 = vmatprep.mubr.msk.f32.mxu0 %vm9918_vm0, %v12092_v0 }
  0x1f   :  { %8918 = vmatprep.mubr.msk.f32.mxu1 %vm9918_vm0, %v12092_v0  ;;  %8943 = vmatprep.subr.mxu0 %v12092_v0 }
  0x21   :  { %8905 = vmatmul.mubr.f32.gmra.mxu0 %v304_v26  ;;  %8919 = vmatmul.mubr.f32.gmra.mxu1 %v315_v31  ;;  %v10050_v31 = vsub.s32 4, %v10031_v3 }
  0x22   :  { %8907 = vmatprep.mubr.msk.f32.mxu0 %vm9918_vm0, %v12092_v0  ;;  %8934 = vmatprep.mubr.msk.f32.mxu1 %vm9918_vm0, %v12092_v0 }
  0x25   :  { %8908 = vmatmul.mubr.f32.gmra.mxu0 %v314_v28  ;;  %8935 = vmatmul.mubr.f32.vlgmr.msra.gmra.mxu1 %v293_v18 }
  0x26   :  { %8923 = vmatprep.mubr.msk.f32.mxu0 %vm9918_vm0, %v12092_v0  ;;  %8937 = vmatprep.mubr.msk.f32.mxu1 %vm9918_vm0, %v12092_v0 }
  0x29   :  { %8924 = vmatmul.mubr.f32.vlgmr.msra.gmra.mxu0 %v293_v18  ;;  %8938 = vmatmul.mubr.f32.gmra.mxu1 %v303_v21  ;;  %v10037_v18 = vsub.s32 1, %v10031_v3 }
  0x2a   :  { %8926 = vmatprep.mubr.msk.f32.mxu0 %vm9918_vm0, %v12092_v0  ;;  %8940 = vmatprep.mubr.msk.f32.mxu1 %vm9918_vm0, %v12092_v0 }
  0x2d   :  { %8927 = vmatmul.mubr.f32.gmra.mxu0 %v303_v21  ;;  %8941 = vmatmul.mubr.f32.gmra.mxu1 %v313_v24 }
  0x2e   :  { %8929 = vmatprep.mubr.msk.f32.mxu0 %vm9918_vm0, %v12092_v0  ;;  %8956 = vmatprep.mubr.msk.f32.mxu1 %vm9918_vm0, %v12092_v0 }
  0x31   :  { %8930 = vmatmul.mubr.f32.gmra.mxu0 %v313_v24 }
  0x32   :  { %8945 = vmatprep.mubr.msk.f32.mxu0 %vm9918_vm0, %v12092_v0 }
  0xcd   :  { %v395_v37 = vpop.f32.mrf.mxu1 }
  0xcf   :  { %v8892_v38 = vpop.f32.mrf.mxu1 }
  0xd1   :  { %v299_v39 = vpop.f32.mrf.mxu0  ;;  %v401_v40 = vpop.f32.mrf.mxu1 }
  0xd2   :  { %v300_v54 = vadd.f32 %v8591_v49, %v299_v39 }
  0xd3   :  { %v8881_v41 = vpop.f32.mrf.mxu0  ;;  %v8895_v42 = vpop.f32.mrf.mxu1 }
  0xd4   :  { %v396_v59 = vadd.f32 %v395_v37, %v300_v54  ;;  %v10058_v37 = vsub.s32 6, %v10031_v3  ;;  %v10063_v42 = vsub.s32 7, %v10031_v3 }
  0xd5   :  { %v309_v43 = vpop.f32.mrf.mxu0  ;;  %v10023_v44 = vpop.f32.mrf.mxu1 }
  0xd6   :  { %v310_v15 = vadd.f32 %v8591_v49, %v309_v43 }
  0xd7   :  { %v8884_v45 = vpop.f32.mrf.mxu0  ;;  %v8898_v46 = vpop.f32.mrf.mxu1 }
  0xd8   :  { %v402_v25 = vadd.f32 %v401_v40, %v310_v15 }
  0xd9   :  { %v319_v47 = vpop.f32.mrf.mxu0  ;;  %v569_v48 = vpop.f32.mrf.mxu1 }
  0xda   :  { %v320_v40 = vadd.f32 %v8591_v49, %v319_v47 }
  0xdb   :  { %v8887_v50 = vpop.f32.mrf.mxu0  ;;  %v8914_v51 = vpop.f32.mrf.mxu1 }
  0xdc   :  { %v408_v45 = vadd.f32 %v10023_v44, %v320_v40 }
  0xdd   :  { %v481_v52 = vpop.f32.mrf.mxu0  ;;  %v577_v53 = vpop.f32.mrf.mxu1 }
  0xde   :  { %v482_v63 = vadd.f32 %v481_v52, %v396_v59 }
  0xdf   :  { %v8903_v55 = vpop.f32.mrf.mxu0  ;;  %v8917_v56 = vpop.f32.mrf.mxu1 }
  0xe0   :  { %v570_v6 = vadd.f32 %v569_v48, %v482_v63 }
  0xe1   :  { %v488_v57 = vpop.f32.mrf.mxu0  ;;  %v10028_v58 = vpop.f32.mrf.mxu1 }
  0xe2   :  { %v489_v29 = vadd.f32 %v488_v57, %v402_v25  ;;  %v17_v25 = vadd.s32 16, %v10031_v3 }
  0xe3   :  { %v8906_v61 = vpop.f32.mrf.mxu0  ;;  %v8920_v62 = vpop.f32.mrf.mxu1 }
  0xe4   :  { %v578_v35 = vadd.f32 %v577_v53, %v489_v29 }
  0xe5   :  { %v495_v1 = vpop.f32.mrf.mxu0  ;;  %v743_v2 = vpop.f32.mrf.mxu1 }
  0xe6   :  { %v496_v48 = vadd.f32 %v495_v1, %v408_v45 }
  0xe7   :  { %v8909_v4 = vpop.f32.mrf.mxu0  ;;  %v8936_v5 = vpop.f32.mrf.mxu1 }
  0xe8   :  { %v586_v49 = vadd.f32 %v10028_v58, %v496_v48 }
  0xe9   :  { %v659_v7 = vpop.f32.mrf.mxu0  ;;  %v749_v8 = vpop.f32.mrf.mxu1 }
  0xea   :  { %v660_v9 = vadd.f32 %v659_v7, %v570_v6 }
  0xeb   :  { %v8925_v11 = vpop.f32.mrf.mxu0  ;;  %v8939_v13 = vpop.f32.mrf.mxu1 }
  0xec   :  { %v744_v16 = vadd.f32 %v743_v2, %v660_v9 }
  0xed   :  { %v665_v19 = vpop.f32.mrf.mxu0  ;;  %v755_v20 = vpop.f32.mrf.mxu1 }
  0xee   :  { %762 = vrot.lane.b32.xlu0 %v744_v16, %s9919_s27  ;;  %v806_v21 = vrot.slane %v744_v16, %v10034_v10  ;;  %v813_v26 = vrot.slane %v744_v16, %v10037_v18  ;;  %v820_v30 = vrot.slane %v744_v16, %v10042_v22  ;;  %v827_v33 = vrot.slane %v744_v16, %v10046_v27 }
  0xef   :  { %v8928_v23 = vpop.f32.mrf.mxu0  ;;  %v8942_v24 = vpop.f32.mrf.mxu1  ;;  %v834_v36 = vrot.slane %v744_v16, %v10050_v31  ;;  %v666_v38 = vadd.f32 %v665_v19, %v578_v35  ;;  %v841_v39 = vrot.slane %v744_v16, %v10054_v34  ;;  %v848_v41 = vrot.slane %v744_v16, %v10058_v37 }
  0xf0   :  { %808 = vbcast.lane.b32.xlu1 %v806_v21, 256  ;;  %v855_v46 = vrot.slane %v744_v16, %v10063_v42  ;;  %v10095_v19 = vand.u32 127, %v14_v60  ;;  %v9920_v23 = vmov 1966171168  }
  0xf1   :  { %v671_v28 = vpop.f32.mrf.mxu0  ;;  %v750_v43 = vadd.f32 %v749_v8, %v666_v38  ;;  %v79_v24 = vunpack.c.l.s4 %v9920_v23 }
  0xf2   :  { %815 = vbcast.lane.b32.xlu0 %v813_v26, 256  ;;  %v672_v52 = vadd.f32 %v671_v28, %v586_v49  ;;  %v60_v21 = vand.u32 1, %v10095_v19  ;;  %v9921_v28 = vmov -1e+09  }
  0xf3   :  { %v8931_v32 = vpop.f32.mrf.mxu0  ;;  %v869_v50 = vrot.slane %v750_v43, %v10037_v18  ;;  %v862_v47 = vrot.slane %v750_v43, %v10034_v10  ;;  %v876_v51 = vrot.slane %v750_v43, %v10042_v22  ;;  %v890_v44 = vrot.slane %v750_v43, %v10050_v31 }
  0xf4   :  { %822 = vbcast.lane.b32.xlu1 %v820_v30, 256  ;;  %v883_v53 = vrot.slane %v750_v43, %v10046_v27  ;;  %v756_v54 = vadd.f32 %v755_v20, %v672_v52  ;;  %v897_v55 = vrot.slane %v750_v43, %v10054_v34  ;;  %v904_v56 = vrot.slane %v750_v43, %v10058_v37 }
  0xf5   :  { %v911_v57 = vrot.slane %v750_v43, %v10063_v42  ;;  %v24_v20 = vand.u32 1, %v10031_v3  ;;  %v80_v26 = vunpack.c.0.s8 %v79_v24  ;;  %v38_v32 = vand.u32 1, %v17_v25 }
  0xf6   :  { %829 = vbcast.lane.b32.xlu0 %v827_v33, 256  ;;  %v918_v58 = vrot.slane %v756_v54, %v10034_v10  ;;  %v925_v59 = vrot.slane %v756_v54, %v10037_v18  ;;  %v932_v61 = vrot.slane %v756_v54, %v10042_v22  ;;  %v939_v62 = vrot.slane %v756_v54, %v10046_v27 }
  0xf7   :  { %vm68_vm2 = vcmp.eq.s32.totalorder %v24_v20, %v60_v21  ;;  %v10103_v35 = vsub.s32 %v80_v26, %v10031_v3  ;;  %vm70_vm3 = vcmp.eq.s32.totalorder %v38_v32, %v60_v21  ;;  %v16_v52 = vadd.s32 8, %v10031_v3 }
  0xf8   :  { %836 = vbcast.lane.b32.xlu1 %v834_v36, 256  ;;  %v71_v29 = vsel %vm68_vm2, 0.0, %v9921_v28 }
  0xf9   :  { %v77_v33 = vcombine.high %v71_v29, %v71_v29  ;;  %v84_v38 = vrot.slane %v71_v29, %v10103_v35 }
  0xfa   :  { %843 = vbcast.lane.b32.xlu0 %v841_v39, 256  ;;  %v73_v39 = vsel %vm70_vm3, 0.0, %v9921_v28 }
  0xfb   :  { %v91_v60 = vrot.slane %v77_v33, %v10103_v35 }
  0xfc   :  { %850 = vbcast.lane.b32.xlu1 %v848_v41, 256  ;;  %v10108_v41 = vrot.slane %v73_v39, %v10103_v35 }
  0xfd   :  { %v93_v40 = vcombine.high %v91_v60, %v91_v60 }
  0xfe   :  { %764 = vrot.lane.b32.xlu0 %v750_v43, %s9919_s27  ;;  %v92_v43 = vcombine.high %v84_v38, %v84_v38  ;;  %v189_v48 = vrot.slane %v10108_v41, %v10103_v35 }
 0x100   :  { %857 = vbcast.lane.b32.xlu1 %v855_v46, 256  ;;  %v100_v46 = vrot.slane %v84_v38, %v10103_v35 }
 0x102   :  { %871 = vbcast.lane.b32.xlu0 %v869_v50, 256  ;;  %v10114_v50 = vrot.slane %v93_v40, %v10103_v35 }
 0x104   :  { %864 = vbcast.lane.b32.xlu1 %v862_v47, 256  ;;  %v114_v47 = vrot.slane %v92_v43, %v10103_v35  ;;  %v10119_v49 = vrot.slane %v10114_v50, %v10034_v10 }
 0x106   :  { %878 = vbcast.lane.b32.xlu0 %v876_v51, 256  ;;  %v10122_v51 = vrot.slane %v100_v46, %v10034_v10 }
 0x108   :  { %892 = vbcast.lane.b32.xlu1 %v890_v44, 256 }
 0x10a   :  { %885 = vbcast.lane.b32.xlu0 %v883_v53, 256  ;;  %v10128_v53 = vrot.slane %v189_v48, %v10034_v10 }
 0x10c   :  { %766 = vrot.lane.b32.xlu1 %v756_v54, %s9919_s27  ;;  %v10131_v54 = vrot.slane %v114_v47, %v10034_v10 }
 0x10e   :  { %899 = vbcast.lane.b32.xlu0 %v897_v55, 256  ;;  %v197_v55 = vcombine.high %v189_v48, %v189_v48 }
 0x110   :  { %906 = vbcast.lane.b32.xlu1 %v904_v56, 256  ;;  %v122_v56 = vcombine.high %v100_v46, %v100_v46  ;;  %v10145_v23 = vrot.slane %v197_v55, %v10034_v10 }
 0x112   :  { %913 = vbcast.lane.b32.xlu0 %v911_v57, 256 }
 0x114   :  { %920 = vbcast.lane.b32.xlu1 %v918_v58, 256 }
 0x116   :  { %927 = vbcast.lane.b32.xlu0 %v925_v59, 256 }
 0x118   :  { %934 = vbcast.lane.b32.xlu1 %v932_v61, 256 }
 0x11a   :  { %941 = vbcast.lane.b32.xlu0 %v939_v62, 256 }
 0x160   :  { %v763_v63 = vpop.permute.xlu0 %762 }
 0x161   :  { %771 = vxpose.xlu1.b32.start [1/3] (short) (narrow) %v763_v63, 16 }
 0x162   :  { %v809_v1 = vpop.permute.xlu1 %808 }
 0x164   :  { %v816_v2 = vpop.permute.xlu0 %815 }
 0x166   :  { %v823_v4 = vpop.permute.xlu1 %822 }
 0x168   :  { %v10082_v5 = vpop.permute.xlu0 %829 }
 0x16a   :  { %v10084_v6 = vpop.permute.xlu1 %836 }
 0x16c   :  { %v844_v7 = vpop.permute.xlu0 %843 }
 0x16e   :  { %v10086_v8 = vpop.permute.xlu1 %850 }
 0x170   :  { %v765_v9 = vpop.permute.xlu0 %764 }
 0x171   :  { %772 = vxpose.xlu1.b32.cont [2/3] (short) (narrow) %v765_v9, 16  ;;  %v124_v9 = vcombine.high %v114_v47, %v114_v47 }
 0x172   :  { %v10088_v11 = vpop.permute.xlu1 %857 }
 0x173   :  { %v10164_v29 = vrot.slane %v124_v9, %v10034_v10 }
 0x176   :  { %v10090_v13 = vpop.permute.xlu1 %864 }
 0x17a   :  { %v10092_v15 = vpop.permute.xlu1 %892 }
 0x17e   :  { %v767_v16 = vpop.permute.xlu1 %766 }
 0x17f   :  { %773 = vxpose.xlu1.b32.end [3/3] (short) (narrow) %v767_v16, 16  ;;  %v31_v16 = vand.u32 1, %v16_v52 }
 0x181   :  { %vm69_vm5 = vcmp.eq.s32.totalorder %v31_v16, %v60_v21  ;;  %v107_v21 = vrot.slane %v91_v60, %v10103_v35 }
 0x182   :  { %v10100_v30 = vpop.permute.xlu1 %906 }
 0x183   :  { %v10179_v40 = vrot.slane %v107_v21, %v10034_v10 }
 0x186   :  { %v921_v36 = vpop.permute.xlu1 %920 }
 0x18a   :  { %v935_v45 = vpop.permute.xlu1 %934 }
 0x1f3   :  { %v10125_v44 = vpop.trf.xlu1 }
 0x1f4   :  { %v948_v57 = vmul.f32 %v844_v7, %v10125_v44  ;;  %v943_v58 = vmul.f32 %v809_v1, %v10125_v44  ;;  %v959_v59 = vmul.f32 %v921_v36, %v10125_v44  ;;  %v944_v61 = vmul.f32 %v816_v2, %v10125_v44 }
 0x1f5   :  { %v961_v20 = vmul.f32 %v935_v45, %v10125_v44  ;;  %v945_v1 = vmul.f32 %v823_v4, %v10125_v44  ;;  %v10149_v7 = vrot.slane %v122_v56, %v10034_v10  ;;  %v946_v4 = vmul.f32 %v10082_v5, %v10125_v44 }
 0x1f6   :  { %v10138_v62 = vadd.f32 %v10119_v49, %v948_v57  ;;  %v10141_v63 = vadd.f32 %v10122_v51, %v943_v58  ;;  %v10156_v25 = vadd.f32 %v10128_v53, %v959_v59  ;;  %v10159_v26 = vadd.f32 %v10131_v54, %v944_v61  ;;  %v872_v57 = vpop.permute.xlu0 %871 }
 0x1f7   :  { %v10171_v36 = vadd.f32 %v10145_v23, %v961_v20  ;;  %v10174_v38 = vadd.f32 %v10149_v7, %v945_v1  ;;  %v72_v5 = vsel %vm69_vm5, 0.0, %v9921_v28  ;;  %v10186_v46 = vadd.f32 %v10164_v29, %v946_v4 }
 0x1f8   :  { %v1099_v2 = vsel %vm1083_vm4, %v10138_v62, -inf  ;;  %v1084_v24 = vsel %vm1083_vm4, %v10141_v63, -inf  ;;  %v1132_v32 = vsel %vm1083_vm4, %v10156_v25, -inf  ;;  %v1087_v33 = vsel %vm1083_vm4, %v10159_v26, -inf }
 0x1f9   :  { %1100 = vmax.xlane.f32.xlu1 %v1099_v2  ;;  %1085 = vmax.xlane.f32.xlu0 %v1084_v24  ;;  %v133_v39 = vrot.slane %v72_v5, %v10103_v35  ;;  %v1138_v43 = vsel %vm1083_vm4, %v10171_v36, -inf  ;;  %v1090_v45 = vsel %vm1083_vm4, %v10174_v38, -inf  ;;  %v947_v48 = vmul.f32 %v10084_v6, %v10125_v44 }
 0x1fa   :  { %v1093_v47 = vsel %vm1083_vm4, %v10186_v46, -inf  ;;  %v951_v55 = vmul.f32 %v10090_v13, %v10125_v44  ;;  %v123_v58 = vcombine.high %v107_v21, %v107_v21  ;;  %v952_v9 = vmul.f32 %v872_v57, %v10125_v44  ;;  %v879_v4 = vpop.permute.xlu0 %878 }
 0x1fb   :  { %v149_v28 = vrot.slane %v133_v39, %v10103_v35  ;;  %v141_v60 = vcombine.high %v133_v39, %v133_v39  ;;  %v10194_v52 = vadd.f32 %v10179_v40, %v947_v48  ;;  %v949_v2 = vmul.f32 %v10086_v8, %v10125_v44 }
 0x1fc   :  { %v10219_v24 = vrot.slane %v123_v58, %v10034_v10  ;;  %v953_v39 = vmul.f32 %v879_v4, %v10125_v44  ;;  %v126_v8 = vcombine.high %v72_v5, %v72_v5 }
 0x1fd   :  { %1133 = vmax.xlane.f32.xlu1 %v1132_v32  ;;  %1088 = vmax.xlane.f32.xlu0 %v1087_v33  ;;  %v10199_v56 = vrot.slane %v149_v28, %v10034_v10  ;;  %v163_v6 = vrot.slane %v141_v60, %v10103_v35  ;;  %v1096_v59 = vsel %vm1083_vm4, %v10194_v52, -inf  ;;  %v171_v13 = vcombine.high %v149_v28, %v149_v28 }
 0x1fe   :  { %v125_v32 = vcombine.high %v10114_v50, %v10114_v50  ;;  %v10226_v21 = vadd.f32 %v10219_v24, %v949_v2  ;;  %v950_v28 = vmul.f32 %v10088_v11, %v10125_v44 }
 0x1ff   :  { %v10205_v61 = vadd.f32 %v10199_v56, %v951_v55  ;;  %v10209_v16 = vrot.slane %v163_v6, %v10034_v10  ;;  %v173_v60 = vcombine.high %v163_v6, %v163_v6  ;;  %v886_v55 = vpop.permute.xlu0 %885 }
 0x200   :  { %v1102_v48 = vsel %vm1083_vm4, %v10226_v21, -inf  ;;  %v954_v58 = vmul.f32 %v886_v55, %v10125_v44 }
 0x201   :  { %1139 = vmax.xlane.f32.xlu1 %v1138_v43  ;;  %1091 = vmax.xlane.f32.xlu0 %v1090_v45  ;;  %v1108_v20 = vsel %vm1083_vm4, %v10205_v61, -inf  ;;  %v10214_v1 = vadd.f32 %v10209_v16, %v952_v9  ;;  %v10230_v43 = vrot.slane %v171_v13, %v10034_v10  ;;  %v10233_v45 = vrot.slane %v125_v32, %v10034_v10 }
 0x203   :  { %v1111_v33 = vsel %vm1083_vm4, %v10214_v1, -inf  ;;  %v10238_v50 = vadd.f32 %v10230_v43, %v953_v39  ;;  %v10246_v57 = vadd.f32 %v10233_v45, %v950_v28  ;;  %v900_v4 = vpop.permute.xlu0 %899 }
 0x205   :  { %1094 = vmax.xlane.f32.xlu0 %v1093_v47  ;;  %v140_v47 = vrot.slane %v126_v8, %v10103_v35  ;;  %v1114_v5 = vsel %vm1083_vm4, %v10238_v50, -inf  ;;  %v1105_v6 = vsel %vm1083_vm4, %v10246_v57, -inf }
 0x207   :  { %v142_v9 = vcombine.high %v140_v47, %v140_v47  ;;  %v156_v11 = vrot.slane %v140_v47, %v10103_v35  ;;  %v182_v47 = vcombine.high %v10108_v41, %v10108_v41 }
 0x209   :  { %1097 = vmax.xlane.f32.xlu0 %v1096_v59  ;;  %v10250_v59 = vrot.slane %v173_v60, %v10034_v10  ;;  %v10261_v2 = vrot.slane %v156_v11, %v10034_v10  ;;  %v170_v32 = vrot.slane %v142_v9, %v10103_v35  ;;  %v172_v28 = vcombine.high %v156_v11, %v156_v11 }
 0x20a   :  { %v196_v11 = vrot.slane %v182_v47, %v10103_v35 }
 0x20b   :  { %v10256_v13 = vadd.f32 %v10250_v59, %v954_v58  ;;  %v174_v60 = vcombine.high %v170_v32, %v170_v32  ;;  %v957_v58 = vmul.f32 %v10100_v30, %v10125_v44  ;;  %v10283_v9 = vrot.slane %v172_v28, %v10034_v10 }
 0x20c   :  { %v10296_v30 = vrot.slane %v196_v11, %v10034_v10  ;;  %v198_v28 = vcombine.high %v196_v11, %v196_v11 }
 0x20d   :  { %1109 = vmax.xlane.f32.xlu0 %v1108_v20  ;;  %v955_v20 = vmul.f32 %v10092_v15, %v10125_v44  ;;  %v1117_v39 = vsel %vm1083_vm4, %v10256_v13, -inf  ;;  %v914_v15 = vpop.permute.xlu0 %913  ;;  %v10289_v41 = vadd.f32 %v10283_v9, %v957_v58 }
 0x20e   :  { %12106 = vst [vmem:[#allocation3_spill] sm:$0xff] %v10296_v30  ;;  %v10311_v58 = vrot.slane %v198_v28, %v10034_v10 }
 0x20f   :  { %v10270_v8 = vadd.f32 %v10261_v2, %v955_v20  ;;  %v958_v20 = vmul.f32 %v914_v15, %v10125_v44 }
 0x210   :  { %12107 = vst [vmem:[#allocation4_spill] sm:$0xff] %v10311_v58 }
 0x211   :  { %1112 = vmax.xlane.f32.xlu0 %v1111_v33  ;;  %v10265_v33 = vrot.slane %v170_v32, %v10034_v10  ;;  %v1120_v55 = vsel %vm1083_vm4, %v10270_v8, -inf  ;;  %v928_v32 = vpop.permute.xlu0 %927 }
 0x215   :  { %1103 = vmax.xlane.f32.xlu0 %v1102_v48  ;;  %v956_v48 = vmul.f32 %v900_v4, %v10125_v44  ;;  %v10293_v4 = vrot.slane %v174_v60, %v10034_v10  ;;  %v942_v47 = vpop.permute.xlu0 %941 }
 0x217   :  { %12105 = vst [vmem:[#allocation2_spill] sm:$0xff] %v10293_v4  ;;  %v10301_v35 = vadd.f32 %v10293_v4, %v958_v20 }
 0x219   :  { %1115 = vmax.xlane.f32.xlu0 %v1114_v5  ;;  %v10278_v5 = vadd.f32 %v10265_v33, %v956_v48  ;;  %v960_v48 = vmul.f32 %v928_v32, %v10125_v44  ;;  %v1129_v15 = vsel %vm1083_vm4, %v10301_v35, -inf }
 0x21b   :  { %v10307_v60 = vadd.f32 %v10296_v30, %v960_v48  ;;  %v10321_v48 = vpop.trf.xlu1 }
 0x21d   :  { %1106 = vmax.xlane.f32.xlu0 %v1105_v6  ;;  %v1123_v6 = vsel %vm1083_vm4, %v10278_v5, -inf }
 0x221   :  { %1118 = vmax.xlane.f32.xlu0 %v1117_v39  ;;  %v1126_v39 = vsel %vm1083_vm4, %v10289_v41, -inf }
 0x225   :  { %1121 = vmax.xlane.f32.xlu0 %v1120_v55  ;;  %v962_v55 = vmul.f32 %v942_v47, %v10125_v44 }
 0x227   :  { %v10316_v20 = vadd.f32 %v10311_v58, %v962_v55 }
 0x229   :  { %1124 = vmax.xlane.f32.xlu0 %v1123_v6  ;;  %v1135_v6 = vsel %vm1083_vm4, %v10307_v60, -inf  ;;  %v1141_v11 = vsel %vm1083_vm4, %v10316_v20, -inf }
 0x22d   :  { %1127 = vmax.xlane.f32.xlu0 %v1126_v39 }
 0x231   :  { %1130 = vmax.xlane.f32.xlu0 %v1129_v15 }
 0x235   :  { %1136 = vmax.xlane.f32.xlu0 %v1135_v6 }
 0x239   :  { %1142 = vmax.xlane.f32.xlu0 %v1141_v11 }
 0x282   :  { %v1086_v32 = vpop.xlane.xlu0 %1085  ;;  %v1101_v0 = vpop.xlane.xlu1 %1100 }
 0x283   :  { %v1144_v39 = vsub.f32 %v10141_v63, %v1086_v32  ;;  %v1149_v6 = vsub.f32 %v10138_v62, %v1101_v0 }
 0x285   :  { %v1164_v44 = vmul.f32 1.442695, %v1144_v39  ;;  %v1174_v32 = vmul.f32 1.442695, %v1149_v6 }
 0x286   :  { %v1089_v28 = vpop.xlane.xlu0 %1088 }
 0x287   :  { %9632 = vpow2.f32 %v1164_v44  ;;  %v1145_v47 = vsub.f32 %v10159_v26, %v1089_v28 }
 0x289   :  { %v1166_v15 = vmul.f32 1.442695, %v1145_v47 }
 0x28a   :  { %v1092_v30 = vpop.xlane.xlu0 %1091 }
 0x28b   :  { %9634 = vpow2.f32 %v1166_v15  ;;  %v1146_v55 = vsub.f32 %v10174_v38, %v1092_v30 }
 0x28d   :  { %v1168_v58 = vmul.f32 1.442695, %v1146_v55 }
 0x28e   :  { %v1095_v11 = vpop.xlane.xlu0 %1094 }
 0x28f   :  { %9636 = vpow2.f32 %v1168_v58  ;;  %v1147_v63 = vsub.f32 %v10186_v46, %v1095_v11 }
 0x291   :  { %v1170_v4 = vmul.f32 1.442695, %v1147_v63 }
 0x292   :  { %v1098_v39 = vpop.xlane.xlu0 %1097 }
 0x293   :  { %9638 = vpow2.f32 %v1170_v4  ;;  %v1148_v44 = vsub.f32 %v10194_v52, %v1098_v39 }
 0x294   :  { %v10328_v26 = vpop.eup %9632  ;;  %9640 = vpow2.f32 %v1174_v32 }
 0x295   :  { %v1172_v28 = vmul.f32 1.442695, %v1148_v44  ;;  %v1204_v38 = vsel %vm1083_vm4, %v10328_v26, 0.0 }
 0x296   :  { %1205 = vadd.xlane.f32.xlu1 %v1204_v38  ;;  %v1110_v0 = vpop.xlane.xlu0 %1109 }
 0x297   :  { %9642 = vpow2.f32 %v1172_v28  ;;  %v1152_v62 = vsub.f32 %v10205_v61, %v1110_v0 }
 0x298   :  { %v10333_v30 = vpop.eup %9634 }
 0x299   :  { %v1180_v46 = vmul.f32 1.442695, %v1152_v62  ;;  %v1207_v4 = vsel %vm1083_vm4, %v10333_v30, 0.0 }
 0x29a   :  { %1208 = vadd.xlane.f32.xlu0 %v1207_v4  ;;  %v1113_v52 = vpop.xlane.xlu0 %1112 }
 0x29b   :  { %9644 = vpow2.f32 %v1180_v46  ;;  %v1153_v58 = vsub.f32 %v10214_v1, %v1113_v52 }
 0x29c   :  { %v10338_v47 = vpop.eup %9636 }
 0x29d   :  { %v1182_v15 = vmul.f32 1.442695, %v1153_v58  ;;  %v1210_v55 = vsel %vm1083_vm4, %v10338_v47, 0.0 }
 0x29e   :  { %1211 = vadd.xlane.f32.xlu1 %v1210_v55  ;;  %v1104_v6 = vpop.xlane.xlu0 %1103 }
 0x29f   :  { %9646 = vpow2.f32 %v1182_v15  ;;  %v1150_v61 = vsub.f32 %v10226_v21, %v1104_v6 }
 0x2a0   :  { %v10343_v11 = vpop.eup %9638 }
 0x2a1   :  { %v1176_v63 = vmul.f32 1.442695, %v1150_v61  ;;  %v1213_v32 = vsel %vm1083_vm4, %v10343_v11, 0.0  ;;  %v10347_v39 = vpop.eup %9640 }
 0x2a2   :  { %1214 = vadd.xlane.f32.xlu0 %v1213_v32  ;;  %v1116_v1 = vpop.xlane.xlu0 %1115  ;;  %v1219_v21 = vsel %vm1083_vm4, %v10347_v39, 0.0 }
 0x2a3   :  { %9648 = vpow2.f32 %v1176_v63  ;;  %v1154_v44 = vsub.f32 %v10238_v50, %v1116_v1  ;;  %v1134_v1 = vpop.xlane.xlu1 %1133 }
 0x2a4   :  { %v10350_v28 = vpop.eup %9642 }
 0x2a5   :  { %v1184_v38 = vmul.f32 1.442695, %v1154_v44  ;;  %v1216_v0 = vsel %vm1083_vm4, %v10350_v28, 0.0 }
 0x2a6   :  { %1217 = vadd.xlane.f32.xlu1 %v1216_v0  ;;  %v1107_v62 = vpop.xlane.xlu0 %1106  ;;  %1220 = vadd.xlane.f32.xlu0 %v1219_v21 }
 0x2a7   :  { %9650 = vpow2.f32 %v1184_v38  ;;  %v1151_v46 = vsub.f32 %v10246_v57, %v1107_v62  ;;  %v1160_v62 = vsub.f32 %v10156_v25, %v1134_v1 }
 0x2a8   :  { %v10357_v4 = vpop.eup %9644 }
 0x2a9   :  { %v1178_v52 = vmul.f32 1.442695, %v1151_v46  ;;  %v1228_v50 = vsel %vm1083_vm4, %v10357_v4, 0.0 }
 0x2aa   :  { %1229 = vadd.xlane.f32.xlu1 %v1228_v50  ;;  %v1119_v58 = vpop.xlane.xlu0 %1118 }
 0x2ab   :  { %9652 = vpow2.f32 %v1178_v52  ;;  %v1155_v15 = vsub.f32 %v10256_v13, %v1119_v58  ;;  %v1140_v52 = vpop.xlane.xlu1 %1139 }
 0x2ac   :  { %v10362_v55 = vpop.eup %9646 }
 0x2ad   :  { %v1186_v6 = vmul.f32 1.442695, %v1155_v15  ;;  %v1231_v61 = vsel %vm1083_vm4, %v10362_v55, 0.0 }
 0x2ae   :  { %v1122_v63 = vpop.xlane.xlu0 %1121  ;;  %1232 = vadd.xlane.f32.xlu0 %v1231_v61  ;;  %v1162_v61 = vsub.f32 %v10171_v36, %v1140_v52 }
 0x2af   :  { %9654 = vpow2.f32 %v1186_v6  ;;  %v1156_v57 = vsub.f32 %v10270_v8, %v1122_v63  ;;  %v1196_v6 = vmul.f32 1.442695, %v1160_v62 }
 0x2b0   :  { %v10367_v32 = vpop.eup %9648 }
 0x2b1   :  { %v1188_v44 = vmul.f32 1.442695, %v1156_v57  ;;  %v1222_v38 = vsel %vm1083_vm4, %v10367_v32, 0.0 }
 0x2b2   :  { %1223 = vadd.xlane.f32.xlu1 %v1222_v38  ;;  %v1125_v13 = vpop.xlane.xlu0 %1124 }
 0x2b3   :  { %9656 = vpow2.f32 %v1188_v44  ;;  %v1157_v0 = vsub.f32 %v10278_v5, %v1125_v13  ;;  %v1200_v44 = vmul.f32 1.442695, %v1162_v61 }
 0x2b4   :  { %v10372_v21 = vpop.eup %9650 }
 0x2b5   :  { %v1190_v46 = vmul.f32 1.442695, %v1157_v0  ;;  %v1234_v8 = vsel %vm1083_vm4, %v10372_v21, 0.0 }
 0x2b6   :  { %v1128_v50 = vpop.xlane.xlu0 %1127  ;;  %1235 = vadd.xlane.f32.xlu0 %v1234_v8 }
 0x2b7   :  { %9658 = vpow2.f32 %v1190_v46  ;;  %v1158_v58 = vsub.f32 %v10289_v41, %v1128_v50 }
 0x2b8   :  { %v10378_v15 = vpop.eup %9652 }
 0x2b9   :  { %v1192_v5 = vmul.f32 1.442695, %v1158_v58  ;;  %v1225_v63 = vsel %vm1083_vm4, %v10378_v15, 0.0 }
 0x2ba   :  { %1226 = vadd.xlane.f32.xlu1 %v1225_v63  ;;  %v1131_v25 = vpop.xlane.xlu0 %1130 }
 0x2bb   :  { %9660 = vpow2.f32 %v1192_v5  ;;  %v1159_v57 = vsub.f32 %v10301_v35, %v1131_v25 }
 0x2bc   :  { %v10384_v1 = vpop.eup %9654  ;;  %9662 = vpow2.f32 %v1196_v6 }
 0x2bd   :  { %v1194_v38 = vmul.f32 1.442695, %v1159_v57  ;;  %v1237_v41 = vsel %vm1083_vm4, %v10384_v1, 0.0 }
 0x2be   :  { %v1137_v13 = vpop.xlane.xlu0 %1136  ;;  %1238 = vadd.xlane.f32.xlu0 %v1237_v41  ;;  %v1284_v41 = vmul.f32 %v10328_v26, %v10321_v48  ;;  %v1287_v26 = vmul.f32 %v10343_v11, %v10321_v48 }
 0x2bf   :  { %9664 = vpow2.f32 %v1194_v38  ;;  %v1161_v36 = vsub.f32 %v10307_v60, %v1137_v13 }
 0x2c0   :  { %v10389_v0 = vpop.eup %9656  ;;  %9666 = vpow2.f32 %v1200_v44 }
 0x2c1   :  { %v1198_v62 = vmul.f32 1.442695, %v1161_v36  ;;  %v1240_v35 = vsel %vm1083_vm4, %v10389_v0, 0.0 }
 0x2c2   :  { %1241 = vadd.xlane.f32.xlu1 %v1240_v35  ;;  %v1143_v46 = vpop.xlane.xlu0 %1142  ;;  %v1285_v35 = vmul.f32 %v10333_v30, %v10321_v48 }
 0x2c3   :  { %9668 = vpow2.f32 %v1198_v62  ;;  %v1163_v8 = vsub.f32 %v10316_v20, %v1143_v46  ;;  %v1304_v62 = vsel %vm1083_vm4, %v1284_v41, 0.0  ;;  %v1286_v46 = vmul.f32 %v10338_v47, %v10321_v48 }
 0x2c4   :  { %v9659_v52 = vpop.eup %9658  ;;  %v1289_v47 = vmul.f32 %v10347_v39, %v10321_v48  ;;  %v1291_v41 = vmul.f32 %v10378_v15, %v10321_v48 }
 0x2c5   :  { %v1202_v50 = vmul.f32 1.442695, %v1163_v8  ;;  %v1243_v58 = vsel %vm1083_vm4, %v9659_v52, 0.0  ;;  %v1307_v8 = vsel %vm1083_vm4, %v1285_v35, 0.0  ;;  %v1297_v15 = vmul.f32 %v9659_v52, %v10321_v48 }
 0x2c6   :  { %1244 = vadd.xlane.f32.xlu0 %v1243_v58  ;;  %v1288_v58 = vmul.f32 %v10350_v28, %v10321_v48  ;;  %v1293_v28 = vmul.f32 %v10362_v55, %v10321_v48  ;;  %v1325_v55 = vsel %vm1083_vm4, %v1291_v41, 0.0 }
 0x2c7   :  { %9670 = vpow2.f32 %v1202_v50  ;;  %v1310_v50 = vsel %vm1083_vm4, %v1286_v46, 0.0 }
 0x2c8   :  { %v9661_v6 = vpop.eup %9660  ;;  %v1316_v30 = vsel %vm1083_vm4, %v1288_v58, 0.0 }
 0x2c9   :  { %v1246_v60 = vsel %vm1083_vm4, %v9661_v6, 0.0  ;;  %v9663_v61 = vpop.eup %9662  ;;  %v1298_v46 = vmul.f32 %v9661_v6, %v10321_v48 }
 0x2ca   :  { %1247 = vadd.xlane.f32.xlu1 %v1246_v60  ;;  %v1252_v25 = vsel %vm1083_vm4, %v9663_v61, 0.0  ;;  %v1313_v60 = vsel %vm1083_vm4, %v1287_v26, 0.0 }
 0x2cc   :  { %v9665_v5 = vpop.eup %9664 }
 0x2cd   :  { %v1249_v63 = vsel %vm1083_vm4, %v9665_v5, 0.0  ;;  %v9667_v57 = vpop.eup %9666 }
 0x2ce   :  { %1250 = vadd.xlane.f32.xlu0 %v1249_v63  ;;  %1253 = vadd.xlane.f32.xlu1 %v1252_v25  ;;  %v1258_v38 = vsel %vm1083_vm4, %v9667_v57, 0.0  ;;  %v1292_v63 = vmul.f32 %v10357_v4, %v10321_v48  ;;  %v1319_v25 = vsel %vm1083_vm4, %v1289_v47, 0.0  ;;  %v1294_v4 = vmul.f32 %v10372_v21, %v10321_v48 }
 0x2cf   :  { %v1302_v6 = vmul.f32 %v9667_v57, %v10321_v48 }
 0x2d0   :  { %v9669_v20 = vpop.eup %9668  ;;  %v1328_v11 = vsel %vm1083_vm4, %v1292_v63, 0.0 }
 0x2d1   :  { %v1255_v44 = vsel %vm1083_vm4, %v9669_v20, 0.0  ;;  %v1301_v52 = vmul.f32 %v9669_v20, %v10321_v48  ;;  %v12108_v20 = vmov 0.0  }
 0x2d2   :  { %1256 = vadd.xlane.f32.xlu0 %v1255_v44  ;;  %1259 = vadd.xlane.f32.xlu1 %v1258_v38  ;;  %v1290_v44 = vmul.f32 %v10367_v32, %v10321_v48  ;;  %v1331_v38 = vsel %vm1083_vm4, %v1293_v28, 0.0  ;;  %v1295_v32 = vmul.f32 %v10384_v1, %v10321_v48  ;;  %v1299_v1 = vmul.f32 %v9665_v5, %v10321_v48 }
 0x2d4   :  { %v9671_v13 = vpop.eup %9670  ;;  %v1322_v39 = vsel %vm1083_vm4, %v1290_v44, 0.0  ;;  %v1337_v35 = vsel %vm1083_vm4, %v1295_v32, 0.0  ;;  %v1349_v26 = vsel %vm1083_vm4, %v1299_v1, 0.0 }
 0x2d5   :  { %v1261_v36 = vsel %vm1083_vm4, %v9671_v13, 0.0  ;;  %v1303_v5 = vmul.f32 %v9671_v13, %v10321_v48 }
 0x2d6   :  { %1262 = vadd.xlane.f32.xlu0 %v1261_v36  ;;  %1305 = vadd.xlane.f32.xlu1 %v1304_v62  ;;  %v1334_v36 = vsel %vm1083_vm4, %v1294_v4, 0.0  ;;  %v1296_v62 = vmul.f32 %v10389_v0, %v10321_v48  ;;  %v1300_v0 = vmul.f32 %v9663_v61, %v10321_v48  ;;  %v1384_v61 = vld [vmem:[%s12088_s2 + $0x28] sm:$0xff] }
 0x2d7   :  { %v1361_v47 = vsel %vm1083_vm4, %v1303_v5, 0.0  ;;  %v10457_v63 = vand.u32 4294901760, %v1384_v61 }
 0x2d8   :  { %v1340_v21 = vsel %vm1083_vm4, %v1296_v62, 0.0  ;;  %v1352_v58 = vsel %vm1083_vm4, %v1300_v0, 0.0 }
 0x2d9   :  { %v10460_v57 = vsub.f32 %v1384_v61, %v10457_v63  ;;  %8944 = vmatpush3.msra.mxu0 %v10457_v63 }
 0x2da   :  { %1308 = vadd.xlane.f32.xlu0 %v1307_v8  ;;  %1311 = vadd.xlane.f32.xlu1 %v1310_v50  ;;  %v1343_v8 = vsel %vm1083_vm4, %v1297_v15, 0.0  ;;  %v1346_v50 = vsel %vm1083_vm4, %v1298_v46, 0.0 }
 0x2db   :  { %8965 = vmatprep.subr.mxu0 %v12108_v20  ;;  %v1649_v48 = vand.u32 4294901760, %v10460_v57 }
 0x2dd   :  { %v1650_v13 = vsub.f32 %v10460_v57, %v1649_v48 }
 0x2de   :  { %1314 = vadd.xlane.f32.xlu0 %v1313_v60  ;;  %1317 = vadd.xlane.f32.xlu1 %v1316_v30  ;;  %v1355_v60 = vsel %vm1083_vm4, %v1301_v52, 0.0  ;;  %v1358_v30 = vsel %vm1083_vm4, %v1302_v6, 0.0 }
 0x2e2   :  { %1320 = vadd.xlane.f32.xlu0 %v1319_v25  ;;  %1329 = vadd.xlane.f32.xlu1 %v1328_v11  ;;  %v1651_v25 = vand.u32 4294901760, %v1650_v13 }
 0x2e4   :  { %8955 = vmatpush3.msra.mxu1 %v1651_v25  ;;  %v10479_v25 = vsub.s32 %v10095_v19, %v10031_v3 }
 0x2e5   :  { %8976 = vmatprep.subr.mxu1 %v12108_v20 }
 0x2e6   :  { %1332 = vadd.xlane.f32.xlu0 %v1331_v38  ;;  %1323 = vadd.xlane.f32.xlu1 %v1322_v39 }
 0x2ea   :  { %1335 = vadd.xlane.f32.xlu0 %v1334_v36  ;;  %1326 = vadd.xlane.f32.xlu1 %v1325_v55 }
 0x2ee   :  { %1338 = vadd.xlane.f32.xlu0 %v1337_v35  ;;  %1341 = vadd.xlane.f32.xlu1 %v1340_v21 }
 0x2f2   :  { %1344 = vadd.xlane.f32.xlu0 %v1343_v8  ;;  %1347 = vadd.xlane.f32.xlu1 %v1346_v50 }
 0x2f6   :  { %1350 = vadd.xlane.f32.xlu0 %v1349_v26  ;;  %1353 = vadd.xlane.f32.xlu1 %v1352_v58 }
 0x2fa   :  { %1356 = vadd.xlane.f32.xlu0 %v1355_v60  ;;  %1359 = vadd.xlane.f32.xlu1 %v1358_v30 }
 0x2fe   :  { %1362 = vadd.xlane.f32.xlu0 %v1361_v47 }
 0x31f   :  { %v1206_v11 = vpop.xlane.xlu1 %1205 }
 0x323   :  { %v1209_v28 = vpop.xlane.xlu0 %1208 }
 0x324   :  { %9672 = vrcp.f32 %v1209_v28 }
 0x325   :  { %9674 = vrcp.f32 %v1206_v11 }
 0x327   :  { %v1212_v44 = vpop.xlane.xlu1 %1211 }
 0x328   :  { %9676 = vrcp.f32 %v1212_v44 }
 0x32b   :  { %v1215_v38 = vpop.xlane.xlu0 %1214 }
 0x32c   :  { %9678 = vrcp.f32 %v1215_v38 }
 0x32f   :  { %v1218_v39 = vpop.xlane.xlu1 %1217  ;;  %v1221_v4 = vpop.xlane.xlu0 %1220 }
 0x330   :  { %9680 = vrcp.f32 %v1218_v39 }
 0x331   :  { %9682 = vrcp.f32 %v1221_v4  ;;  %v9673_v60 = vpop.eup %9672 }
 0x332   :  { %v9675_v5 = vpop.eup %9674 }
 0x333   :  { %v1230_v41 = vpop.xlane.xlu1 %1229 }
 0x335   :  { %v9677_v13 = vpop.eup %9676 }
 0x337   :  { %v1233_v36 = vpop.xlane.xlu0 %1232 }
 0x339   :  { %v9679_v28 = vpop.eup %9678 }
 0x33b   :  { %v1224_v55 = vpop.xlane.xlu1 %1223 }
 0x33c   :  { %9684 = vrcp.f32 %v1224_v55 }
 0x33d   :  { %9686 = vrcp.f32 %v1230_v41 }
 0x33e   :  { %9688 = vrcp.f32 %v1233_v36  ;;  %v9681_v36 = vpop.eup %9680 }
 0x33f   :  { %v1236_v32 = vpop.xlane.xlu0 %1235 }
 0x340   :  { %9690 = vrcp.f32 %v1236_v32  ;;  %v9683_v32 = vpop.eup %9682 }
 0x343   :  { %v1227_v62 = vpop.xlane.xlu1 %1226 }
 0x344   :  { %9692 = vrcp.f32 %v1227_v62 }
 0x347   :  { %v1239_v35 = vpop.xlane.xlu0 %1238 }
 0x348   :  { %9694 = vrcp.f32 %v1239_v35 }
 0x34b   :  { %v1242_v21 = vpop.xlane.xlu1 %1241 }
 0x34c   :  { %9696 = vrcp.f32 %v1242_v21 }
 0x34f   :  { %v1245_v15 = vpop.xlane.xlu0 %1244 }
 0x350   :  { %9698 = vrcp.f32 %v1245_v15 }
 0x353   :  { %v1248_v46 = vpop.xlane.xlu1 %1247 }
 0x354   :  { %9700 = vrcp.f32 %v1248_v46 }
 0x357   :  { %v1251_v8 = vpop.xlane.xlu0 %1250  ;;  %v10469_v50 = vpop.xlane.xlu1 %1253 }
 0x358   :  { %9702 = vrcp.f32 %v1251_v8 }
 0x359   :  { %9704 = vrcp.f32 %v10469_v50 }
 0x35b   :  { %v10471_v1 = vpop.xlane.xlu0 %1256  ;;  %v10473_v0 = vpop.xlane.xlu1 %1259 }
 0x35c   :  { %9706 = vrcp.f32 %v10471_v1 }
 0x35d   :  { %9708 = vrcp.f32 %v10473_v0 }
 0x35f   :  { %v10475_v26 = vpop.xlane.xlu0 %1262  ;;  %v1306_v58 = vpop.xlane.xlu1 %1305 }
 0x360   :  { %v1364_v11 = vmul.f32 %v9675_v5, %v1306_v58  ;;  %v9685_v58 = vpop.eup %9684  ;;  %9710 = vrcp.f32 %v10475_v26 }
 0x362   :  { %v1413_v55 = vrot.slane %v1364_v11, %v10479_v25 }
 0x363   :  { %v1309_v52 = vpop.xlane.xlu0 %1308  ;;  %v1312_v6 = vpop.xlane.xlu1 %1311 }
 0x364   :  { %v1365_v30 = vmul.f32 %v9673_v60, %v1309_v52  ;;  %v1366_v44 = vmul.f32 %v9677_v13, %v1312_v6  ;;  %v9687_v60 = vpop.eup %9686 }
 0x365   :  { %v9689_v5 = vpop.eup %9688 }
 0x366   :  { %v1417_v38 = vrot.slane %v1365_v30, %v10479_v25  ;;  %v1421_v3 = vrot.slane %v1366_v44, %v10479_v25  ;;  %v9691_v13 = vpop.eup %9690 }
 0x367   :  { %v1315_v61 = vpop.xlane.xlu0 %1314  ;;  %v1318_v47 = vpop.xlane.xlu1 %1317 }
 0x368   :  { %v1367_v39 = vmul.f32 %v9679_v28, %v1315_v61  ;;  %v1368_v19 = vmul.f32 %v9681_v36, %v1318_v47  ;;  %v1491_v62 = vsel %vm1490_vm6, %v1417_v38, %v1413_v55  ;;  %v9693_v28 = vpop.eup %9692 }
 0x369   :  { %v1493_v61 = vsel %vm1492_vm7, %v1421_v3, %v1491_v62 }
 0x36a   :  { %v1425_v35 = vrot.slane %v1367_v39, %v10479_v25  ;;  %v1429_v15 = vrot.slane %v1368_v19, %v10479_v25 }
 0x36b   :  { %v1321_v4 = vpop.xlane.xlu0 %1320  ;;  %v1330_v41 = vpop.xlane.xlu1 %1329 }
 0x36c   :  { %v1369_v21 = vmul.f32 %v9683_v32, %v1321_v4  ;;  %v1495_v46 = vsel %vm1494_vm8, %v1425_v35, %v1493_v61  ;;  %v1372_v4 = vmul.f32 %v9687_v60, %v1330_v41  ;;  %v9695_v32 = vpop.eup %9694 }
 0x36d   :  { %v1497_v8 = vsel %vm1496_vm9, %v1429_v15, %v1495_v46  ;;  %v9697_v35 = vpop.eup %9696 }
 0x36e   :  { %v1433_v47 = vrot.slane %v1369_v21, %v10479_v25  ;;  %v1445_v1 = vrot.slane %v1372_v4, %v10479_v25 }
 0x36f   :  { %v1333_v52 = vpop.xlane.xlu0 %1332  ;;  %v1324_v6 = vpop.xlane.xlu1 %1323 }
 0x370   :  { %v1370_v30 = vmul.f32 %v9685_v58, %v1324_v6  ;;  %v1373_v11 = vmul.f32 %v9689_v5, %v1333_v52  ;;  %v1499_v3 = vsel %vm1498_vm10, %v1433_v47, %v1497_v8 }
 0x372   :  { %v1437_v44 = vrot.slane %v1370_v30, %v10479_v25  ;;  %v1449_v19 = vrot.slane %v1373_v11, %v10479_v25  ;;  %v9699_v30 = vpop.eup %9698 }
 0x373   :  { %v1336_v38 = vpop.xlane.xlu0 %1335  ;;  %v1327_v39 = vpop.xlane.xlu1 %1326 }
 0x374   :  { %v1374_v36 = vmul.f32 %v9691_v13, %v1336_v38  ;;  %v1371_v55 = vmul.f32 %v9693_v28, %v1327_v39  ;;  %v1501_v50 = vsel %vm1500_vm11, %v1437_v44, %v1499_v3  ;;  %v1504_v5 = vsel %vm1490_vm6, %v1449_v19, %v1445_v1  ;;  %v9701_v13 = vpop.eup %9700 }
 0x376   :  { %v1441_v62 = vrot.slane %v1371_v55, %v10479_v25  ;;  %v1453_v41 = vrot.slane %v1374_v36, %v10479_v25  ;;  %v9703_v55 = vpop.eup %9702 }
 0x377   :  { %v1339_v21 = vpop.xlane.xlu0 %1338  ;;  %v1342_v58 = vpop.xlane.xlu1 %1341 }
 0x378   :  { %v1503_v52 = vsel %vm1502_vm12, %v1441_v62, %v1501_v50  ;;  %v1375_v6 = vmul.f32 %v9695_v32, %v1339_v21  ;;  %v1376_v60 = vmul.f32 %v9697_v35, %v1342_v58  ;;  %v1505_v46 = vsel %vm1492_vm7, %v1453_v41, %v1504_v5  ;;  %v9705_v41 = vpop.eup %9704 }
 0x379   :  { %v1514_v0 = vsel %vm217_vm1, %v1503_v52, 0  ;;  %v9707_v21 = vpop.eup %9706 }
 0x37a   :  { %v10505_v61 = vand.u32 4294901760, %v1514_v0  ;;  %v1457_v15 = vrot.slane %v1375_v6, %v10479_v25  ;;  %v1461_v47 = vrot.slane %v1376_v60, %v10479_v25  ;;  %v9709_v6 = vpop.eup %9708 }
 0x37b   :  { %v1345_v11 = vpop.xlane.xlu0 %1344  ;;  %v1348_v28 = vpop.xlane.xlu1 %1347 }
 0x37c   :  { %v10511_v44 = vsub.f32 %v1514_v0, %v10505_v61  ;;  %v1506_v38 = vsel %vm1494_vm8, %v1457_v15, %v1505_v46  ;;  %v1377_v39 = vmul.f32 %v9699_v30, %v1345_v11  ;;  %v1378_v26 = vmul.f32 %v9701_v13, %v1348_v28  ;;  %8957 = vmatmul.mubr.f32.vlgmr.msra.gmra.mxu1 %v10505_v61 }
 0x37d   :  { %8959 = vmatprep.mubr.msk.f32.mxu1 %vm9918_vm0, %v12108_v20  ;;  %8977 = vmatpush3.msra.mxu1 %v10457_v63  ;;  %v1507_v8 = vsel %vm1496_vm9, %v1461_v47, %v1506_v38  ;;  %v9711_v38 = vpop.eup %9710 }
 0x37e   :  { %v1465_v4 = vrot.slane %v1377_v39, %v10479_v25  ;;  %v1588_v36 = vand.u32 4294901760, %v10511_v44  ;;  %8998 = vmatprep.subr.mxu1 %v12108_v20  ;;  %v1469_v32 = vrot.slane %v1378_v26, %v10479_v25 }
 0x37f   :  { %v1351_v3 = vpop.xlane.xlu0 %1350  ;;  %v1354_v19 = vpop.xlane.xlu1 %1353 }
 0x380   :  { %v1508_v62 = vsel %vm1498_vm10, %v1465_v4, %v1507_v8  ;;  %v1379_v35 = vmul.f32 %v9703_v55, %v1351_v3  ;;  %v1589_v50 = vsub.f32 %v10511_v44, %v1588_v36  ;;  %v1380_v1 = vmul.f32 %v9705_v41, %v1354_v19 }
 0x381   :  { %v1509_v60 = vsel %vm1500_vm11, %v1469_v32, %v1508_v62 }
 0x382   :  { %v1473_v58 = vrot.slane %v1379_v35, %v10479_v25  ;;  %v1590_v52 = vand.u32 4294901760, %v1589_v50  ;;  %v1477_v47 = vrot.slane %v1380_v1, %v10479_v25 }
 0x383   :  { %v1357_v0 = vpop.xlane.xlu0 %1356  ;;  %v1360_v30 = vpop.xlane.xlu1 %1359 }
 0x384   :  { %v1510_v5 = vsel %vm1502_vm12, %v1473_v58, %v1509_v60  ;;  %v1381_v15 = vmul.f32 %v9707_v21, %v1357_v0  ;;  %v1382_v13 = vmul.f32 %v9709_v6, %v1360_v30  ;;  %8946 = vmatmul.mubr.f32.vlgmr.msra.gmra.mxu0 %v1590_v52 }
 0x385   :  { %v1516_v46 = vsel %vm217_vm1, %v1510_v5, 0  ;;  %8948 = vmatprep.mubr.msk.f32.mxu0 %vm9918_vm0, %v12108_v20  ;;  %8966 = vmatpush3.msra.mxu0 %v10460_v57 }
 0x386   :  { %v1481_v11 = vrot.slane %v1381_v15, %v10479_v25  ;;  %v1596_v28 = vand.u32 4294901760, %v1516_v46  ;;  %8987 = vmatprep.subr.mxu0 %v12108_v20  ;;  %v1485_v39 = vrot.slane %v1382_v13, %v10479_v25 }
 0x387   :  { %v1363_v26 = vpop.xlane.xlu0 %1362 }
 0x388   :  { %v1511_v4 = vsel %vm1490_vm6, %v1481_v11, %v1477_v47  ;;  %v1383_v55 = vmul.f32 %v9711_v38, %v1363_v26  ;;  %8960 = vmatmul.mubr.f32.gmra.mxu1 %v1596_v28  ;;  %v1597_v8 = vsub.f32 %v1516_v46, %v1596_v28  ;;  %v8592_v11 = vld [vmem:[%s12088_s2 + $0x30] ss:$0 sm:$0xff] }
 0x389   :  { %8962 = vmatprep.mubr.msk.f32.mxu1 %vm9918_vm0, %v12108_v20  ;;  %v1512_v19 = vsel %vm1492_vm7, %v1485_v39, %v1511_v4 }
 0x38a   :  { %v1489_v32 = vrot.slane %v1383_v55, %v10479_v25  ;;  %v1598_v3 = vand.u32 4294901760, %v1597_v8 }
 0x38c   :  { %v1513_v62 = vsel %vm1494_vm8, %v1489_v32, %v1512_v19  ;;  %v1599_v35 = vsub.f32 %v1597_v8, %v1598_v3 }
 0x38d   :  { %v1518_v50 = vsel %vm217_vm1, %v1513_v62, 0 }
 0x38e   :  { %v1600_v41 = vand.u32 4294901760, %v1599_v35  ;;  %v1606_v21 = vand.u32 4294901760, %v1518_v50 }
 0x390   :  { %8949 = vmatmul.mubr.f32.gmra.mxu0 %v1600_v41  ;;  %8963 = vmatmul.mubr.f32.gmra.mxu1 %v1606_v21  ;;  %v1607_v58 = vsub.f32 %v1518_v50, %v1606_v21 }
 0x391   :  { %8978 = vmatprep.mubr.msk.f32.mxu1 %vm9918_vm0, %v12108_v20  ;;  %8951 = vmatprep.mubr.msk.f32.mxu0 %vm9918_vm0, %v12108_v20 }
 0x392   :  { %v1608_v1 = vand.u32 4294901760, %v1607_v58 }
 0x394   :  { %8979 = vmatmul.mubr.f32.vlgmr.msra.gmra.mxu1 %v1588_v36  ;;  %v1609_v52 = vsub.f32 %v1607_v58, %v1608_v1 }
 0x395   :  { %8981 = vmatprep.mubr.msk.f32.mxu1 %vm9918_vm0, %v12108_v20  ;;  %8999 = vmatpush3.msra.mxu1 %v10457_v63 }
 0x396   :  { %v1610_v6 = vand.u32 4294901760, %v1609_v52  ;;  %9020 = vmatprep.subr.mxu1 %v12108_v20 }
 0x398   :  { %8952 = vmatmul.mubr.f32.gmra.mxu0 %v1610_v6  ;;  %8982 = vmatmul.mubr.f32.gmra.mxu1 %v1598_v3 }
 0x399   :  { %8967 = vmatprep.mubr.msk.f32.mxu0 %vm9918_vm0, %v12108_v20  ;;  %8984 = vmatprep.mubr.msk.f32.mxu1 %vm9918_vm0, %v12108_v20 }
 0x39c   :  { %8968 = vmatmul.mubr.f32.vlgmr.msra.gmra.mxu0 %v10511_v44  ;;  %8985 = vmatmul.mubr.f32.gmra.mxu1 %v1608_v1 }
 0x39d   :  { %8988 = vmatpush3.msra.mxu0 %v1649_v48  ;;  %8970 = vmatprep.mubr.msk.f32.mxu0 %vm9918_vm0, %v12108_v20 }
 0x39e   :  { %9000 = vmatprep.mubr.msk.f32.mxu1 %vm9918_vm0, %v12108_v20  ;;  %9009 = vmatprep.subr.mxu0 %v12108_v20 }
 0x3a0   :  { %8971 = vmatmul.mubr.f32.gmra.mxu0 %v1597_v8  ;;  %9001 = vmatmul.mubr.f32.vlgmr.msra.gmra.mxu1 %v10505_v61 }
 0x3a1   :  { %8973 = vmatprep.mubr.msk.f32.mxu0 %vm9918_vm0, %v12108_v20  ;;  %9003 = vmatprep.mubr.msk.f32.mxu1 %vm9918_vm0, %v12108_v20 }
 0x3a4   :  { %8974 = vmatmul.mubr.f32.gmra.mxu0 %v1607_v58  ;;  %9004 = vmatmul.mubr.f32.gmra.mxu1 %v1596_v28 }
 0x3a5   :  { %8989 = vmatprep.mubr.msk.f32.mxu0 %vm9918_vm0, %v12108_v20  ;;  %9006 = vmatprep.mubr.msk.f32.mxu1 %vm9918_vm0, %v12108_v20 }
 0x3a8   :  { %8990 = vmatmul.mubr.f32.vlgmr.msra.gmra.mxu0 %v10505_v61  ;;  %9007 = vmatmul.mubr.f32.gmra.mxu1 %v1606_v21 }
 0x3a9   :  { %8992 = vmatprep.mubr.msk.f32.mxu0 %vm9918_vm0, %v12108_v20  ;;  %9022 = vmatprep.mubr.msk.f32.mxu1 %vm9918_vm0, %v12108_v20 }
 0x3ac   :  { %8993 = vmatmul.mubr.f32.gmra.mxu0 %v1596_v28 }
 0x3ad   :  { %8995 = vmatprep.mubr.msk.f32.mxu0 %vm9918_vm0, %v12108_v20 }
 0x3b0   :  { %8996 = vmatmul.mubr.f32.gmra.mxu0 %v1606_v21 }
 0x3b1   :  { %9011 = vmatprep.mubr.msk.f32.mxu0 %vm9918_vm0, %v12108_v20 }
 0x43c   :  { %v1688_v63 = vpop.f32.mrf.mxu1 }
 0x43e   :  { %v8958_v57 = vpop.f32.mrf.mxu1 }
 0x444   :  { %v1592_v48 = vpop.f32.mrf.mxu0 }
 0x445   :  { %v1593_v4 = vadd.f32 %v8592_v11, %v1592_v48 }
 0x446   :  { %v8947_v44 = vpop.f32.mrf.mxu0 }
 0x447   :  { %v1689_v62 = vadd.f32 %v1688_v63, %v1593_v4 }
 0x448   :  { %v1694_v61 = vpop.f32.mrf.mxu1 }
 0x44a   :  { %v8961_v36 = vpop.f32.mrf.mxu1 }
 0x450   :  { %v1602_v60 = vpop.f32.mrf.mxu0  ;;  %v1700_v0 = vpop.f32.mrf.mxu1 }
 0x451   :  { %v1603_v19 = vadd.f32 %v8592_v11, %v1602_v60 }
 0x452   :  { %v8950_v30 = vpop.f32.mrf.mxu0  ;;  %v8964_v5 = vpop.f32.mrf.mxu1 }
 0x453   :  { %v1695_v52 = vadd.f32 %v1694_v61, %v1603_v19 }
 0x454   :  { %v1862_v15 = vpop.f32.mrf.mxu1 }
 0x456   :  { %v8980_v13 = vpop.f32.mrf.mxu1 }
 0x458   :  { %v1612_v46 = vpop.f32.mrf.mxu0  ;;  %v1870_v47 = vpop.f32.mrf.mxu1 }
 0x459   :  { %v1613_v1 = vadd.f32 %v8592_v11, %v1612_v46 }
 0x45a   :  { %v8953_v28 = vpop.f32.mrf.mxu0  ;;  %v8983_v38 = vpop.f32.mrf.mxu1 }
 0x45b   :  { %v1701_v48 = vadd.f32 %v1700_v0, %v1613_v1 }
 0x45c   :  { %v1774_v39 = vpop.f32.mrf.mxu0  ;;  %v1878_v26 = vpop.f32.mrf.mxu1 }
 0x45d   :  { %v1775_v41 = vadd.f32 %v1774_v39, %v1689_v62 }
 0x45e   :  { %v8969_v55 = vpop.f32.mrf.mxu0  ;;  %v8986_v8 = vpop.f32.mrf.mxu1 }
 0x45f   :  { %v1863_v36 = vadd.f32 %v1862_v15, %v1775_v41 }
 0x460   :  { %v1781_v32 = vpop.f32.mrf.mxu0  ;;  %v2036_v3 = vpop.f32.mrf.mxu1 }
 0x461   :  { %v1782_v44 = vadd.f32 %v1781_v32, %v1695_v52 }
 0x462   :  { %v8972_v35 = vpop.f32.mrf.mxu0  ;;  %v9002_v50 = vpop.f32.mrf.mxu1 }
 0x463   :  { %v1871_v63 = vadd.f32 %v1870_v47, %v1782_v44 }
 0x464   :  { %v1788_v21 = vpop.f32.mrf.mxu0  ;;  %v2042_v58 = vpop.f32.mrf.mxu1 }
 0x465   :  { %v1789_v55 = vadd.f32 %v1788_v21, %v1701_v48  ;;  %v2111_v48 = vld [vmem:[%s12088_s2 + $0x40] sm:$0xff] }
 0x466   :  { %v8975_v6 = vpop.f32.mrf.mxu0  ;;  %v9005_v57 = vpop.f32.mrf.mxu1 }
 0x467   :  { %v1879_v11 = vadd.f32 %v1878_v26, %v1789_v55 }
 0x468   :  { %v1952_v30 = vpop.f32.mrf.mxu0  ;;  %v2048_v5 = vpop.f32.mrf.mxu1 }
 0x469   :  { %v1953_v13 = vadd.f32 %v1952_v30, %v1863_v36 }
 0x46a   :  { %v8991_v28 = vpop.f32.mrf.mxu0  ;;  %v9008_v38 = vpop.f32.mrf.mxu1 }
 0x46b   :  { %v2037_v60 = vadd.f32 %v2036_v3, %v1953_v13  ;;  %v10596_v13 = vand.u32 4294901760, %v2111_v48 }
 0x46c   :  { %v1958_v4 = vpop.f32.mrf.mxu0 }
 0x46d   :  { %v1959_v8 = vadd.f32 %v1958_v4, %v1871_v63  ;;  %v2052_v39 = vadd.f32 %v2037_v60, %v9969_v12  ;;  %9010 = vmatpush3.msra.mxu0 %v10596_v13  ;;  %v10600_v28 = vsub.f32 %v2111_v48, %v10596_v13 }
 0x46e   :  { %v8994_v62 = vpop.f32.mrf.mxu0  ;;  %9031 = vmatprep.subr.mxu0 %v12108_v20 }
 0x46f   :  { %v2043_v46 = vadd.f32 %v2042_v58, %v1959_v8  ;;  %v2056_v61 = vsel %vm217_vm1, %v2052_v39, 0.0  ;;  %v2255_v38 = vand.u32 4294901760, %v10600_v28 }
 0x470   :  { %2057 = vadd.xlane.f32.xlu1 %v2056_v61  ;;  %v1964_v15 = vpop.f32.mrf.mxu0 }
 0x471   :  { %v1965_v32 = vadd.f32 %v1964_v15, %v1879_v11  ;;  %v2053_v0 = vadd.f32 %v2043_v46, %v9972_v14  ;;  %v2256_v55 = vsub.f32 %v10600_v28, %v2255_v38 }
 0x472   :  { %v8997_v19 = vpop.f32.mrf.mxu0 }
 0x473   :  { %v2049_v35 = vadd.f32 %v2048_v5, %v1965_v32  ;;  %v2059_v50 = vsel %vm217_vm1, %v2053_v0, 0.0  ;;  %v2257_v60 = vand.u32 4294901760, %v2256_v55  ;;  %v2055_v32 = vld [vmem:[%s12088_s2 + $0x38] sm:$0x3] }
 0x474   :  { %2060 = vadd.xlane.f32.xlu0 %v2059_v50  ;;  %v2107_v50 = vrot.slane %v2055_v32, %v10037_v18 }
 0x475   :  { %v2054_v47 = vadd.f32 %v2049_v35, %v9976_v17  ;;  %9021 = vmatpush3.msra.mxu1 %v2257_v60 }
 0x476   :  { %9042 = vmatprep.subr.mxu1 %v12108_v20 }
 0x477   :  { %v2063_v12 = vsel %vm2062_vm13, %v2054_v47, 0.0 }
 0x478   :  { %2064 = vadd.xlane.f32.xlu1 %v2063_v12 }
 0x4f9   :  { %v2058_v3 = vpop.xlane.xlu1 %2057 }
 0x4fa   :  { %v2067_v41 = vmul.f32 0.125, %v2058_v3 }
 0x4fc   :  { %v2070_v21 = vsub.f32 %v2052_v39, %v2067_v41 }
 0x4fd   :  { %v2061_v26 = vpop.xlane.xlu0 %2060 }
 0x4fe   :  { %v2068_v58 = vmul.f32 0.125, %v2061_v26  ;;  %v2073_v1 = vmul.f32 %v2070_v21, %v2070_v21 }
 0x500   :  { %v2071_v52 = vsub.f32 %v2053_v0, %v2068_v58  ;;  %v2076_v14 = vsel %vm217_vm1, %v2073_v1, 0.0  ;;  %v2100_v0 = vrot.slane %v2055_v32, %v10034_v10 }
 0x501   :  { %2077 = vadd.xlane.f32.xlu0 %v2076_v14  ;;  %v2065_v6 = vpop.xlane.xlu1 %2064 }
 0x502   :  { %v2069_v57 = vmul.f32 0.125, %v2065_v6  ;;  %v2074_v44 = vmul.f32 %v2071_v52, %v2071_v52 }
 0x504   :  { %v2072_v36 = vsub.f32 %v2054_v47, %v2069_v57  ;;  %v2079_v30 = vsel %vm217_vm1, %v2074_v44, 0.0 }
 0x505   :  { %2080 = vadd.xlane.f32.xlu1 %v2079_v30 }
 0x506   :  { %v2075_v17 = vmul.f32 %v2072_v36, %v2072_v36 }
 0x508   :  { %v2082_v5 = vsel %vm2062_vm13, %v2075_v17, 0.0 }
 0x509   :  { %2083 = vadd.xlane.f32.xlu0 %v2082_v5 }
 0x58a   :  { %v2078_v63 = vpop.xlane.xlu0 %2077 }
 0x58b   :  { %v2085_v4 = vmul.f32 0.125, %v2078_v63 }
 0x58d   :  { %v2088_v8 = vadd.f32 1e-05, %v2085_v4 }
 0x58e   :  { %v2081_v39 = vpop.xlane.xlu1 %2080 }
 0x58f   :  { %9712 = vrsqrt.f32 %v2088_v8  ;;  %v2086_v62 = vmul.f32 0.125, %v2081_v39 }
 0x591   :  { %v2089_v46 = vadd.f32 1e-05, %v2086_v62 }
 0x592   :  { %v2084_v61 = vpop.xlane.xlu0 %2083 }
 0x593   :  { %9714 = vrsqrt.f32 %v2089_v46  ;;  %v2087_v11 = vmul.f32 0.125, %v2084_v61 }
 0x595   :  { %v2090_v15 = vadd.f32 1e-05, %v2087_v11 }
 0x597   :  { %9716 = vrsqrt.f32 %v2090_v15 }
 0x59c   :  { %v9713_v19 = vpop.eup %9712 }
 0x59d   :  { %v2094_v35 = vmul.f32 %v9713_v19, %v2070_v21 }
 0x59f   :  { %v2101_v47 = vmul.f32 %v2100_v0, %v2094_v35 }
 0x5a0   :  { %v9715_v12 = vpop.eup %9714 }
 0x5a1   :  { %v10613_v3 = vadd.f32 %v2107_v50, %v2101_v47  ;;  %v2095_v41 = vmul.f32 %v9715_v12, %v2071_v52 }
 0x5a3   :  { %12109 = vst [vmem:[#allocation5_spill] sm:$0xff] %v10613_v3  ;;  %v2118_v26 = vsel %vm217_vm1, %v10613_v3, 0  ;;  %v2102_v58 = vmul.f32 %v2100_v0, %v2095_v41 }
 0x5a4   :  { %v9717_v1 = vpop.eup %9716  ;;  %v2192_v14 = vand.u32 4294901760, %v2118_v26 }
 0x5a5   :  { %v10617_v6 = vadd.f32 %v2107_v50, %v2102_v58  ;;  %v2096_v57 = vmul.f32 %v9717_v1, %v2072_v36 }
 0x5a6   :  { %v2193_v44 = vsub.f32 %v2118_v26, %v2192_v14  ;;  %9023 = vmatmul.mubr.f32.vlgmr.msra.gmra.mxu1 %v2192_v14 }
 0x5a7   :  { %12110 = vst [vmem:[#allocation6_spill] sm:$0xff] %v10617_v6  ;;  %9025 = vmatprep.mubr.msk.f32.mxu1 %vm9918_vm0, %v12108_v20  ;;  %v2121_v21 = vsel %vm217_vm1, %v10617_v6, 0  ;;  %v2103_v30 = vmul.f32 %v2100_v0, %v2096_v57  ;;  %9043 = vmatpush3.msra.mxu1 %v10596_v13 }
 0x5a8   :  { %v2202_v52 = vand.u32 4294901760, %v2121_v21  ;;  %v2194_v17 = vand.u32 4294901760, %v2193_v44  ;;  %9064 = vmatprep.subr.mxu1 %v12108_v20 }
 0x5a9   :  { %v10625_v5 = vadd.f32 %v2107_v50, %v2103_v30 }
 0x5aa   :  { %9026 = vmatmul.mubr.f32.gmra.mxu1 %v2202_v52  ;;  %v2195_v48 = vsub.f32 %v2193_v44, %v2194_v17  ;;  %v2203_v36 = vsub.f32 %v2121_v21, %v2202_v52 }
 0x5ab   :  { %12111 = vst [vmem:[#allocation7_spill] sm:$0xff] %v10625_v5  ;;  %9028 = vmatprep.mubr.msk.f32.mxu1 %vm9918_vm0, %v12108_v20  ;;  %v2124_v55 = vsel %vm217_vm1, %v10625_v5, 0 }
 0x5ac   :  { %v2196_v60 = vand.u32 4294901760, %v2195_v48  ;;  %v2212_v63 = vand.u32 4294901760, %v2124_v55  ;;  %v2204_v4 = vand.u32 4294901760, %v2203_v36 }
 0x5ae   :  { %9012 = vmatmul.mubr.f32.vlgmr.msra.gmra.mxu0 %v2196_v60  ;;  %9029 = vmatmul.mubr.f32.gmra.mxu1 %v2212_v63  ;;  %v2205_v8 = vsub.f32 %v2203_v36, %v2204_v4  ;;  %v2213_v39 = vsub.f32 %v2124_v55, %v2212_v63 }
 0x5af   :  { %9032 = vmatpush3.msra.mxu0 %v10600_v28  ;;  %9014 = vmatprep.mubr.msk.f32.mxu0 %vm9918_vm0, %v12108_v20 }
 0x5b0   :  { %9044 = vmatprep.mubr.msk.f32.mxu1 %vm9918_vm0, %v12108_v20  ;;  %v2206_v62 = vand.u32 4294901760, %v2205_v8  ;;  %v2214_v46 = vand.u32 4294901760, %v2213_v39  ;;  %9053 = vmatprep.subr.mxu0 %v12108_v20 }
 0x5b2   :  { %9015 = vmatmul.mubr.f32.gmra.mxu0 %v2206_v62  ;;  %9045 = vmatmul.mubr.f32.vlgmr.msra.gmra.mxu1 %v2194_v17  ;;  %v2215_v61 = vsub.f32 %v2213_v39, %v2214_v46 }
 0x5b3   :  { %9017 = vmatprep.mubr.msk.f32.mxu0 %vm9918_vm0, %v12108_v20  ;;  %9047 = vmatprep.mubr.msk.f32.mxu1 %vm9918_vm0, %v12108_v20 }
 0x5b4   :  { %v2216_v11 = vand.u32 4294901760, %v2215_v61  ;;  %9065 = vmatpush3.msra.mxu1 %v10596_v13  ;;  %v2662_v13 = vld [vmem:[%s12088_s2 + $0x58] sm:$0xff] }
 0x5b5   :  { %9088 = vmatprep.subr.mxu1 %v12108_v20  ;;  %v10673_v28 = vand.u32 4294901760, %v2662_v13 }
 0x5b6   :  { %9018 = vmatmul.mubr.f32.gmra.mxu0 %v2216_v11  ;;  %9048 = vmatmul.mubr.f32.gmra.mxu1 %v2204_v4 }
 0x5b7   :  { %9033 = vmatprep.mubr.msk.f32.mxu0 %vm9918_vm0, %v12108_v20  ;;  %9050 = vmatprep.mubr.msk.f32.mxu1 %vm9918_vm0, %v12108_v20  ;;  %v10680_v15 = vsub.f32 %v2662_v13, %v10673_v28 }
 0x5b9   :  { %v12101_v0 = vand.u32 4294901760, %v10680_v15 }
 0x5ba   :  { %9034 = vmatmul.mubr.f32.vlgmr.msra.gmra.mxu0 %v2193_v44  ;;  %9051 = vmatmul.mubr.f32.gmra.mxu1 %v2214_v46 }
 0x5bb   :  { %9054 = vmatpush3.msra.mxu0 %v2255_v38  ;;  %9036 = vmatprep.mubr.msk.f32.mxu0 %vm9918_vm0, %v12108_v20  ;;  %v2661_v38 = vld [vmem:[%s12088_s2 + $0x50] sm:$0xff]  ;;  %v2807_v35 = vsub.f32 %v10680_v15, %v12101_v0 }
 0x5bc   :  { %9066 = vmatprep.mubr.msk.f32.mxu1 %vm9918_vm0, %v12108_v20  ;;  %9075 = vmatprep.subr.mxu0 %v12108_v20  ;;  %v10682_v32 = vand.u32 4294901760, %v2661_v38 }
 0x5bd   :  { %v2808_v47 = vand.u32 4294901760, %v2807_v35 }
 0x5be   :  { %9037 = vmatmul.mubr.f32.gmra.mxu0 %v2203_v36  ;;  %9067 = vmatmul.mubr.f32.vlgmr.msra.gmra.mxu1 %v2192_v14  ;;  %v10687_v19 = vsub.f32 %v2661_v38, %v10682_v32 }
 0x5bf   :  { %9039 = vmatprep.mubr.msk.f32.mxu0 %vm9918_vm0, %v12108_v20  ;;  %9069 = vmatprep.mubr.msk.f32.mxu1 %vm9918_vm0, %v12108_v20 }
 0x5c0   :  { %v12100_v50 = vand.u32 4294901760, %v10687_v19  ;;  %9089 = vmatpush3.msra.mxu1 %v2808_v47 }
 0x5c1   :  { %9090 = vmatprep.subr.mxu1 %v12108_v20 }
 0x5c2   :  { %9040 = vmatmul.mubr.f32.gmra.mxu0 %v2213_v39  ;;  %9070 = vmatmul.mubr.f32.gmra.mxu1 %v2202_v52  ;;  %v2814_v12 = vsub.f32 %v10687_v19, %v12100_v50 }
 0x5c3   :  { %9055 = vmatprep.mubr.msk.f32.mxu0 %vm9918_vm0, %v12108_v20  ;;  %9072 = vmatprep.mubr.msk.f32.mxu1 %vm9918_vm0, %v12108_v20 }
 0x5c4   :  { %v2815_v41 = vand.u32 4294901760, %v2814_v12 }
 0x5c6   :  { %9056 = vmatmul.mubr.f32.vlgmr.msra.gmra.mxu0 %v2192_v14  ;;  %9073 = vmatmul.mubr.f32.gmra.mxu1 %v2212_v63 }
 0x5c7   :  { %9058 = vmatprep.mubr.msk.f32.mxu0 %vm9918_vm0, %v12108_v20  ;;  %9092 = vmatprep.mubr.msk.f32.mxu1 %vm9918_vm0, %v12108_v20 }
 0x5c8   :  { %9076 = vmatpush3.msra.mxu0 %v10673_v28  ;;  %9091 = vmatpush3.msra.mxu1 %v2815_v41 }
 0x5c9   :  { %9077 = vmatprep.subr.mxu0 %v12108_v20  ;;  %9114 = vmatprep.subr.mxu1 %v12108_v20 }
 0x5ca   :  { %9059 = vmatmul.mubr.f32.gmra.mxu0 %v2202_v52 }
 0x5cb   :  { %9061 = vmatprep.mubr.msk.f32.mxu0 %vm9918_vm0, %v12108_v20  ;;  %9078 = vmatpush3.msra.mxu0 %v10682_v32 }
 0x5cc   :  { %9101 = vmatprep.subr.mxu0 %v12108_v20 }
 0x5ce   :  { %9062 = vmatmul.mubr.f32.gmra.mxu0 %v2212_v63  ;;  %v8593_v63 = vld [vmem:[%s12088_s2 + $0x48] ss:$0 sm:$0xff] }
 0x5cf   :  { %9079 = vmatprep.mubr.msk.f32.mxu0 %vm9918_vm0, %v12108_v20 }
 0x666   :  { %v2294_v26 = vpop.f32.mrf.mxu1 }
 0x668   :  { %v9024_v58 = vpop.f32.mrf.mxu1 }
 0x66a   :  { %v2300_v1 = vpop.f32.mrf.mxu1 }
 0x66c   :  { %v9027_v14 = vpop.f32.mrf.mxu1 }
 0x66e   :  { %v2198_v57 = vpop.f32.mrf.mxu0  ;;  %v2306_v44 = vpop.f32.mrf.mxu1 }
 0x66f   :  { %v2199_v46 = vadd.f32 %v8593_v63, %v2198_v57 }
 0x670   :  { %v9013_v21 = vpop.f32.mrf.mxu0  ;;  %v9030_v30 = vpop.f32.mrf.mxu1 }
 0x671   :  { %v2295_v47 = vadd.f32 %v2294_v26, %v2199_v46 }
 0x672   :  { %v2208_v52 = vpop.f32.mrf.mxu0  ;;  %v2468_v17 = vpop.f32.mrf.mxu1 }
 0x673   :  { %v2209_v35 = vadd.f32 %v8593_v63, %v2208_v52 }
 0x674   :  { %v9016_v48 = vpop.f32.mrf.mxu0  ;;  %v9046_v36 = vpop.f32.mrf.mxu1 }
 0x675   :  { %v2301_v48 = vadd.f32 %v2300_v1, %v2209_v35 }
 0x676   :  { %v2218_v55 = vpop.f32.mrf.mxu0  ;;  %v2476_v60 = vpop.f32.mrf.mxu1 }
 0x677   :  { %v2219_v30 = vadd.f32 %v8593_v63, %v2218_v55 }
 0x678   :  { %v9019_v4 = vpop.f32.mrf.mxu0  ;;  %v9049_v8 = vpop.f32.mrf.mxu1 }
 0x679   :  { %v2307_v57 = vadd.f32 %v2306_v44, %v2219_v30 }
 0x67a   :  { %v2380_v39 = vpop.f32.mrf.mxu0  ;;  %v2484_v62 = vpop.f32.mrf.mxu1 }
 0x67b   :  { %v2381_v58 = vadd.f32 %v2380_v39, %v2295_v47 }
 0x67c   :  { %v9035_v61 = vpop.f32.mrf.mxu0  ;;  %v9052_v11 = vpop.f32.mrf.mxu1 }
 0x67d   :  { %v2469_v8 = vadd.f32 %v2468_v17, %v2381_v58 }
 0x67e   :  { %v2387_v13 = vpop.f32.mrf.mxu0  ;;  %v2642_v38 = vpop.f32.mrf.mxu1 }
 0x67f   :  { %v2388_v4 = vadd.f32 %v2387_v13, %v2301_v48 }
 0x680   :  { %v9038_v12 = vpop.f32.mrf.mxu0  ;;  %v9068_v41 = vpop.f32.mrf.mxu1 }
 0x681   :  { %v2477_v26 = vadd.f32 %v2476_v60, %v2388_v4  ;;  %v3283_v41 = vld [vmem:[%s12088_s2 + $0x70] sm:$0xff] }
 0x682   :  { %v2394_v14 = vpop.f32.mrf.mxu0  ;;  %v2648_v21 = vpop.f32.mrf.mxu1 }
 0x683   :  { %v2395_v3 = vadd.f32 %v2394_v14, %v2307_v57 }
 0x684   :  { %v9041_v36 = vpop.f32.mrf.mxu0  ;;  %v9071_v50 = vpop.f32.mrf.mxu1 }
 0x685   :  { %v2485_v50 = vadd.f32 %v2484_v62, %v2395_v3  ;;  %v10727_v36 = vand.u32 4294901760, %v3283_v41 }
 0x686   :  { %v2558_v0 = vpop.f32.mrf.mxu0  ;;  %v2654_v6 = vpop.f32.mrf.mxu1 }
 0x687   :  { %v2559_v61 = vadd.f32 %v2558_v0, %v2469_v8 }
 0x688   :  { %v9057_v11 = vpop.f32.mrf.mxu0  ;;  %v9074_v5 = vpop.f32.mrf.mxu1 }
 0x689   :  { %v2643_v52 = vadd.f32 %v2642_v38, %v2559_v61  ;;  %v10738_v11 = vsub.f32 %v3283_v41, %v10727_v36 }
 0x68a   :  { %v2564_v46 = vpop.f32.mrf.mxu0 }
 0x68b   :  { %v2658_v39 = vmax.f32 %v2643_v52, 0.0  ;;  %v2565_v47 = vadd.f32 %v2564_v46, %v2477_v26  ;;  %v3427_v46 = vand.u32 4294901760, %v10738_v11 }
 0x68c   :  { %v9060_v12 = vpop.f32.mrf.mxu0 }
 0x68d   :  { %v2670_v1 = vsel %vm2668_vm14, %v2658_v39, 0  ;;  %v2649_v55 = vadd.f32 %v2648_v21, %v2565_v47  ;;  %v3428_v39 = vsub.f32 %v10738_v11, %v3427_v46  ;;  %v12112_v47 = vand.u32 4294901760, %v10680_v15 }
 0x68e   :  { %v10704_v63 = vand.u32 4294901760, %v2670_v1  ;;  %v2570_v17 = vpop.f32.mrf.mxu0 }
 0x68f   :  { %v2659_v13 = vmax.f32 %v2649_v55, 0.0  ;;  %v2571_v44 = vadd.f32 %v2570_v17, %v2485_v50  ;;  %v3429_v12 = vand.u32 4294901760, %v3428_v39  ;;  %v12113_v55 = vand.u32 4294901760, %v10687_v19 }
 0x690   :  { %v2746_v0 = vsub.f32 %v2670_v1, %v10704_v63  ;;  %v9063_v5 = vpop.f32.mrf.mxu0  ;;  %9093 = vmatmul.mubr.f32.vlgmr.msra.gmra.mxu1 %v10704_v63  ;;  %v3281_v1 = vld [vmem:[%s12090_s1 + $0x8] sm:$0xff] }
 0x691   :  { %v2673_v60 = vsel %vm2668_vm14, %v2659_v13, 0  ;;  %v2655_v38 = vadd.f32 %v2654_v6, %v2571_v44  ;;  %9095 = vmatprep.mubr.msk.f32.mxu1 %vm9918_vm0, %v12108_v20  ;;  %9115 = vmatpush3.msra.mxu1 %v10673_v28  ;;  %v3293_v50 = vsel %vm217_vm1, %v3281_v1, 0 }
 0x692   :  { %v2747_v35 = vand.u32 4294901760, %v2746_v0  ;;  %v10712_v3 = vand.u32 4294901760, %v2673_v60  ;;  %9116 = vmatprep.subr.mxu1 %v12108_v20  ;;  %v10789_v13 = vand.u32 4294901760, %v3293_v50 }
 0x693   :  { %v2660_v62 = vmax.f32 %v2655_v38, 0.0  ;;  %9117 = vmatpush3.msra.mxu1 %v10682_v32 }
 0x694   :  { %v2748_v58 = vsub.f32 %v2746_v0, %v2747_v35  ;;  %v2756_v6 = vsub.f32 %v2673_v60, %v10712_v3  ;;  %9096 = vmatmul.mubr.f32.gmra.mxu1 %v10712_v3  ;;  %9140 = vmatprep.subr.mxu1 %v12108_v20  ;;  %v3375_v5 = vsub.f32 %v3293_v50, %v10789_v13 }
 0x695   :  { %v2676_v14 = vsel %vm2668_vm14, %v2660_v62, 0  ;;  %9098 = vmatprep.mubr.msk.f32.mxu1 %vm9918_vm0, %v12108_v20 }
 0x696   :  { %v2749_v21 = vand.u32 4294901760, %v2748_v58  ;;  %v10725_v30 = vand.u32 4294901760, %v2676_v14  ;;  %v2757_v48 = vand.u32 4294901760, %v2756_v6 }
 0x698   :  { %v2766_v4 = vsub.f32 %v2676_v14, %v10725_v30  ;;  %9080 = vmatmul.mubr.f32.vlgmr.msra.gmra.mxu0 %v2749_v21  ;;  %9099 = vmatmul.mubr.f32.gmra.mxu1 %v10725_v30  ;;  %v2758_v8 = vsub.f32 %v2756_v6, %v2757_v48 }
 0x699   :  { %9102 = vmatpush3.msra.mxu0 %v10680_v15  ;;  %9082 = vmatprep.mubr.msk.f32.mxu0 %vm9918_vm0, %v12108_v20 }
 0x69a   :  { %9118 = vmatprep.mubr.msk.f32.mxu1 %vm9918_vm0, %v12108_v20  ;;  %v2759_v57 = vand.u32 4294901760, %v2758_v8  ;;  %9103 = vmatprep.subr.mxu0 %v12108_v20  ;;  %v2767_v61 = vand.u32 4294901760, %v2766_v4 }
 0x69b   :  { %9104 = vmatpush3.msra.mxu0 %v10687_v19  ;;  %v3282_v19 = vld [vmem:[%s12090_s1 + $0x10] sm:$0xf] }
 0x69c   :  { %9083 = vmatmul.mubr.f32.gmra.mxu0 %v2759_v57  ;;  %9119 = vmatmul.mubr.f32.vlgmr.msra.gmra.mxu1 %v2747_v35  ;;  %v2768_v52 = vsub.f32 %v2766_v4, %v2767_v61  ;;  %v3296_v44 = vsel %vm217_vm1, %v3282_v19, 0 }
 0x69d   :  { %9085 = vmatprep.mubr.msk.f32.mxu0 %vm9918_vm0, %v12108_v20  ;;  %9121 = vmatprep.mubr.msk.f32.mxu1 %vm9918_vm0, %v12108_v20  ;;  %v3384_v60 = vand.u32 4294901760, %v3296_v44 }
 0x69e   :  { %v2769_v26 = vand.u32 4294901760, %v2768_v52  ;;  %9127 = vmatprep.subr.mxu0 %v12108_v20  ;;  %9141 = vmatpush3.msra.mxu1 %v10673_v28  ;;  %v3280_v28 = vld [vmem:[%s12090_s1] sm:$0xff] }
 0x69f   :  { %9142 = vmatprep.subr.mxu1 %v12108_v20  ;;  %v3385_v35 = vsub.f32 %v3296_v44, %v3384_v60 }
 0x6a0   :  { %9086 = vmatmul.mubr.f32.gmra.mxu0 %v2769_v26  ;;  %9122 = vmatmul.mubr.f32.gmra.mxu1 %v2757_v48 }
 0x6a1   :  { %9105 = vmatprep.mubr.msk.f32.mxu0 %vm9918_vm0, %v12108_v20  ;;  %9124 = vmatprep.mubr.msk.f32.mxu1 %vm9918_vm0, %v12108_v20 }
 0x6a2   :  { %9143 = vmatpush3.msra.mxu1 %v10682_v32  ;;  %v3290_v32 = vsel %vm217_vm1, %v3280_v28, 0 }
 0x6a3   :  { %9164 = vmatprep.subr.mxu1 %v12108_v20  ;;  %v10775_v15 = vand.u32 4294901760, %v3290_v32 }
 0x6a4   :  { %9106 = vmatmul.mubr.f32.vlgmr.msra.gmra.mxu0 %v2746_v0  ;;  %9125 = vmatmul.mubr.f32.gmra.mxu1 %v2767_v61 }
 0x6a5   :  { %9128 = vmatpush3.msra.mxu0 %v12112_v47  ;;  %9108 = vmatprep.mubr.msk.f32.mxu0 %vm9918_vm0, %v12108_v20  ;;  %v3365_v17 = vsub.f32 %v3290_v32, %v10775_v15 }
 0x6a6   :  { %9144 = vmatprep.mubr.msk.f32.mxu1 %vm9918_vm0, %v12108_v20  ;;  %9129 = vmatprep.subr.mxu0 %v12108_v20 }
 0x6a7   :  { %9130 = vmatpush3.msra.mxu0 %v12113_v55  ;;  %v3366_v0 = vand.u32 4294901760, %v3365_v17 }
 0x6a8   :  { %9109 = vmatmul.mubr.f32.gmra.mxu0 %v2756_v6  ;;  %9145 = vmatmul.mubr.f32.vlgmr.msra.gmra.mxu1 %v10704_v63 }
 0x6a9   :  { %9111 = vmatprep.mubr.msk.f32.mxu0 %vm9918_vm0, %v12108_v20  ;;  %9147 = vmatprep.mubr.msk.f32.mxu1 %vm9918_vm0, %v12108_v20  ;;  %v3367_v38 = vsub.f32 %v3365_v17, %v3366_v0 }
 0x6aa   :  { %9153 = vmatprep.subr.mxu0 %v12108_v20  ;;  %9165 = vmatpush3.msra.mxu1 %v3429_v12 }
 0x6ab   :  { %9186 = vmatprep.subr.mxu1 %v12108_v20  ;;  %v3368_v62 = vand.u32 4294901760, %v3367_v38 }
 0x6ac   :  { %9112 = vmatmul.mubr.f32.gmra.mxu0 %v2766_v4  ;;  %9148 = vmatmul.mubr.f32.gmra.mxu1 %v10712_v3  ;;  %v8594_v4 = vld [vmem:[%s12088_s2 + $0x60] ss:$0 sm:$0xff] }
 0x6ad   :  { %9131 = vmatprep.mubr.msk.f32.mxu0 %vm9918_vm0, %v12108_v20  ;;  %9150 = vmatprep.mubr.msk.f32.mxu1 %vm9918_vm0, %v12108_v20 }
 0x6b0   :  { %9132 = vmatmul.mubr.f32.vlgmr.msra.gmra.mxu0 %v10704_v63  ;;  %9151 = vmatmul.mubr.f32.gmra.mxu1 %v10725_v30  ;;  %v3376_v63 = vand.u32 4294901760, %v3375_v5 }
 0x6b1   :  { %9154 = vmatpush3.msra.mxu0 %v10727_v36  ;;  %9134 = vmatprep.mubr.msk.f32.mxu0 %vm9918_vm0, %v12108_v20 }
 0x6b2   :  { %9166 = vmatprep.mubr.msk.f32.mxu1 %vm9918_vm0, %v12108_v20  ;;  %9175 = vmatprep.subr.mxu0 %v12108_v20  ;;  %v3377_v41 = vsub.f32 %v3375_v5, %v3376_v63 }
 0x6b4   :  { %9135 = vmatmul.mubr.f32.gmra.mxu0 %v10712_v3  ;;  %9167 = vmatmul.mubr.f32.vlgmr.msra.gmra.mxu1 %v10775_v15  ;;  %v3386_v3 = vand.u32 4294901760, %v3385_v35  ;;  %v3378_v58 = vand.u32 4294901760, %v3377_v41 }
 0x6b5   :  { %9137 = vmatprep.mubr.msk.f32.mxu0 %vm9918_vm0, %v12108_v20  ;;  %9187 = vmatpush3.msra.mxu1 %v10727_v36 }
 0x6b6   :  { %9169 = vmatprep.mubr.msk.f32.mxu1 %vm9918_vm0, %v12108_v20  ;;  %9208 = vmatprep.subr.mxu1 %v12108_v20  ;;  %v3387_v6 = vsub.f32 %v3385_v35, %v3386_v3 }
 0x6b8   :  { %9138 = vmatmul.mubr.f32.gmra.mxu0 %v10725_v30  ;;  %9170 = vmatmul.mubr.f32.gmra.mxu1 %v10789_v13  ;;  %v3388_v14 = vand.u32 4294901760, %v3387_v6 }
 0x6b9   :  { %9155 = vmatprep.mubr.msk.f32.mxu0 %vm9918_vm0, %v12108_v20  ;;  %9172 = vmatprep.mubr.msk.f32.mxu1 %vm9918_vm0, %v12108_v20 }
 0x6bc   :  { %9156 = vmatmul.mubr.f32.vlgmr.msra.gmra.mxu0 %v3368_v62  ;;  %9173 = vmatmul.mubr.f32.gmra.mxu1 %v3384_v60 }
 0x6bd   :  { %9176 = vmatpush3.msra.mxu0 %v10738_v11  ;;  %9158 = vmatprep.mubr.msk.f32.mxu0 %vm9918_vm0, %v12108_v20 }
 0x6be   :  { %9188 = vmatprep.mubr.msk.f32.mxu1 %vm9918_vm0, %v12108_v20  ;;  %9197 = vmatprep.subr.mxu0 %v12108_v20 }
 0x6c0   :  { %9159 = vmatmul.mubr.f32.gmra.mxu0 %v3378_v58  ;;  %9189 = vmatmul.mubr.f32.vlgmr.msra.gmra.mxu1 %v3366_v0 }
 0x6c1   :  { %9161 = vmatprep.mubr.msk.f32.mxu0 %vm9918_vm0, %v12108_v20  ;;  %9209 = vmatpush3.msra.mxu1 %v10727_v36 }
 0x6c2   :  { %9191 = vmatprep.mubr.msk.f32.mxu1 %vm9918_vm0, %v12108_v20  ;;  %9230 = vmatprep.subr.mxu1 %v12108_v20 }
 0x6c4   :  { %9162 = vmatmul.mubr.f32.gmra.mxu0 %v3388_v14  ;;  %9192 = vmatmul.mubr.f32.gmra.mxu1 %v3376_v63 }
 0x6c5   :  { %9177 = vmatprep.mubr.msk.f32.mxu0 %vm9918_vm0, %v12108_v20  ;;  %9194 = vmatprep.mubr.msk.f32.mxu1 %vm9918_vm0, %v12108_v20 }
 0x6c8   :  { %9178 = vmatmul.mubr.f32.vlgmr.msra.gmra.mxu0 %v3365_v17  ;;  %9195 = vmatmul.mubr.f32.gmra.mxu1 %v3386_v3 }
 0x6c9   :  { %9198 = vmatpush3.msra.mxu0 %v3427_v46  ;;  %9180 = vmatprep.mubr.msk.f32.mxu0 %vm9918_vm0, %v12108_v20 }
 0x6ca   :  { %9210 = vmatprep.mubr.msk.f32.mxu1 %vm9918_vm0, %v12108_v20  ;;  %9219 = vmatprep.subr.mxu0 %v12108_v20 }
 0x6cc   :  { %9181 = vmatmul.mubr.f32.gmra.mxu0 %v3375_v5  ;;  %9211 = vmatmul.mubr.f32.vlgmr.msra.gmra.mxu1 %v10775_v15 }
 0x6cd   :  { %9183 = vmatprep.mubr.msk.f32.mxu0 %vm9918_vm0, %v12108_v20  ;;  %9213 = vmatprep.mubr.msk.f32.mxu1 %vm9918_vm0, %v12108_v20 }
 0x6d0   :  { %9184 = vmatmul.mubr.f32.gmra.mxu0 %v3385_v35  ;;  %9214 = vmatmul.mubr.f32.gmra.mxu1 %v10789_v13 }
 0x6d1   :  { %9199 = vmatprep.mubr.msk.f32.mxu0 %vm9918_vm0, %v12108_v20  ;;  %9216 = vmatprep.mubr.msk.f32.mxu1 %vm9918_vm0, %v12108_v20 }
 0x6d4   :  { %9200 = vmatmul.mubr.f32.vlgmr.msra.gmra.mxu0 %v10775_v15  ;;  %9217 = vmatmul.mubr.f32.gmra.mxu1 %v3384_v60 }
 0x6d5   :  { %9202 = vmatprep.mubr.msk.f32.mxu0 %vm9918_vm0, %v12108_v20  ;;  %9232 = vmatprep.mubr.msk.f32.mxu1 %vm9918_vm0, %v12108_v20 }
 0x6d8   :  { %9203 = vmatmul.mubr.f32.gmra.mxu0 %v10789_v13 }
 0x6d9   :  { %9205 = vmatprep.mubr.msk.f32.mxu0 %vm9918_vm0, %v12108_v20 }
 0x6dc   :  { %9206 = vmatmul.mubr.f32.gmra.mxu0 %v3384_v60 }
 0x6dd   :  { %9221 = vmatprep.mubr.msk.f32.mxu0 %vm9918_vm0, %v12108_v20 }
 0x750   :  { %v2852_v21 = vpop.f32.mrf.mxu1 }
 0x752   :  { %v9094_v30 = vpop.f32.mrf.mxu1 }
 0x754   :  { %v2858_v48 = vpop.f32.mrf.mxu1 }
 0x756   :  { %v9097_v36 = vpop.f32.mrf.mxu1 }
 0x758   :  { %v2751_v8 = vpop.f32.mrf.mxu0  ;;  %v2864_v57 = vpop.f32.mrf.mxu1 }
 0x759   :  { %v2752_v61 = vadd.f32 %v8594_v4, %v2751_v8 }
 0x75a   :  { %v9081_v11 = vpop.f32.mrf.mxu0  ;;  %v9100_v52 = vpop.f32.mrf.mxu1 }
 0x75b   :  { %v2853_v26 = vadd.f32 %v2852_v21, %v2752_v61 }
 0x75c   :  { %v2761_v46 = vpop.f32.mrf.mxu0  ;;  %v3029_v39 = vpop.f32.mrf.mxu1 }
 0x75d   :  { %v2762_v28 = vadd.f32 %v8594_v4, %v2761_v46 }
 0x75e   :  { %v9084_v47 = vpop.f32.mrf.mxu0  ;;  %v9120_v32 = vpop.f32.mrf.mxu1 }
 0x75f   :  { %v2859_v12 = vadd.f32 %v2858_v48, %v2762_v28 }
 0x760   :  { %v2771_v1 = vpop.f32.mrf.mxu0  ;;  %v3037_v55 = vpop.f32.mrf.mxu1 }
 0x761   :  { %v2772_v15 = vadd.f32 %v8594_v4, %v2771_v1 }
 0x762   :  { %v9087_v50 = vpop.f32.mrf.mxu0  ;;  %v9123_v19 = vpop.f32.mrf.mxu1 }
 0x763   :  { %v2865_v17 = vadd.f32 %v2864_v57, %v2772_v15 }
 0x764   :  { %v2940_v13 = vpop.f32.mrf.mxu0  ;;  %v3045_v44 = vpop.f32.mrf.mxu1 }
 0x765   :  { %v2941_v0 = vadd.f32 %v2940_v13, %v2853_v26 }
 0x766   :  { %v9107_v5 = vpop.f32.mrf.mxu0  ;;  %v9126_v60 = vpop.f32.mrf.mxu1 }
 0x767   :  { %v3030_v38 = vadd.f32 %v3029_v39, %v2941_v0 }
 0x768   :  { %v2947_v63 = vpop.f32.mrf.mxu0  ;;  %v3207_v35 = vpop.f32.mrf.mxu1 }
 0x769   :  { %v2948_v62 = vadd.f32 %v2947_v63, %v2859_v12 }
 0x76a   :  { %v9110_v41 = vpop.f32.mrf.mxu0  ;;  %v9146_v3 = vpop.f32.mrf.mxu1 }
 0x76b   :  { %v3038_v58 = vadd.f32 %v3037_v55, %v2948_v62  ;;  %v8595_v41 = vld [vmem:[%s12088_s2 + $0x78] ss:$0 sm:$0xff] }
 0x76c   :  { %v2954_v6 = vpop.f32.mrf.mxu0  ;;  %v3213_v14 = vpop.f32.mrf.mxu1 }
 0x76d   :  { %v2955_v21 = vadd.f32 %v2954_v6, %v2865_v17 }
 0x76e   :  { %v9113_v30 = vpop.f32.mrf.mxu0  ;;  %v9149_v48 = vpop.f32.mrf.mxu1 }
 0x76f   :  { %v3046_v36 = vadd.f32 %v3045_v44, %v2955_v21 }
 0x770   :  { %v3122_v4 = vpop.f32.mrf.mxu0  ;;  %v3219_v8 = vpop.f32.mrf.mxu1 }
 0x771   :  { %v3123_v57 = vadd.f32 %v3122_v4, %v3030_v38 }
 0x772   :  { %v9133_v61 = vpop.f32.mrf.mxu0  ;;  %v9152_v11 = vpop.f32.mrf.mxu1 }
 0x773   :  { %v10865_v52 = vadd.f32 %v3207_v35, %v3123_v57 }
 0x774   :  { %v3128_v26 = vpop.f32.mrf.mxu0  ;;  %v3466_v46 = vpop.f32.mrf.mxu1 }
 0x775   :  { %v3129_v39 = vadd.f32 %v3128_v26, %v3038_v58 }
 0x776   :  { %v9136_v28 = vpop.f32.mrf.mxu0  ;;  %v9168_v47 = vpop.f32.mrf.mxu1 }
 0x777   :  { %v10867_v32 = vadd.f32 %v3213_v14, %v3129_v39 }
 0x778   :  { %v3134_v12 = vpop.f32.mrf.mxu0  ;;  %v3472_v1 = vpop.f32.mrf.mxu1 }
 0x779   :  { %v3135_v55 = vadd.f32 %v3134_v12, %v3046_v36 }
 0x77a   :  { %v9139_v15 = vpop.f32.mrf.mxu0  ;;  %v9171_v50 = vpop.f32.mrf.mxu1 }
 0x77b   :  { %v10869_v19 = vadd.f32 %v3219_v8, %v3135_v55 }
 0x77c   :  { %v3370_v17 = vpop.f32.mrf.mxu0  ;;  %v3478_v13 = vpop.f32.mrf.mxu1 }
 0x77d   :  { %v3371_v21 = vadd.f32 %v8595_v41, %v3370_v17 }
 0x77e   :  { %v9157_v44 = vpop.f32.mrf.mxu0  ;;  %v9174_v0 = vpop.f32.mrf.mxu1 }
 0x77f   :  { %v3467_v8 = vadd.f32 %v3466_v46, %v3371_v21 }
 0x780   :  { %v3380_v5 = vpop.f32.mrf.mxu0  ;;  %v3640_v60 = vpop.f32.mrf.mxu1 }
 0x781   :  { %v3381_v50 = vadd.f32 %v8595_v41, %v3380_v5 }
 0x782   :  { %v9160_v38 = vpop.f32.mrf.mxu0  ;;  %v9190_v63 = vpop.f32.mrf.mxu1 }
 0x784   :  { %v3390_v35 = vpop.f32.mrf.mxu0  ;;  %v3648_v62 = vpop.f32.mrf.mxu1 }
 0x786   :  { %v9163_v3 = vpop.f32.mrf.mxu0  ;;  %v9193_v58 = vpop.f32.mrf.mxu1 }
 0x787   :  { %v3473_v3 = vadd.f32 %v3472_v1, %v3381_v50 }
 0x788   :  { %v3552_v6 = vpop.f32.mrf.mxu0  ;;  %v3656_v14 = vpop.f32.mrf.mxu1 }
 0x789   :  { %v3553_v11 = vadd.f32 %v3552_v6, %v3467_v8 }
 0x78a   :  { %v9179_v30 = vpop.f32.mrf.mxu0  ;;  %v9196_v48 = vpop.f32.mrf.mxu1 }
 0x78b   :  { %v3641_v12 = vadd.f32 %v3640_v60, %v3553_v11 }
 0x78c   :  { %v3559_v36 = vpop.f32.mrf.mxu0  ;;  %v3814_v4 = vpop.f32.mrf.mxu1 }
 0x78d   :  { %v3560_v6 = vadd.f32 %v3559_v36, %v3473_v3 }
 0x78e   :  { %v9182_v57 = vpop.f32.mrf.mxu0  ;;  %v9212_v61 = vpop.f32.mrf.mxu1 }
 0x78f   :  { %v3649_v48 = vadd.f32 %v3648_v62, %v3560_v6  ;;  %v3391_v61 = vadd.f32 %v8595_v41, %v3390_v35 }
 0x790   :  { %v3566_v26 = vpop.f32.mrf.mxu0  ;;  %v3820_v39 = vpop.f32.mrf.mxu1 }
 0x792   :  { %v9185_v28 = vpop.f32.mrf.mxu0  ;;  %v9215_v47 = vpop.f32.mrf.mxu1 }
 0x793   :  { %v3479_v28 = vadd.f32 %v3478_v13, %v3391_v61 }
 0x794   :  { %v3730_v55 = vpop.f32.mrf.mxu0  ;;  %v3826_v15 = vpop.f32.mrf.mxu1 }
 0x795   :  { %v3731_v44 = vadd.f32 %v3730_v55, %v3641_v12  ;;  %v3567_v12 = vadd.f32 %v3566_v26, %v3479_v28 }
 0x796   :  { %v9201_v0 = vpop.f32.mrf.mxu0  ;;  %v9218_v38 = vpop.f32.mrf.mxu1 }
 0x797   :  { %v3815_v17 = vadd.f32 %v3814_v4, %v3731_v44  ;;  %v3657_v50 = vadd.f32 %v3656_v14, %v3567_v12 }
 0x798   :  { %v3736_v63 = vpop.f32.mrf.mxu0 }
 0x799   :  { %3833 = vrot.lane.b32.xlu1 %v3815_v17, %s9919_s27  ;;  %v3884_v46 = vrot.slane %v3815_v17, %v10037_v18  ;;  %v3877_v21 = vrot.slane %v3815_v17, %v10034_v10  ;;  %v3898_v60 = vrot.slane %v3815_v17, %v10046_v27  ;;  %v3891_v4 = vrot.slane %v3815_v17, %v10042_v22 }
 0x79a   :  { %v9204_v58 = vpop.f32.mrf.mxu0  ;;  %v3737_v8 = vadd.f32 %v3736_v63, %v3649_v48  ;;  %v3912_v1 = vrot.slane %v3815_v17, %v10054_v34  ;;  %v3905_v57 = vrot.slane %v3815_v17, %v10050_v31  ;;  %v3919_v11 = vrot.slane %v3815_v17, %v10058_v37 }
 0x79b   :  { %3886 = vbcast.lane.b32.xlu0 %v3884_v46, 256  ;;  %v3926_v47 = vrot.slane %v3815_v17, %v10063_v42 }
 0x79c   :  { %v3742_v30 = vpop.f32.mrf.mxu0  ;;  %v3821_v36 = vadd.f32 %v3820_v39, %v3737_v8 }
 0x79d   :  { %3879 = vbcast.lane.b32.xlu1 %v3877_v21, 256  ;;  %v3743_v41 = vadd.f32 %v3742_v30, %v3657_v50 }
 0x79e   :  { %v9207_v5 = vpop.f32.mrf.mxu0  ;;  %v3940_v62 = vrot.slane %v3821_v36, %v10037_v18  ;;  %v3947_v55 = vrot.slane %v3821_v36, %v10042_v22  ;;  %v3933_v39 = vrot.slane %v3821_v36, %v10034_v10  ;;  %v3954_v35 = vrot.slane %v3821_v36, %v10046_v27 }
 0x79f   :  { %3900 = vbcast.lane.b32.xlu0 %v3898_v60, 256  ;;  %v3961_v44 = vrot.slane %v3821_v36, %v10050_v31  ;;  %v3968_v13 = vrot.slane %v3821_v36, %v10054_v34  ;;  %v3827_v0 = vadd.f32 %v3826_v15, %v3743_v41  ;;  %v3982_v26 = vrot.slane %v3821_v36, %v10063_v42 }
 0x7a0   :  { %v3975_v38 = vrot.slane %v3821_v36, %v10058_v37 }
 0x7a1   :  { %3893 = vbcast.lane.b32.xlu1 %v3891_v4, 256  ;;  %v3996_v14 = vrot.slane %v3827_v0, %v10037_v18  ;;  %v3989_v17 = vrot.slane %v3827_v0, %v10034_v10  ;;  %v4010_v63 = vrot.slane %v3827_v0, %v10046_v27  ;;  %v4003_v15 = vrot.slane %v3827_v0, %v10042_v22 }
 0x7a3   :  { %3914 = vbcast.lane.b32.xlu0 %v3912_v1, 256 }
 0x7a5   :  { %3907 = vbcast.lane.b32.xlu1 %v3905_v57, 256 }
 0x7a7   :  { %3835 = vrot.lane.b32.xlu0 %v3821_v36, %s9919_s27 }
 0x7a9   :  { %3921 = vbcast.lane.b32.xlu1 %v3919_v11, 256 }
 0x7ab   :  { %3942 = vbcast.lane.b32.xlu0 %v3940_v62, 256 }
 0x7ad   :  { %3928 = vbcast.lane.b32.xlu1 %v3926_v47, 256 }
 0x7af   :  { %3949 = vbcast.lane.b32.xlu0 %v3947_v55, 256 }
 0x7b1   :  { %3935 = vbcast.lane.b32.xlu1 %v3933_v39, 256 }
 0x7b3   :  { %3956 = vbcast.lane.b32.xlu0 %v3954_v35, 256 }
 0x7b5   :  { %3963 = vbcast.lane.b32.xlu1 %v3961_v44, 256 }
 0x7b7   :  { %3970 = vbcast.lane.b32.xlu0 %v3968_v13, 256 }
 0x7b9   :  { %3837 = vrot.lane.b32.xlu1 %v3827_v0, %s9919_s27 }
 0x7bb   :  { %3984 = vbcast.lane.b32.xlu0 %v3982_v26, 256 }
 0x7bd   :  { %3977 = vbcast.lane.b32.xlu1 %v3975_v38, 256 }
 0x7bf   :  { %3998 = vbcast.lane.b32.xlu0 %v3996_v14, 256 }
 0x7c1   :  { %3991 = vbcast.lane.b32.xlu1 %v3989_v17, 256 }
 0x7c3   :  { %4012 = vbcast.lane.b32.xlu0 %v4010_v63, 256 }
 0x7c5   :  { %4005 = vbcast.lane.b32.xlu1 %v4003_v15, 256 }
 0x80b   :  { %v3834_v3 = vpop.permute.xlu1 %3833 }
 0x80c   :  { %3842 = vxpose.xlu1.b32.start [1/3] (short) (narrow) %v3834_v3, 16 }
 0x80d   :  { %v3887_v46 = vpop.permute.xlu0 %3886 }
 0x80f   :  { %v3880_v58 = vpop.permute.xlu1 %3879 }
 0x811   :  { %v3901_v6 = vpop.permute.xlu0 %3900 }
 0x813   :  { %v3894_v21 = vpop.permute.xlu1 %3893 }
 0x815   :  { %v3915_v30 = vpop.permute.xlu0 %3914 }
 0x817   :  { %v3908_v60 = vpop.permute.xlu1 %3907 }
 0x819   :  { %v3836_v5 = vpop.permute.xlu0 %3835 }
 0x81a   :  { %3843 = vxpose.xlu1.b32.cont [2/3] (short) (narrow) %v3836_v5, 16 }
 0x81b   :  { %v3922_v48 = vpop.permute.xlu1 %3921 }
 0x81f   :  { %v3929_v4 = vpop.permute.xlu1 %3928 }
 0x823   :  { %v3936_v8 = vpop.permute.xlu1 %3935 }
 0x827   :  { %v10897_v1 = vpop.permute.xlu1 %3963 }
 0x82b   :  { %v3838_v57 = vpop.permute.xlu1 %3837 }
 0x82c   :  { %3844 = vxpose.xlu1.b32.end [3/3] (short) (narrow) %v3838_v57, 16  ;;  %v3943_v57 = vpop.permute.xlu0 %3942 }
 0x82f   :  { %v10899_v36 = vpop.permute.xlu1 %3977 }
 0x833   :  { %v3992_v61 = vpop.permute.xlu1 %3991 }
 0x837   :  { %v4006_v11 = vpop.permute.xlu1 %4005 }
 0x8a0   :  { %v10901_v62 = vpop.trf.xlu1 }
 0x8a1   :  { %v4019_v28 = vmul.f32 %v3915_v30, %v10901_v62  ;;  %v4014_v47 = vmul.f32 %v3880_v58, %v10901_v62  ;;  %v4030_v12 = vmul.f32 %v3992_v61, %v10901_v62  ;;  %v4015_v55 = vmul.f32 %v3887_v46, %v10901_v62 }
 0x8a2   :  { %v4032_v35 = vmul.f32 %v4006_v11, %v10901_v62  ;;  %v4016_v41 = vmul.f32 %v3894_v21, %v10901_v62  ;;  %v4017_v38 = vmul.f32 %v3901_v6, %v10901_v62  ;;  %v4018_v6 = vmul.f32 %v3908_v60, %v10901_v62 }
 0x8a3   :  { %v10908_v39 = vadd.f32 %v4019_v28, %v10119_v49  ;;  %v10911_v50 = vadd.f32 %v4014_v47, %v10122_v51  ;;  %v10920_v0 = vadd.f32 %v4030_v12, %v10128_v53  ;;  %v10923_v26 = vadd.f32 %v4015_v55, %v10131_v54 }
 0x8a4   :  { %v10931_v63 = vadd.f32 %v4032_v35, %v10145_v23  ;;  %v10934_v15 = vadd.f32 %v4016_v41, %v10149_v7  ;;  %v10941_v58 = vadd.f32 %v4017_v38, %v10164_v29  ;;  %v10947_v30 = vadd.f32 %v4018_v6, %v10179_v40 }
 0x8a5   :  { %v4069_v44 = vsel %vm1083_vm4, %v10908_v39, -inf  ;;  %v4054_v13 = vsel %vm1083_vm4, %v10911_v50, -inf  ;;  %v4102_v14 = vsel %vm1083_vm4, %v10920_v0, -inf  ;;  %v4057_v17 = vsel %vm1083_vm4, %v10923_v26, -inf }
 0x8a6   :  { %4070 = vmax.xlane.f32.xlu1 %v4069_v44  ;;  %4055 = vmax.xlane.f32.xlu0 %v4054_v13  ;;  %v4108_v3 = vsel %vm1083_vm4, %v10931_v63, -inf  ;;  %v4060_v46 = vsel %vm1083_vm4, %v10934_v15, -inf  ;;  %v4063_v21 = vsel %vm1083_vm4, %v10941_v58, -inf  ;;  %v4022_v5 = vmul.f32 %v3936_v8, %v10901_v62  ;;  %v3950_v8 = vpop.permute.xlu0 %3949 }
 0x8a7   :  { %v4066_v61 = vsel %vm1083_vm4, %v10947_v30, -inf  ;;  %v4023_v60 = vmul.f32 %v3943_v57, %v10901_v62  ;;  %v4020_v12 = vmul.f32 %v3922_v48, %v10901_v62  ;;  %v4024_v41 = vmul.f32 %v3950_v8, %v10901_v62 }
 0x8a8   :  { %v10953_v11 = vadd.f32 %v4022_v5, %v10199_v56  ;;  %v4021_v38 = vmul.f32 %v3929_v4, %v10901_v62  ;;  %v4026_v4 = vmul.f32 %v10897_v1, %v10901_v62  ;;  %v4028_v1 = vmul.f32 %v10899_v36, %v10901_v62 }
 0x8a9   :  { %v10959_v47 = vadd.f32 %v4023_v60, %v10209_v16  ;;  %v10965_v35 = vadd.f32 %v4020_v12, %v10219_v24  ;;  %v10971_v13 = vadd.f32 %v4024_v41, %v10230_v43 }
 0x8aa   :  { %4103 = vmax.xlane.f32.xlu1 %v4102_v14  ;;  %4058 = vmax.xlane.f32.xlu0 %v4057_v17  ;;  %v4078_v28 = vsel %vm1083_vm4, %v10953_v11, -inf  ;;  %v3957_v48 = vpop.permute.xlu0 %3956  ;;  %v10977_v17 = vadd.f32 %v4021_v38, %v10233_v45  ;;  %v10990_v57 = vadd.f32 %v4026_v4, %v10261_v2  ;;  %v12115_v4 = vld [vmem:[#allocation3_spill] sm:$0xff] }
 0x8ab   :  { %v4081_v55 = vsel %vm1083_vm4, %v10959_v47, -inf  ;;  %v4072_v44 = vsel %vm1083_vm4, %v10965_v35, -inf  ;;  %v4084_v14 = vsel %vm1083_vm4, %v10971_v13, -inf }
 0x8ae   :  { %4109 = vmax.xlane.f32.xlu1 %v4108_v3  ;;  %4061 = vmax.xlane.f32.xlu0 %v4060_v46  ;;  %v4025_v3 = vmul.f32 %v3957_v48, %v10901_v62  ;;  %v4075_v46 = vsel %vm1083_vm4, %v10977_v17, -inf  ;;  %v12114_v48 = vld [vmem:[#allocation2_spill] sm:$0xff] }
 0x8b0   :  { %v10983_v6 = vadd.f32 %v4025_v3, %v10250_v59 }
 0x8b2   :  { %4064 = vmax.xlane.f32.xlu0 %v4063_v21  ;;  %v3971_v21 = vpop.permute.xlu0 %3970  ;;  %v4087_v5 = vsel %vm1083_vm4, %v10983_v6, -inf }
 0x8b6   :  { %4067 = vmax.xlane.f32.xlu0 %v4066_v61  ;;  %v4027_v61 = vmul.f32 %v3971_v21, %v10901_v62  ;;  %v3985_v60 = vpop.permute.xlu0 %3984 }
 0x8b7   :  { %v4029_v41 = vmul.f32 %v3985_v60, %v10901_v62  ;;  %v12116_v60 = vld [vmem:[#allocation4_spill] sm:$0xff] }
 0x8b8   :  { %v10996_v12 = vadd.f32 %v4027_v61, %v10265_v33 }
 0x8ba   :  { %4079 = vmax.xlane.f32.xlu0 %v4078_v28  ;;  %v4090_v28 = vsel %vm1083_vm4, %v10990_v57, -inf  ;;  %v4093_v8 = vsel %vm1083_vm4, %v10996_v12, -inf }
 0x8be   :  { %4082 = vmax.xlane.f32.xlu0 %v4081_v55  ;;  %v11003_v55 = vadd.f32 %v4028_v1, %v10283_v9 }
 0x8c0   :  { %v4096_v38 = vsel %vm1083_vm4, %v11003_v55, -inf }
 0x8c2   :  { %4073 = vmax.xlane.f32.xlu0 %v4072_v44  ;;  %v3999_v44 = vpop.permute.xlu0 %3998 }
 0x8c3   :  { %v4031_v3 = vmul.f32 %v3999_v44, %v10901_v62  ;;  %v11026_v44 = vpop.trf.xlu1 }
 0x8c5   :  { %v11015_v21 = vadd.f32 %v4031_v3, %v12115_v4 }
 0x8c6   :  { %4085 = vmax.xlane.f32.xlu0 %v4084_v14  ;;  %v11009_v14 = vadd.f32 %v4029_v41, %v12114_v48  ;;  %v4013_v36 = vpop.permute.xlu0 %4012 }
 0x8c7   :  { %v4105_v61 = vsel %vm1083_vm4, %v11015_v21, -inf }
 0x8ca   :  { %4076 = vmax.xlane.f32.xlu0 %v4075_v46  ;;  %v4099_v46 = vsel %vm1083_vm4, %v11009_v14, -inf }
 0x8ce   :  { %4088 = vmax.xlane.f32.xlu0 %v4087_v5  ;;  %v4033_v5 = vmul.f32 %v4013_v36, %v10901_v62 }
 0x8d2   :  { %4091 = vmax.xlane.f32.xlu0 %v4090_v28  ;;  %v11021_v28 = vadd.f32 %v4033_v5, %v12116_v60 }
 0x8d4   :  { %v4111_v1 = vsel %vm1083_vm4, %v11021_v28, -inf }
 0x8d6   :  { %4094 = vmax.xlane.f32.xlu0 %v4093_v8 }
 0x8da   :  { %4097 = vmax.xlane.f32.xlu0 %v4096_v38 }
 0x8de   :  { %4100 = vmax.xlane.f32.xlu0 %v4099_v46 }
 0x8e2   :  { %4106 = vmax.xlane.f32.xlu0 %v4105_v61 }
 0x8e6   :  { %4112 = vmax.xlane.f32.xlu0 %v4111_v1 }
 0x92f   :  { %v4056_v8 = vpop.xlane.xlu0 %4055  ;;  %v4071_v46 = vpop.xlane.xlu1 %4070 }
 0x930   :  { %v4114_v41 = vsub.f32 %v10911_v50, %v4056_v8  ;;  %v4119_v61 = vsub.f32 %v10908_v39, %v4071_v46 }
 0x932   :  { %v4134_v38 = vmul.f32 1.442695, %v4114_v41  ;;  %v4144_v8 = vmul.f32 1.442695, %v4119_v61 }
 0x933   :  { %v4059_v3 = vpop.xlane.xlu0 %4058 }
 0x934   :  { %9718 = vpow2.f32 %v4134_v38  ;;  %v4115_v62 = vsub.f32 %v10923_v26, %v4059_v3 }
 0x936   :  { %v4136_v36 = vmul.f32 1.442695, %v4115_v62 }
 0x937   :  { %v4062_v4 = vpop.xlane.xlu0 %4061 }
 0x938   :  { %9720 = vpow2.f32 %v4136_v36  ;;  %v4116_v5 = vsub.f32 %v10934_v15, %v4062_v4 }
 0x93a   :  { %v4138_v60 = vmul.f32 1.442695, %v4116_v5 }
 0x93b   :  { %v4065_v1 = vpop.xlane.xlu0 %4064 }
 0x93c   :  { %9722 = vpow2.f32 %v4138_v60  ;;  %v4117_v50 = vsub.f32 %v10941_v58, %v4065_v1 }
 0x93e   :  { %v4140_v48 = vmul.f32 1.442695, %v4117_v50 }
 0x93f   :  { %v4068_v41 = vpop.xlane.xlu0 %4067 }
 0x940   :  { %9724 = vpow2.f32 %v4140_v48  ;;  %v4118_v38 = vsub.f32 %v10947_v30, %v4068_v41 }
 0x941   :  { %v11033_v26 = vpop.eup %9718  ;;  %9726 = vpow2.f32 %v4144_v8 }
 0x942   :  { %v4142_v3 = vmul.f32 1.442695, %v4118_v38  ;;  %v4174_v15 = vsel %vm1083_vm4, %v11033_v26, 0.0 }
 0x943   :  { %4175 = vadd.xlane.f32.xlu1 %v4174_v15  ;;  %v4080_v39 = vpop.xlane.xlu0 %4079 }
 0x944   :  { %9728 = vpow2.f32 %v4142_v3  ;;  %v4122_v4 = vsub.f32 %v10953_v11, %v4080_v39 }
 0x945   :  { %v11038_v60 = vpop.eup %9720 }
 0x946   :  { %v4150_v58 = vmul.f32 1.442695, %v4122_v4  ;;  %v4177_v48 = vsel %vm1083_vm4, %v11038_v60, 0.0 }
 0x947   :  { %4178 = vadd.xlane.f32.xlu0 %v4177_v48  ;;  %v4083_v30 = vpop.xlane.xlu0 %4082 }
 0x948   :  { %9730 = vpow2.f32 %v4150_v58  ;;  %v4123_v62 = vsub.f32 %v10959_v47, %v4083_v30 }
 0x949   :  { %v11043_v36 = vpop.eup %9722 }
 0x94a   :  { %v4152_v46 = vmul.f32 1.442695, %v4123_v62  ;;  %v4180_v5 = vsel %vm1083_vm4, %v11043_v36, 0.0 }
 0x94b   :  { %4181 = vadd.xlane.f32.xlu1 %v4180_v5  ;;  %v4074_v61 = vpop.xlane.xlu0 %4073 }
 0x94c   :  { %9732 = vpow2.f32 %v4152_v46  ;;  %v4120_v11 = vsub.f32 %v10965_v35, %v4074_v61 }
 0x94d   :  { %v11048_v1 = vpop.eup %9724 }
 0x94e   :  { %v4146_v50 = vmul.f32 1.442695, %v4120_v11  ;;  %v4183_v8 = vsel %vm1083_vm4, %v11048_v1, 0.0  ;;  %v11052_v41 = vpop.eup %9726 }
 0x94f   :  { %4184 = vadd.xlane.f32.xlu0 %v4183_v8  ;;  %v4086_v47 = vpop.xlane.xlu0 %4085  ;;  %v4189_v35 = vsel %vm1083_vm4, %v11052_v41, 0.0 }
 0x950   :  { %9734 = vpow2.f32 %v4146_v50  ;;  %v4124_v38 = vsub.f32 %v10971_v13, %v4086_v47  ;;  %v4104_v47 = vpop.xlane.xlu1 %4103 }
 0x951   :  { %v11055_v3 = vpop.eup %9728 }
 0x952   :  { %v4154_v15 = vmul.f32 1.442695, %v4124_v38  ;;  %v4186_v39 = vsel %vm1083_vm4, %v11055_v3, 0.0 }
 0x953   :  { %4187 = vadd.xlane.f32.xlu1 %v4186_v39  ;;  %v4077_v4 = vpop.xlane.xlu0 %4076  ;;  %4190 = vadd.xlane.f32.xlu0 %v4189_v35 }
 0x954   :  { %9736 = vpow2.f32 %v4154_v15  ;;  %v4121_v58 = vsub.f32 %v10977_v17, %v4077_v4  ;;  %v4130_v4 = vsub.f32 %v10920_v0, %v4104_v47 }
 0x955   :  { %v11062_v48 = vpop.eup %9730 }
 0x956   :  { %v4148_v30 = vmul.f32 1.442695, %v4121_v58  ;;  %v4198_v13 = vsel %vm1083_vm4, %v11062_v48, 0.0 }
 0x957   :  { %4199 = vadd.xlane.f32.xlu1 %v4198_v13  ;;  %v4089_v62 = vpop.xlane.xlu0 %4088 }
 0x958   :  { %9738 = vpow2.f32 %v4148_v30  ;;  %v4125_v46 = vsub.f32 %v10983_v6, %v4089_v62  ;;  %v4110_v30 = vpop.xlane.xlu1 %4109 }
 0x959   :  { %v11067_v5 = vpop.eup %9732 }
 0x95a   :  { %v4156_v61 = vmul.f32 1.442695, %v4125_v46  ;;  %v4201_v11 = vsel %vm1083_vm4, %v11067_v5, 0.0 }
 0x95b   :  { %v4092_v50 = vpop.xlane.xlu0 %4091  ;;  %4202 = vadd.xlane.f32.xlu0 %v4201_v11  ;;  %v4132_v11 = vsub.f32 %v10931_v63, %v4110_v30 }
 0x95c   :  { %9740 = vpow2.f32 %v4156_v61  ;;  %v4126_v17 = vsub.f32 %v10990_v57, %v4092_v50  ;;  %v4166_v61 = vmul.f32 1.442695, %v4130_v4 }
 0x95d   :  { %v11072_v8 = vpop.eup %9734 }
 0x95e   :  { %v4158_v38 = vmul.f32 1.442695, %v4126_v17  ;;  %v4192_v15 = vsel %vm1083_vm4, %v11072_v8, 0.0 }
 0x95f   :  { %4193 = vadd.xlane.f32.xlu1 %v4192_v15  ;;  %v4095_v6 = vpop.xlane.xlu0 %4094 }
 0x960   :  { %9742 = vpow2.f32 %v4158_v38  ;;  %v4127_v39 = vsub.f32 %v10996_v12, %v4095_v6  ;;  %v4170_v38 = vmul.f32 1.442695, %v4132_v11 }
 0x961   :  { %v11077_v35 = vpop.eup %9736 }
 0x962   :  { %v4160_v58 = vmul.f32 1.442695, %v4127_v39  ;;  %v4204_v57 = vsel %vm1083_vm4, %v11077_v35, 0.0 }
 0x963   :  { %v4098_v13 = vpop.xlane.xlu0 %4097  ;;  %4205 = vadd.xlane.f32.xlu0 %v4204_v57 }
 0x964   :  { %9744 = vpow2.f32 %v4160_v58  ;;  %v4128_v62 = vsub.f32 %v11003_v55, %v4098_v13 }
 0x965   :  { %v11083_v46 = vpop.eup %9738 }
 0x966   :  { %v4162_v12 = vmul.f32 1.442695, %v4128_v62  ;;  %v4195_v50 = vsel %vm1083_vm4, %v11083_v46, 0.0 }
 0x967   :  { %4196 = vadd.xlane.f32.xlu1 %v4195_v50  ;;  %v4101_v0 = vpop.xlane.xlu0 %4100 }
 0x968   :  { %9746 = vpow2.f32 %v4162_v12  ;;  %v4129_v17 = vsub.f32 %v11009_v14, %v4101_v0 }
 0x969   :  { %v11089_v47 = vpop.eup %9740  ;;  %9748 = vpow2.f32 %v4166_v61 }
 0x96a   :  { %v4164_v15 = vmul.f32 1.442695, %v4129_v17  ;;  %v4207_v55 = vsel %vm1083_vm4, %v11089_v47, 0.0 }
 0x96b   :  { %v4107_v6 = vpop.xlane.xlu0 %4106  ;;  %4208 = vadd.xlane.f32.xlu0 %v4207_v55  ;;  %v4254_v55 = vmul.f32 %v11033_v26, %v11026_v44  ;;  %v4257_v26 = vmul.f32 %v11048_v1, %v11026_v44 }
 0x96c   :  { %9750 = vpow2.f32 %v4164_v15  ;;  %v4131_v63 = vsub.f32 %v11015_v21, %v4107_v6 }
 0x96d   :  { %v11094_v39 = vpop.eup %9742  ;;  %9752 = vpow2.f32 %v4170_v38 }
 0x96e   :  { %v4168_v4 = vmul.f32 1.442695, %v4131_v63  ;;  %v4210_v14 = vsel %vm1083_vm4, %v11094_v39, 0.0 }
 0x96f   :  { %4211 = vadd.xlane.f32.xlu1 %v4210_v14  ;;  %v4113_v58 = vpop.xlane.xlu0 %4112  ;;  %v4255_v14 = vmul.f32 %v11038_v60, %v11026_v44 }
 0x970   :  { %9754 = vpow2.f32 %v4168_v4  ;;  %v4133_v57 = vsub.f32 %v11021_v28, %v4113_v58  ;;  %v4274_v4 = vsel %vm1083_vm4, %v4254_v55, 0.0  ;;  %v4256_v58 = vmul.f32 %v11043_v36, %v11026_v44 }
 0x971   :  { %v9745_v30 = vpop.eup %9744  ;;  %v4259_v36 = vmul.f32 %v11052_v41, %v11026_v44  ;;  %v4261_v55 = vmul.f32 %v11083_v46, %v11026_v44 }
 0x972   :  { %v4172_v13 = vmul.f32 1.442695, %v4133_v57  ;;  %v4213_v62 = vsel %vm1083_vm4, %v9745_v30, 0.0  ;;  %v4277_v57 = vsel %vm1083_vm4, %v4255_v14, 0.0  ;;  %v4267_v46 = vmul.f32 %v9745_v30, %v11026_v44 }
 0x973   :  { %4214 = vadd.xlane.f32.xlu0 %v4213_v62  ;;  %v4258_v62 = vmul.f32 %v11055_v3, %v11026_v44  ;;  %v4263_v3 = vmul.f32 %v11067_v5, %v11026_v44  ;;  %v4295_v5 = vsel %vm1083_vm4, %v4261_v55, 0.0 }
 0x974   :  { %9756 = vpow2.f32 %v4172_v13  ;;  %v4280_v13 = vsel %vm1083_vm4, %v4256_v58, 0.0 }
 0x975   :  { %v9747_v61 = vpop.eup %9746  ;;  %v4286_v60 = vsel %vm1083_vm4, %v4258_v62, 0.0 }
 0x976   :  { %v4216_v21 = vsel %vm1083_vm4, %v9747_v61, 0.0  ;;  %v9749_v11 = vpop.eup %9748  ;;  %v4268_v58 = vmul.f32 %v9747_v61, %v11026_v44 }
 0x977   :  { %4217 = vadd.xlane.f32.xlu1 %v4216_v21  ;;  %v4222_v0 = vsel %vm1083_vm4, %v9749_v11, 0.0  ;;  %v4283_v21 = vsel %vm1083_vm4, %v4257_v26, 0.0 }
 0x979   :  { %v9751_v12 = vpop.eup %9750 }
 0x97a   :  { %v4219_v50 = vsel %vm1083_vm4, %v9751_v12, 0.0  ;;  %v9753_v17 = vpop.eup %9752 }
 0x97b   :  { %4220 = vadd.xlane.f32.xlu0 %v4219_v50  ;;  %4223 = vadd.xlane.f32.xlu1 %v4222_v0  ;;  %v4228_v15 = vsel %vm1083_vm4, %v9753_v17, 0.0  ;;  %v4262_v50 = vmul.f32 %v11062_v48, %v11026_v44  ;;  %v4289_v0 = vsel %vm1083_vm4, %v4259_v36, 0.0  ;;  %v4264_v48 = vmul.f32 %v11077_v35, %v11026_v44 }
 0x97c   :  { %v4272_v61 = vmul.f32 %v9753_v17, %v11026_v44 }
 0x97d   :  { %v9755_v28 = vpop.eup %9754  ;;  %v4298_v1 = vsel %vm1083_vm4, %v4262_v50, 0.0 }
 0x97e   :  { %v4225_v38 = vsel %vm1083_vm4, %v9755_v28, 0.0  ;;  %v4271_v30 = vmul.f32 %v9755_v28, %v11026_v44 }
 0x97f   :  { %4226 = vadd.xlane.f32.xlu0 %v4225_v38  ;;  %4229 = vadd.xlane.f32.xlu1 %v4228_v15  ;;  %v4260_v38 = vmul.f32 %v11072_v8, %v11026_v44  ;;  %v4301_v15 = vsel %vm1083_vm4, %v4263_v3, 0.0  ;;  %v4265_v8 = vmul.f32 %v11089_v47, %v11026_v44  ;;  %v4269_v47 = vmul.f32 %v9751_v12, %v11026_v44 }
 0x981   :  { %v9757_v6 = vpop.eup %9756  ;;  %v4292_v41 = vsel %vm1083_vm4, %v4260_v38, 0.0  ;;  %v4307_v14 = vsel %vm1083_vm4, %v4265_v8, 0.0  ;;  %v4319_v26 = vsel %vm1083_vm4, %v4269_v47, 0.0 }
 0x982   :  { %v4231_v63 = vsel %vm1083_vm4, %v9757_v6, 0.0  ;;  %v4273_v12 = vmul.f32 %v9757_v6, %v11026_v44 }
 0x983   :  { %4232 = vadd.xlane.f32.xlu0 %v4231_v63  ;;  %4275 = vadd.xlane.f32.xlu1 %v4274_v4  ;;  %v4304_v63 = vsel %vm1083_vm4, %v4264_v48, 0.0  ;;  %v4266_v4 = vmul.f32 %v11094_v39, %v11026_v44  ;;  %v4270_v39 = vmul.f32 %v9749_v11, %v11026_v44  ;;  %v4354_v11 = vld [vmem:[%s12088_s2 + $0x80] sm:$0xff] }
 0x984   :  { %v4331_v36 = vsel %vm1083_vm4, %v4273_v12, 0.0  ;;  %v11162_v50 = vand.u32 4294901760, %v4354_v11 }
 0x985   :  { %v4310_v35 = vsel %vm1083_vm4, %v4266_v4, 0.0  ;;  %v4322_v62 = vsel %vm1083_vm4, %v4270_v39, 0.0 }
 0x986   :  { %v11165_v17 = vsub.f32 %v4354_v11, %v11162_v50  ;;  %9220 = vmatpush3.msra.mxu0 %v11162_v50 }
 0x987   :  { %4278 = vadd.xlane.f32.xlu0 %v4277_v57  ;;  %4281 = vadd.xlane.f32.xlu1 %v4280_v13  ;;  %v4313_v57 = vsel %vm1083_vm4, %v4267_v46, 0.0  ;;  %v4316_v13 = vsel %vm1083_vm4, %v4268_v58, 0.0 }
 0x988   :  { %9241 = vmatprep.subr.mxu0 %v12108_v20  ;;  %v4612_v44 = vand.u32 4294901760, %v11165_v17 }
 0x98a   :  { %v4613_v28 = vsub.f32 %v11165_v17, %v4612_v44 }
 0x98b   :  { %4284 = vadd.xlane.f32.xlu0 %v4283_v21  ;;  %4287 = vadd.xlane.f32.xlu1 %v4286_v60  ;;  %v4325_v21 = vsel %vm1083_vm4, %v4271_v30, 0.0  ;;  %v4328_v60 = vsel %vm1083_vm4, %v4272_v61, 0.0 }
 0x98c   :  { %v4614_v6 = vand.u32 4294901760, %v4613_v28 }
 0x98e   :  { %9231 = vmatpush3.msra.mxu1 %v4614_v6 }
 0x98f   :  { %4290 = vadd.xlane.f32.xlu0 %v4289_v0  ;;  %4299 = vadd.xlane.f32.xlu1 %v4298_v1 }
 0x990   :  { %9252 = vmatprep.subr.mxu1 %v12108_v20 }
 0x993   :  { %4302 = vadd.xlane.f32.xlu0 %v4301_v15  ;;  %4293 = vadd.xlane.f32.xlu1 %v4292_v41 }
 0x997   :  { %4305 = vadd.xlane.f32.xlu0 %v4304_v63  ;;  %4296 = vadd.xlane.f32.xlu1 %v4295_v5 }
 0x99b   :  { %4308 = vadd.xlane.f32.xlu0 %v4307_v14  ;;  %4311 = vadd.xlane.f32.xlu1 %v4310_v35 }
 0x99f   :  { %4314 = vadd.xlane.f32.xlu0 %v4313_v57  ;;  %4317 = vadd.xlane.f32.xlu1 %v4316_v13 }
 0x9a3   :  { %4320 = vadd.xlane.f32.xlu0 %v4319_v26  ;;  %4323 = vadd.xlane.f32.xlu1 %v4322_v62 }
 0x9a7   :  { %4326 = vadd.xlane.f32.xlu0 %v4325_v21  ;;  %4329 = vadd.xlane.f32.xlu1 %v4328_v60 }
 0x9ab   :  { %4332 = vadd.xlane.f32.xlu0 %v4331_v36 }
 0x9cc   :  { %v4176_v0 = vpop.xlane.xlu1 %4175 }
 0x9d0   :  { %v4179_v1 = vpop.xlane.xlu0 %4178 }
 0x9d1   :  { %9758 = vrcp.f32 %v4179_v1 }
 0x9d2   :  { %9760 = vrcp.f32 %v4176_v0 }
 0x9d4   :  { %v4182_v3 = vpop.xlane.xlu1 %4181 }
 0x9d5   :  { %9762 = vrcp.f32 %v4182_v3 }
 0x9d8   :  { %v4185_v38 = vpop.xlane.xlu0 %4184 }
 0x9d9   :  { %9764 = vrcp.f32 %v4185_v38 }
 0x9dc   :  { %v4188_v15 = vpop.xlane.xlu1 %4187  ;;  %v4191_v41 = vpop.xlane.xlu0 %4190 }
 0x9dd   :  { %9766 = vrcp.f32 %v4188_v15 }
 0x9de   :  { %9768 = vrcp.f32 %v4191_v41  ;;  %v9759_v61 = vpop.eup %9758 }
 0x9df   :  { %v9761_v60 = vpop.eup %9760 }
 0x9e0   :  { %v4200_v48 = vpop.xlane.xlu1 %4199 }
 0x9e2   :  { %v9763_v36 = vpop.eup %9762 }
 0x9e4   :  { %v4203_v55 = vpop.xlane.xlu0 %4202 }
 0x9e6   :  { %v9765_v6 = vpop.eup %9764 }
 0x9e8   :  { %v4194_v63 = vpop.xlane.xlu1 %4193 }
 0x9e9   :  { %9770 = vrcp.f32 %v4194_v63 }
 0x9ea   :  { %9772 = vrcp.f32 %v4200_v48  ;;  %v9767_v41 = vpop.eup %9766 }
 0x9eb   :  { %9774 = vrcp.f32 %v4203_v55  ;;  %v9769_v55 = vpop.eup %9768 }
 0x9ec   :  { %v4206_v5 = vpop.xlane.xlu0 %4205 }
 0x9ed   :  { %9776 = vrcp.f32 %v4206_v5 }
 0x9f0   :  { %v4197_v8 = vpop.xlane.xlu1 %4196 }
 0x9f1   :  { %9778 = vrcp.f32 %v4197_v8 }
 0x9f4   :  { %v4209_v4 = vpop.xlane.xlu0 %4208 }
 0x9f5   :  { %9780 = vrcp.f32 %v4209_v4 }
 0x9f8   :  { %v4212_v14 = vpop.xlane.xlu1 %4211 }
 0x9f9   :  { %9782 = vrcp.f32 %v4212_v14  ;;  %v9771_v14 = vpop.eup %9770 }
 0x9fc   :  { %v4215_v35 = vpop.xlane.xlu0 %4214 }
 0x9fd   :  { %9784 = vrcp.f32 %v4215_v35 }
 0xa00   :  { %v4218_v46 = vpop.xlane.xlu1 %4217 }
 0xa01   :  { %9786 = vrcp.f32 %v4218_v46 }
 0xa04   :  { %v4221_v58 = vpop.xlane.xlu0 %4220  ;;  %v4224_v57 = vpop.xlane.xlu1 %4223 }
 0xa05   :  { %9788 = vrcp.f32 %v4221_v58 }
 0xa06   :  { %9790 = vrcp.f32 %v4224_v57 }
 0xa08   :  { %v4227_v13 = vpop.xlane.xlu0 %4226  ;;  %v4230_v47 = vpop.xlane.xlu1 %4229 }
 0xa09   :  { %9792 = vrcp.f32 %v4227_v13 }
 0xa0a   :  { %9794 = vrcp.f32 %v4230_v47 }
 0xa0c   :  { %v11174_v39 = vpop.xlane.xlu0 %4232  ;;  %v4276_v26 = vpop.xlane.xlu1 %4275 }
 0xa0d   :  { %v4334_v28 = vmul.f32 %v9761_v60, %v4276_v26  ;;  %9796 = vrcp.f32 %v11174_v39 }
 0xa0f   :  { %v4383_v48 = vrot.slane %v4334_v28, %v10479_v25 }
 0xa10   :  { %v4279_v62 = vpop.xlane.xlu0 %4278  ;;  %v4282_v30 = vpop.xlane.xlu1 %4281 }
 0xa11   :  { %v4335_v21 = vmul.f32 %v9759_v61, %v4279_v62  ;;  %v4336_v0 = vmul.f32 %v9763_v36, %v4282_v30  ;;  %v9773_v61 = vpop.eup %9772 }
 0xa12   :  { %v9775_v60 = vpop.eup %9774 }
 0xa13   :  { %v4387_v1 = vrot.slane %v4335_v21, %v10479_v25  ;;  %v4391_v63 = vrot.slane %v4336_v0, %v10479_v25  ;;  %v9777_v35 = vpop.eup %9776 }
 0xa14   :  { %v4285_v12 = vpop.xlane.xlu0 %4284  ;;  %v4288_v11 = vpop.xlane.xlu1 %4287 }
 0xa15   :  { %v4337_v3 = vmul.f32 %v9765_v6, %v4285_v12  ;;  %v4338_v5 = vmul.f32 %v9767_v41, %v4288_v11  ;;  %v4460_v8 = vsel %vm1490_vm6, %v4387_v1, %v4383_v48  ;;  %v9779_v6 = vpop.eup %9778 }
 0xa16   :  { %v4461_v12 = vsel %vm1492_vm7, %v4391_v63, %v4460_v8  ;;  %v9781_v63 = vpop.eup %9780 }
 0xa17   :  { %v4395_v4 = vrot.slane %v4337_v3, %v10479_v25  ;;  %v4399_v36 = vrot.slane %v4338_v5, %v10479_v25 }
 0xa18   :  { %v4291_v38 = vpop.xlane.xlu0 %4290  ;;  %v4300_v15 = vpop.xlane.xlu1 %4299 }
 0xa19   :  { %v4339_v26 = vmul.f32 %v9769_v55, %v4291_v38  ;;  %v4462_v11 = vsel %vm1494_vm8, %v4395_v4, %v4461_v12  ;;  %v4342_v38 = vmul.f32 %v9773_v61, %v4300_v15  ;;  %v9783_v4 = vpop.eup %9782 }
 0xa1a   :  { %v4463_v55 = vsel %vm1496_vm9, %v4399_v36, %v4462_v11 }
 0xa1b   :  { %v4403_v46 = vrot.slane %v4339_v26, %v10479_v25 }
 0xa1c   :  { %v4303_v62 = vpop.xlane.xlu0 %4302  ;;  %v4294_v30 = vpop.xlane.xlu1 %4293 }
 0xa1d   :  { %v4340_v21 = vmul.f32 %v9771_v14, %v4294_v30  ;;  %v4343_v28 = vmul.f32 %v9775_v60, %v4303_v62  ;;  %v4464_v58 = vsel %vm1498_vm10, %v4403_v46, %v4463_v55  ;;  %v4415_v62 = vrot.slane %v4342_v38, %v10479_v25 }
 0xa1f   :  { %v4407_v0 = vrot.slane %v4340_v21, %v10479_v25  ;;  %v4419_v5 = vrot.slane %v4343_v28, %v10479_v25  ;;  %v9785_v21 = vpop.eup %9784 }
 0xa20   :  { %v4306_v1 = vpop.xlane.xlu0 %4305  ;;  %v4297_v3 = vpop.xlane.xlu1 %4296 }
 0xa21   :  { %v4344_v41 = vmul.f32 %v9777_v35, %v4306_v1  ;;  %v4341_v48 = vmul.f32 %v9779_v6, %v4297_v3  ;;  %v4465_v26 = vsel %vm1500_vm11, %v4407_v0, %v4464_v58  ;;  %v4467_v60 = vsel %vm1490_vm6, %v4419_v5, %v4415_v62  ;;  %v9787_v35 = vpop.eup %9786 }
 0xa23   :  { %v4411_v8 = vrot.slane %v4341_v48, %v10479_v25  ;;  %v4423_v14 = vrot.slane %v4344_v41, %v10479_v25  ;;  %v9789_v48 = vpop.eup %9788 }
 0xa24   :  { %v4309_v57 = vpop.xlane.xlu0 %4308  ;;  %v4312_v15 = vpop.xlane.xlu1 %4311 }
 0xa25   :  { %v4466_v13 = vsel %vm1502_vm12, %v4411_v8, %v4465_v26  ;;  %v4345_v30 = vmul.f32 %v9781_v63, %v4309_v57  ;;  %v4346_v61 = vmul.f32 %v9783_v4, %v4312_v15  ;;  %v4468_v11 = vsel %vm1492_vm7, %v4423_v14, %v4467_v60  ;;  %v9791_v14 = vpop.eup %9790 }
 0xa26   :  { %v4477_v47 = vsel %vm217_vm1, %v4466_v13, 0  ;;  %v9793_v57 = vpop.eup %9792 }
 0xa27   :  { %v11197_v12 = vand.u32 4294901760, %v4477_v47  ;;  %v4427_v36 = vrot.slane %v4345_v30, %v10479_v25  ;;  %v4431_v46 = vrot.slane %v4346_v61, %v10479_v25  ;;  %v9795_v30 = vpop.eup %9794 }
 0xa28   :  { %v4315_v28 = vpop.xlane.xlu0 %4314  ;;  %v4318_v6 = vpop.xlane.xlu1 %4317 }
 0xa29   :  { %v11203_v0 = vsub.f32 %v4477_v47, %v11197_v12  ;;  %v4469_v1 = vsel %vm1494_vm8, %v4427_v36, %v4468_v11  ;;  %v4347_v3 = vmul.f32 %v9785_v21, %v4315_v28  ;;  %v4348_v39 = vmul.f32 %v9787_v35, %v4318_v6  ;;  %9233 = vmatmul.mubr.f32.vlgmr.msra.gmra.mxu1 %v11197_v12 }
 0xa2a   :  { %9235 = vmatprep.mubr.msk.f32.mxu1 %vm9918_vm0, %v12108_v20  ;;  %9253 = vmatpush3.msra.mxu1 %v11162_v50  ;;  %v4470_v55 = vsel %vm1496_vm9, %v4431_v46, %v4469_v1  ;;  %v9797_v1 = vpop.eup %9796 }
 0xa2b   :  { %v4435_v38 = vrot.slane %v4347_v3, %v10479_v25  ;;  %v4551_v41 = vand.u32 4294901760, %v11203_v0  ;;  %9274 = vmatprep.subr.mxu1 %v12108_v20  ;;  %v4439_v63 = vrot.slane %v4348_v39, %v10479_v25 }
 0xa2c   :  { %v4321_v58 = vpop.xlane.xlu0 %4320  ;;  %v4324_v5 = vpop.xlane.xlu1 %4323 }
 0xa2d   :  { %v4471_v8 = vsel %vm1498_vm10, %v4435_v38, %v4470_v55  ;;  %v4349_v4 = vmul.f32 %v9789_v48, %v4321_v58  ;;  %v4552_v26 = vsub.f32 %v11203_v0, %v4551_v41  ;;  %v4350_v62 = vmul.f32 %v9791_v14, %v4324_v5 }
 0xa2e   :  { %v4472_v61 = vsel %vm1500_vm11, %v4439_v63, %v4471_v8 }
 0xa2f   :  { %v4443_v15 = vrot.slane %v4349_v4, %v10479_v25  ;;  %v4553_v13 = vand.u32 4294901760, %v4552_v26  ;;  %v4447_v46 = vrot.slane %v4350_v62, %v10479_v25 }
 0xa30   :  { %v4327_v47 = vpop.xlane.xlu0 %4326  ;;  %v4330_v21 = vpop.xlane.xlu1 %4329 }
 0xa31   :  { %v4473_v60 = vsel %vm1502_vm12, %v4443_v15, %v4472_v61  ;;  %v4351_v36 = vmul.f32 %v9793_v57, %v4327_v47  ;;  %v4352_v35 = vmul.f32 %v9795_v30, %v4330_v21  ;;  %9222 = vmatmul.mubr.f32.vlgmr.msra.gmra.mxu0 %v4553_v13 }
 0xa32   :  { %v4479_v11 = vsel %vm217_vm1, %v4473_v60, 0  ;;  %9224 = vmatprep.mubr.msk.f32.mxu0 %vm9918_vm0, %v12108_v20  ;;  %9242 = vmatpush3.msra.mxu0 %v11165_v17 }
 0xa33   :  { %v4451_v28 = vrot.slane %v4351_v36, %v10479_v25  ;;  %v4559_v6 = vand.u32 4294901760, %v4479_v11  ;;  %9263 = vmatprep.subr.mxu0 %v12108_v20  ;;  %v4455_v3 = vrot.slane %v4352_v35, %v10479_v25 }
 0xa34   :  { %v4333_v39 = vpop.xlane.xlu0 %4332 }
 0xa35   :  { %v4474_v38 = vsel %vm1490_vm6, %v4451_v28, %v4447_v46  ;;  %v4353_v48 = vmul.f32 %v9797_v1, %v4333_v39  ;;  %9236 = vmatmul.mubr.f32.gmra.mxu1 %v4559_v6  ;;  %v4560_v55 = vsub.f32 %v4479_v11, %v4559_v6  ;;  %v8596_v28 = vld [vmem:[%s12088_s2 + $0x88] ss:$0 sm:$0xff] }
 0xa36   :  { %9238 = vmatprep.mubr.msk.f32.mxu1 %vm9918_vm0, %v12108_v20  ;;  %v4475_v5 = vsel %vm1492_vm7, %v4455_v3, %v4474_v38 }
 0xa37   :  { %v4459_v63 = vrot.slane %v4353_v48, %v10479_v25  ;;  %v4561_v58 = vand.u32 4294901760, %v4560_v55 }
 0xa39   :  { %v4476_v8 = vsel %vm1494_vm8, %v4459_v63, %v4475_v5  ;;  %v4562_v4 = vsub.f32 %v4560_v55, %v4561_v58 }
 0xa3a   :  { %v4481_v26 = vsel %vm217_vm1, %v4476_v8, 0 }
 0xa3b   :  { %v4563_v14 = vand.u32 4294901760, %v4562_v4  ;;  %v4569_v57 = vand.u32 4294901760, %v4481_v26 }
 0xa3d   :  { %9225 = vmatmul.mubr.f32.gmra.mxu0 %v4563_v14  ;;  %9239 = vmatmul.mubr.f32.gmra.mxu1 %v4569_v57  ;;  %v4570_v15 = vsub.f32 %v4481_v26, %v4569_v57 }
 0xa3e   :  { %9254 = vmatprep.mubr.msk.f32.mxu1 %vm9918_vm0, %v12108_v20  ;;  %9227 = vmatprep.mubr.msk.f32.mxu0 %vm9918_vm0, %v12108_v20 }
 0xa3f   :  { %v4571_v62 = vand.u32 4294901760, %v4570_v15 }
 0xa41   :  { %9255 = vmatmul.mubr.f32.vlgmr.msra.gmra.mxu1 %v4551_v41  ;;  %v4572_v13 = vsub.f32 %v4570_v15, %v4571_v62 }
 0xa42   :  { %9257 = vmatprep.mubr.msk.f32.mxu1 %vm9918_vm0, %v12108_v20  ;;  %9275 = vmatpush3.msra.mxu1 %v11162_v50 }
 0xa43   :  { %v4573_v30 = vand.u32 4294901760, %v4572_v13  ;;  %9296 = vmatprep.subr.mxu1 %v12108_v20 }
 0xa45   :  { %9228 = vmatmul.mubr.f32.gmra.mxu0 %v4573_v30  ;;  %9258 = vmatmul.mubr.f32.gmra.mxu1 %v4561_v58 }
 0xa46   :  { %9243 = vmatprep.mubr.msk.f32.mxu0 %vm9918_vm0, %v12108_v20  ;;  %9260 = vmatprep.mubr.msk.f32.mxu1 %vm9918_vm0, %v12108_v20 }
 0xa49   :  { %9244 = vmatmul.mubr.f32.vlgmr.msra.gmra.mxu0 %v11203_v0  ;;  %9261 = vmatmul.mubr.f32.gmra.mxu1 %v4571_v62 }
 0xa4a   :  { %9264 = vmatpush3.msra.mxu0 %v4612_v44  ;;  %9246 = vmatprep.mubr.msk.f32.mxu0 %vm9918_vm0, %v12108_v20 }
 0xa4b   :  { %9276 = vmatprep.mubr.msk.f32.mxu1 %vm9918_vm0, %v12108_v20  ;;  %9285 = vmatprep.subr.mxu0 %v12108_v20 }
 0xa4d   :  { %9247 = vmatmul.mubr.f32.gmra.mxu0 %v4560_v55  ;;  %9277 = vmatmul.mubr.f32.vlgmr.msra.gmra.mxu1 %v11197_v12 }
 0xa4e   :  { %9249 = vmatprep.mubr.msk.f32.mxu0 %vm9918_vm0, %v12108_v20  ;;  %9279 = vmatprep.mubr.msk.f32.mxu1 %vm9918_vm0, %v12108_v20 }
 0xa51   :  { %9250 = vmatmul.mubr.f32.gmra.mxu0 %v4570_v15  ;;  %9280 = vmatmul.mubr.f32.gmra.mxu1 %v4559_v6 }
 0xa52   :  { %9265 = vmatprep.mubr.msk.f32.mxu0 %vm9918_vm0, %v12108_v20  ;;  %9282 = vmatprep.mubr.msk.f32.mxu1 %vm9918_vm0, %v12108_v20 }
 0xa55   :  { %9266 = vmatmul.mubr.f32.vlgmr.msra.gmra.mxu0 %v11197_v12  ;;  %9283 = vmatmul.mubr.f32.gmra.mxu1 %v4569_v57 }
 0xa56   :  { %9268 = vmatprep.mubr.msk.f32.mxu0 %vm9918_vm0, %v12108_v20  ;;  %9298 = vmatprep.mubr.msk.f32.mxu1 %vm9918_vm0, %v12108_v20 }
 0xa59   :  { %9269 = vmatmul.mubr.f32.gmra.mxu0 %v4559_v6 }
 0xa5a   :  { %9271 = vmatprep.mubr.msk.f32.mxu0 %vm9918_vm0, %v12108_v20 }
 0xa5d   :  { %9272 = vmatmul.mubr.f32.gmra.mxu0 %v4569_v57 }
 0xa5e   :  { %9287 = vmatprep.mubr.msk.f32.mxu0 %vm9918_vm0, %v12108_v20 }
 0xae9   :  { %v4651_v50 = vpop.f32.mrf.mxu1 }
 0xaeb   :  { %v9234_v17 = vpop.f32.mrf.mxu1 }
 0xaf1   :  { %v4555_v44 = vpop.f32.mrf.mxu0 }
 0xaf2   :  { %v4556_v38 = vadd.f32 %v8596_v28, %v4555_v44 }
 0xaf3   :  { %v9223_v0 = vpop.f32.mrf.mxu0 }
 0xaf4   :  { %v4652_v8 = vadd.f32 %v4651_v50, %v4556_v38 }
 0xaf5   :  { %v4657_v12 = vpop.f32.mrf.mxu1 }
 0xaf7   :  { %v9237_v41 = vpop.f32.mrf.mxu1 }
 0xafd   :  { %v4565_v61 = vpop.f32.mrf.mxu0  ;;  %v4663_v47 = vpop.f32.mrf.mxu1 }
 0xafe   :  { %v4566_v5 = vadd.f32 %v8596_v28, %v4565_v61 }
 0xaff   :  { %v9226_v21 = vpop.f32.mrf.mxu0  ;;  %v9240_v60 = vpop.f32.mrf.mxu1 }
 0xb00   :  { %v4658_v13 = vadd.f32 %v4657_v12, %v4566_v5 }
 0xb01   :  { %v4825_v36 = vpop.f32.mrf.mxu1 }
 0xb03   :  { %v9256_v35 = vpop.f32.mrf.mxu1 }
 0xb05   :  { %v4575_v11 = vpop.f32.mrf.mxu0  ;;  %v4833_v46 = vpop.f32.mrf.mxu1 }
 0xb06   :  { %v4576_v62 = vadd.f32 %v8596_v28, %v4575_v11  ;;  %v9914_v11 = vld [vmem:[%s12090_s1] sm:$0xff] }
 0xb07   :  { %v9229_v6 = vpop.f32.mrf.mxu0  ;;  %v9259_v1 = vpop.f32.mrf.mxu1 }
 0xb08   :  { %v4664_v44 = vadd.f32 %v4663_v47, %v4576_v62 }
 0xb09   :  { %v4737_v3 = vpop.f32.mrf.mxu0  ;;  %v4841_v39 = vpop.f32.mrf.mxu1 }
 0xb0a   :  { %v4738_v14 = vadd.f32 %v4737_v3, %v4652_v8 }
 0xb0b   :  { %v9245_v48 = vpop.f32.mrf.mxu0  ;;  %v9262_v55 = vpop.f32.mrf.mxu1 }
 0xb0c   :  { %v4826_v41 = vadd.f32 %v4825_v36, %v4738_v14  ;;  %v12117_v14 = vld [vmem:[#allocation5_spill] sm:$0xff] }
 0xb0d   :  { %v4744_v63 = vpop.f32.mrf.mxu0  ;;  %v4999_v58 = vpop.f32.mrf.mxu1 }
 0xb0e   :  { %v4745_v0 = vadd.f32 %v4744_v63, %v4658_v13 }
 0xb0f   :  { %v9248_v4 = vpop.f32.mrf.mxu0  ;;  %v9278_v26 = vpop.f32.mrf.mxu1 }
 0xb10   :  { %v4834_v50 = vadd.f32 %v4833_v46, %v4745_v0  ;;  %v12119_v0 = vld [vmem:[#allocation6_spill] sm:$0xff] }
 0xb11   :  { %v4751_v57 = vpop.f32.mrf.mxu0  ;;  %v5005_v15 = vpop.f32.mrf.mxu1 }
 0xb12   :  { %v4752_v48 = vadd.f32 %v4751_v57, %v4664_v44  ;;  %v3223_v57 = vadd.f32 %v10865_v52, %v12117_v14 }
 0xb13   :  { %v9251_v30 = vpop.f32.mrf.mxu0  ;;  %v9281_v17 = vpop.f32.mrf.mxu1 }
 0xb14   :  { %v4842_v63 = vadd.f32 %v4841_v39, %v4752_v48  ;;  %v9916_v39 = vld [vmem:[%s12090_s1 + $0x10] sm:$0xf]  ;;  %v3227_v62 = vsel %vm217_vm1, %v3223_v57, 0.0  ;;  %v12118_v30 = vld [vmem:[#allocation7_spill] sm:$0xff] }
 0xb15   :  { %v4915_v21 = vpop.f32.mrf.mxu0  ;;  %v5011_v60 = vpop.f32.mrf.mxu1  ;;  %v3225_v17 = vadd.f32 %v10869_v19, %v12118_v30 }
 0xb16   :  { %v4916_v35 = vadd.f32 %v4915_v21, %v4826_v41  ;;  %v3224_v41 = vadd.f32 %v10867_v32, %v12119_v0 }
 0xb17   :  { %v9267_v6 = vpop.f32.mrf.mxu0  ;;  %v9284_v1 = vpop.f32.mrf.mxu1  ;;  %v3233_v52 = vsel %vm2062_vm13, %v3225_v17, 0.0 }
 0xb18   :  { %v5000_v61 = vadd.f32 %v4999_v58, %v4916_v35  ;;  %v9915_v58 = vld [vmem:[%s12090_s1 + $0x8] sm:$0xff]  ;;  %v3230_v21 = vsel %vm217_vm1, %v3224_v41, 0.0 }
 0xb19   :  { %v4921_v38 = vpop.f32.mrf.mxu0 }
 0xb1a   :  { %v4922_v55 = vadd.f32 %v4921_v38, %v4834_v50  ;;  %v5015_v12 = vadd.f32 %v9914_v11, %v5000_v61 }
 0xb1b   :  { %v9270_v28 = vpop.f32.mrf.mxu0 }
 0xb1c   :  { %v5006_v3 = vadd.f32 %v5005_v15, %v4922_v55  ;;  %v5019_v36 = vsel %vm217_vm1, %v5015_v12, 0.0 }
 0xb1d   :  { %5020 = vadd.xlane.f32.xlu1 %v5019_v36  ;;  %v4927_v47 = vpop.f32.mrf.mxu0 }
 0xb1e   :  { %v4928_v5 = vadd.f32 %v4927_v47, %v4842_v63  ;;  %v5016_v46 = vadd.f32 %v9915_v58, %v5006_v3 }
 0xb1f   :  { %v9273_v8 = vpop.f32.mrf.mxu0 }
 0xb20   :  { %v5012_v4 = vadd.f32 %v5011_v60, %v4928_v5  ;;  %v5022_v26 = vsel %vm217_vm1, %v5016_v46, 0.0  ;;  %v5072_v60 = vld [vmem:[%s12088_s2 + $0x98] sm:$0xff] }
 0xb21   :  { %5023 = vadd.xlane.f32.xlu0 %v5022_v26  ;;  %v11300_v44 = vand.u32 4294901760, %v5072_v60 }
 0xb22   :  { %v5017_v15 = vadd.f32 %v9916_v39, %v5012_v4 }
 0xb23   :  { %9286 = vmatpush3.msra.mxu0 %v11300_v44 }
 0xb24   :  { %v5025_v13 = vsel %vm2062_vm13, %v5017_v15, 0.0  ;;  %9307 = vmatprep.subr.mxu0 %v12108_v20 }
 0xb25   :  { %3228 = vadd.xlane.f32.xlu0 %v3227_v62  ;;  %5026 = vadd.xlane.f32.xlu1 %v5025_v13 }
 0xb29   :  { %3234 = vadd.xlane.f32.xlu0 %v3233_v52  ;;  %3231 = vadd.xlane.f32.xlu1 %v3230_v21  ;;  %v11342_v21 = vld [vmem:[%s12088_s2 + $0xa0] ss:$0 sm:$0xff] }
 0xba6   :  { %v5021_v19 = vpop.xlane.xlu1 %5020 }
 0xba7   :  { %v5028_v32 = vmul.f32 0.125, %v5021_v19 }
 0xba9   :  { %v5031_v35 = vsub.f32 %v5015_v12, %v5028_v32 }
 0xbaa   :  { %v5024_v6 = vpop.xlane.xlu0 %5023 }
 0xbab   :  { %v5029_v1 = vmul.f32 0.125, %v5024_v6  ;;  %v5034_v48 = vmul.f32 %v5031_v35, %v5031_v35 }
 0xbad   :  { %v11304_v61 = vsub.f32 %v5016_v46, %v5029_v1  ;;  %v5037_v50 = vsel %vm217_vm1, %v5034_v48, 0.0 }
 0xbae   :  { %v3229_v38 = vpop.xlane.xlu0 %3228  ;;  %5038 = vadd.xlane.f32.xlu1 %v5037_v50  ;;  %v5027_v55 = vpop.xlane.xlu1 %5026 }
 0xbaf   :  { %v3236_v11 = vmul.f32 0.125, %v3229_v38  ;;  %v5030_v28 = vmul.f32 0.125, %v5027_v55  ;;  %v5035_v3 = vmul.f32 %v11304_v61, %v11304_v61 }
 0xbb1   :  { %v11309_v36 = vsub.f32 %v3223_v57, %v3236_v11  ;;  %v11311_v63 = vsub.f32 %v5017_v15, %v5030_v28  ;;  %v5040_v12 = vsel %vm217_vm1, %v5035_v3, 0.0  ;;  %v5018_v28 = vld [vmem:[%s12088_s2 + $0x90] sm:$0x3] }
 0xbb2   :  { %5041 = vadd.xlane.f32.xlu0 %v5040_v12  ;;  %v3235_v47 = vpop.xlane.xlu0 %3234  ;;  %v3232_v5 = vpop.xlane.xlu1 %3231 }
 0xbb3   :  { %v3238_v58 = vmul.f32 0.125, %v3235_v47  ;;  %v3237_v46 = vmul.f32 0.125, %v3232_v5  ;;  %v3242_v8 = vmul.f32 %v11309_v36, %v11309_v36  ;;  %v5036_v4 = vmul.f32 %v11311_v63, %v11311_v63 }
 0xbb4   :  { %v5061_v47 = vrot.slane %v5018_v28, %v10034_v10 }
 0xbb5   :  { %v11318_v26 = vsub.f32 %v3225_v17, %v3238_v58  ;;  %v11320_v14 = vsub.f32 %v3224_v41, %v3237_v46  ;;  %v3245_v57 = vsel %vm217_vm1, %v3242_v8, 0.0  ;;  %v5043_v39 = vsel %vm2062_vm13, %v5036_v4, 0.0 }
 0xbb6   :  { %3246 = vadd.xlane.f32.xlu0 %v3245_v57  ;;  %5044 = vadd.xlane.f32.xlu1 %v5043_v39  ;;  %v11332_v17 = vsub.f32 %v5072_v60, %v11300_v44  ;;  %v5068_v46 = vrot.slane %v5018_v28, %v10037_v18 }
 0xbb7   :  { %v3244_v15 = vmul.f32 %v11318_v26, %v11318_v26  ;;  %v3243_v62 = vmul.f32 %v11320_v14, %v11320_v14 }
 0xbb8   :  { %v5216_v0 = vand.u32 4294901760, %v11332_v17 }
 0xbb9   :  { %v3251_v13 = vsel %vm2062_vm13, %v3244_v15, 0.0  ;;  %v3248_v30 = vsel %vm217_vm1, %v3243_v62, 0.0 }
 0xbba   :  { %3252 = vadd.xlane.f32.xlu0 %v3251_v13  ;;  %3249 = vadd.xlane.f32.xlu1 %v3248_v30  ;;  %v5217_v41 = vsub.f32 %v11332_v17, %v5216_v0 }
 0xbbc   :  { %v5218_v52 = vand.u32 4294901760, %v5217_v41 }
 0xbbe   :  { %9297 = vmatpush3.msra.mxu1 %v5218_v52 }
 0xbbf   :  { %9318 = vmatprep.subr.mxu1 %v12108_v20 }
 0xbcb   :  { %5620 = vrot.lane.b32.xlu1 %v5072_v60, %s9919_s27 }
 0xbd0   :  { %5624 = vrot.lane.b32.xlu0 %v11342_v21, %s9919_s27 }
 0xc37   :  { %v5039_v60 = vpop.xlane.xlu1 %5038 }
 0xc38   :  { %v5046_v19 = vmul.f32 0.125, %v5039_v60 }
 0xc3a   :  { %v5049_v32 = vadd.f32 1e-05, %v5046_v19 }
 0xc3b   :  { %v5042_v6 = vpop.xlane.xlu0 %5041 }
 0xc3c   :  { %9798 = vrsqrt.f32 %v5049_v32  ;;  %v5047_v1 = vmul.f32 0.125, %v5042_v6 }
 0xc3e   :  { %v5050_v48 = vadd.f32 1e-05, %v5047_v1 }
 0xc3f   :  { %v5045_v50 = vpop.xlane.xlu1 %5044  ;;  %v3247_v11 = vpop.xlane.xlu0 %3246 }
 0xc40   :  { %9800 = vrsqrt.f32 %v5050_v48  ;;  %v5048_v38 = vmul.f32 0.125, %v5045_v50  ;;  %v3254_v3 = vmul.f32 0.125, %v3247_v11 }
 0xc42   :  { %v5051_v55 = vadd.f32 1e-05, %v5048_v38  ;;  %v3257_v8 = vadd.f32 1e-05, %v3254_v3 }
 0xc43   :  { %v3250_v12 = vpop.xlane.xlu1 %3249  ;;  %v3253_v57 = vpop.xlane.xlu0 %3252 }
 0xc44   :  { %9802 = vrsqrt.f32 %v5051_v55  ;;  %v3255_v4 = vmul.f32 0.125, %v3250_v12  ;;  %v3256_v30 = vmul.f32 0.125, %v3253_v57 }
 0xc45   :  { %9804 = vrsqrt.f32 %v3257_v8 }
 0xc46   :  { %v3258_v41 = vadd.f32 1e-05, %v3255_v4  ;;  %v3259_v6 = vadd.f32 1e-05, %v3256_v30 }
 0xc47   :  { %v5621_v3 = vpop.permute.xlu1 %5620 }
 0xc48   :  { %9806 = vrsqrt.f32 %v3258_v41  ;;  %v11381_v8 = vand.u32 4294901760, %v5621_v3 }
 0xc49   :  { %v9799_v5 = vpop.eup %9798  ;;  %9808 = vrsqrt.f32 %v3259_v6 }
 0xc4a   :  { %v5055_v58 = vmul.f32 %v9799_v5, %v5031_v35  ;;  %v11395_v30 = vsub.f32 %v5621_v3, %v11381_v8 }
 0xc4c   :  { %v5062_v39 = vmul.f32 %v5061_v47, %v5055_v58 }
 0xc4d   :  { %v9801_v15 = vpop.eup %9800 }
 0xc4e   :  { %v11351_v62 = vadd.f32 %v5068_v46, %v5062_v39  ;;  %v5056_v13 = vmul.f32 %v9801_v15, %v11304_v61 }
 0xc50   :  { %v5079_v52 = vsel %vm217_vm1, %v11351_v62, 0  ;;  %v5063_v60 = vmul.f32 %v5061_v47, %v5056_v13 }
 0xc51   :  { %v11356_v19 = vand.u32 4294901760, %v5079_v52  ;;  %v9803_v35 = vpop.eup %9802 }
 0xc52   :  { %v11358_v32 = vadd.f32 %v5068_v46, %v5063_v60  ;;  %v5057_v61 = vmul.f32 %v9803_v35, %v11311_v63  ;;  %v9805_v57 = vpop.eup %9804 }
 0xc53   :  { %v5154_v1 = vsub.f32 %v5079_v52, %v11356_v19  ;;  %9299 = vmatmul.mubr.f32.vlgmr.msra.gmra.mxu1 %v11356_v19  ;;  %v3263_v52 = vmul.f32 %v9805_v57, %v11309_v36 }
 0xc54   :  { %9301 = vmatprep.mubr.msk.f32.mxu1 %vm9918_vm0, %v12108_v20  ;;  %v5082_v48 = vsel %vm217_vm1, %v11358_v32, 0  ;;  %9319 = vmatpush3.msra.mxu1 %v11300_v44  ;;  %v5064_v55 = vmul.f32 %v5061_v47, %v5057_v61  ;;  %v5765_v61 = vand.u32 4294901760, %v11395_v30 }
 0xc55   :  { %v11368_v50 = vand.u32 4294901760, %v5082_v48  ;;  %v5155_v38 = vand.u32 4294901760, %v5154_v1  ;;  %9340 = vmatprep.subr.mxu1 %v12108_v20  ;;  %v9807_v60 = vpop.eup %9806 }
 0xc56   :  { %v11372_v28 = vadd.f32 %v5068_v46, %v5064_v55  ;;  %v3226_v46 = vld [vmem:[%s12088_s2 + $0x68] sm:$0x3]  ;;  %v3264_v55 = vmul.f32 %v9807_v60, %v11320_v14 }
 0xc57   :  { %9302 = vmatmul.mubr.f32.gmra.mxu1 %v11368_v50  ;;  %v5156_v11 = vsub.f32 %v5154_v1, %v5155_v38  ;;  %v5164_v63 = vsub.f32 %v5082_v48, %v11368_v50  ;;  %v3269_v41 = vrot.slane %v3226_v46, %v10034_v10  ;;  %v3276_v48 = vrot.slane %v3226_v46, %v10037_v18 }
 0xc58   :  { %9304 = vmatprep.mubr.msk.f32.mxu1 %vm9918_vm0, %v12108_v20  ;;  %v5085_v5 = vsel %vm217_vm1, %v11372_v28, 0 }
 0xc59   :  { %v5157_v12 = vand.u32 4294901760, %v5156_v11  ;;  %v5165_v58 = vand.u32 4294901760, %v5164_v63  ;;  %v11379_v47 = vand.u32 4294901760, %v5085_v5  ;;  %v3270_v36 = vmul.f32 %v3269_v41, %v3263_v52 }
 0xc5a   :  { %v3271_v3 = vmul.f32 %v3269_v41, %v3264_v55 }
 0xc5b   :  { %9288 = vmatmul.mubr.f32.vlgmr.msra.gmra.mxu0 %v5157_v12  ;;  %v5166_v4 = vsub.f32 %v5164_v63, %v5165_v58  ;;  %v5174_v39 = vsub.f32 %v5085_v5, %v11379_v47  ;;  %9305 = vmatmul.mubr.f32.gmra.mxu1 %v11379_v47  ;;  %v3277_v11 = vadd.f32 %v3276_v48, %v3270_v36 }
 0xc5c   :  { %9308 = vmatpush3.msra.mxu0 %v11332_v17  ;;  %9290 = vmatprep.mubr.msk.f32.mxu0 %vm9918_vm0, %v12108_v20 }
 0xc5d   :  { %9320 = vmatprep.mubr.msk.f32.mxu1 %vm9918_vm0, %v12108_v20  ;;  %v5167_v15 = vand.u32 4294901760, %v5166_v4  ;;  %v5175_v13 = vand.u32 4294901760, %v5174_v39  ;;  %9329 = vmatprep.subr.mxu0 %v12108_v20  ;;  %v5628_v5 = vsel %vm217_vm1, %v3277_v11, 0 }
 0xc5f   :  { %9291 = vmatmul.mubr.f32.gmra.mxu0 %v5167_v15  ;;  %9321 = vmatmul.mubr.f32.vlgmr.msra.gmra.mxu1 %v5155_v38  ;;  %v5176_v35 = vsub.f32 %v5174_v39, %v5175_v13  ;;  %v9809_v38 = vpop.eup %9808 }
 0xc60   :  { %9293 = vmatprep.mubr.msk.f32.mxu0 %vm9918_vm0, %v12108_v20  ;;  %9323 = vmatprep.mubr.msk.f32.mxu1 %vm9918_vm0, %v12108_v20  ;;  %v3265_v12 = vmul.f32 %v9809_v38, %v11318_v26  ;;  %v11429_v26 = vand.u32 4294901760, %v5628_v5 }
 0xc61   :  { %9341 = vmatpush3.msra.mxu1 %v11300_v44  ;;  %v5177_v6 = vand.u32 4294901760, %v5176_v35  ;;  %v5766_v44 = vsub.f32 %v11395_v30, %v5765_v61 }
 0xc62   :  { %9362 = vmatprep.subr.mxu1 %v12108_v20  ;;  %v3272_v4 = vmul.f32 %v3269_v41, %v3265_v12 }
 0xc63   :  { %9294 = vmatmul.mubr.f32.gmra.mxu0 %v5177_v6  ;;  %9324 = vmatmul.mubr.f32.gmra.mxu1 %v5165_v58  ;;  %v5767_v14 = vand.u32 4294901760, %v5766_v44  ;;  %v3278_v58 = vadd.f32 %v3276_v48, %v3271_v3 }
 0xc64   :  { %9309 = vmatprep.mubr.msk.f32.mxu0 %vm9918_vm0, %v12108_v20  ;;  %9326 = vmatprep.mubr.msk.f32.mxu1 %vm9918_vm0, %v12108_v20 }
 0xc65   :  { %v5631_v17 = vsel %vm217_vm1, %v3278_v58, 0 }
 0xc67   :  { %9310 = vmatmul.mubr.f32.vlgmr.msra.gmra.mxu0 %v5154_v1  ;;  %9327 = vmatmul.mubr.f32.gmra.mxu1 %v5175_v13  ;;  %v5703_v1 = vsub.f32 %v5628_v5, %v11429_v26 }
 0xc68   :  { %9330 = vmatpush3.msra.mxu0 %v5216_v0  ;;  %9312 = vmatprep.mubr.msk.f32.mxu0 %vm9918_vm0, %v12108_v20  ;;  %v3279_v0 = vadd.f32 %v3276_v48, %v3272_v4 }
 0xc69   :  { %9342 = vmatprep.mubr.msk.f32.mxu1 %vm9918_vm0, %v12108_v20  ;;  %9351 = vmatprep.subr.mxu0 %v12108_v20 }
 0xc6a   :  { %v5634_v57 = vsel %vm217_vm1, %v3279_v0, 0 }
 0xc6b   :  { %9313 = vmatmul.mubr.f32.gmra.mxu0 %v5164_v63  ;;  %9343 = vmatmul.mubr.f32.vlgmr.msra.gmra.mxu1 %v11356_v19  ;;  %v11439_v63 = vand.u32 4294901760, %v5631_v17  ;;  %v5722_v15 = vand.u32 4294901760, %v5634_v57 }
 0xc6c   :  { %9315 = vmatprep.mubr.msk.f32.mxu0 %vm9918_vm0, %v12108_v20  ;;  %9345 = vmatprep.mubr.msk.f32.mxu1 %vm9918_vm0, %v12108_v20 }
 0xc6d   :  { %9363 = vmatpush3.msra.mxu1 %v5767_v14  ;;  %v5713_v46 = vsub.f32 %v5631_v17, %v11439_v63  ;;  %v5723_v13 = vsub.f32 %v5634_v57, %v5722_v15 }
 0xc6e   :  { %9384 = vmatprep.subr.mxu1 %v12108_v20 }
 0xc6f   :  { %9316 = vmatmul.mubr.f32.gmra.mxu0 %v5174_v39  ;;  %9346 = vmatmul.mubr.f32.gmra.mxu1 %v11368_v50  ;;  %v5704_v39 = vand.u32 4294901760, %v5703_v1  ;;  %v5714_v41 = vand.u32 4294901760, %v5713_v46  ;;  %v5724_v60 = vand.u32 4294901760, %v5723_v13 }
 0xc70   :  { %9331 = vmatprep.mubr.msk.f32.mxu0 %vm9918_vm0, %v12108_v20  ;;  %9348 = vmatprep.mubr.msk.f32.mxu1 %vm9918_vm0, %v12108_v20 }
 0xc71   :  { %v5715_v52 = vsub.f32 %v5713_v46, %v5714_v41  ;;  %v5725_v35 = vsub.f32 %v5723_v13, %v5724_v60 }
 0xc73   :  { %9332 = vmatmul.mubr.f32.vlgmr.msra.gmra.mxu0 %v11356_v19  ;;  %9349 = vmatmul.mubr.f32.gmra.mxu1 %v11379_v47  ;;  %v5705_v19 = vsub.f32 %v5703_v1, %v5704_v39  ;;  %v5726_v6 = vand.u32 4294901760, %v5725_v35 }
 0xc74   :  { %9334 = vmatprep.mubr.msk.f32.mxu0 %vm9918_vm0, %v12108_v20  ;;  %9364 = vmatprep.mubr.msk.f32.mxu1 %vm9918_vm0, %v12108_v20 }
 0xc75   :  { %9352 = vmatpush3.msra.mxu0 %v11381_v8 }
 0xc76   :  { %9373 = vmatprep.subr.mxu0 %v12108_v20 }
 0xc77   :  { %9335 = vmatmul.mubr.f32.gmra.mxu0 %v11368_v50  ;;  %9365 = vmatmul.mubr.f32.vlgmr.msra.gmra.mxu1 %v11429_v26  ;;  %v5706_v50 = vand.u32 4294901760, %v5705_v19 }
 0xc78   :  { %9337 = vmatprep.mubr.msk.f32.mxu0 %vm9918_vm0, %v12108_v20  ;;  %9367 = vmatprep.mubr.msk.f32.mxu1 %vm9918_vm0, %v12108_v20 }
 0xc79   :  { %9385 = vmatpush3.msra.mxu1 %v11381_v8 }
 0xc7a   :  { %9406 = vmatprep.subr.mxu1 %v12108_v20 }
 0xc7b   :  { %9338 = vmatmul.mubr.f32.gmra.mxu0 %v11379_v47  ;;  %9368 = vmatmul.mubr.f32.gmra.mxu1 %v11439_v63  ;;  %v5716_v47 = vand.u32 4294901760, %v5715_v52 }
 0xc7c   :  { %9353 = vmatprep.mubr.msk.f32.mxu0 %vm9918_vm0, %v12108_v20  ;;  %9370 = vmatprep.mubr.msk.f32.mxu1 %vm9918_vm0, %v12108_v20 }
 0xc7f   :  { %9354 = vmatmul.mubr.f32.vlgmr.msra.gmra.mxu0 %v5706_v50  ;;  %9371 = vmatmul.mubr.f32.gmra.mxu1 %v5722_v15 }
 0xc80   :  { %9356 = vmatprep.mubr.msk.f32.mxu0 %vm9918_vm0, %v12108_v20  ;;  %9386 = vmatprep.mubr.msk.f32.mxu1 %vm9918_vm0, %v12108_v20 }
 0xc81   :  { %9374 = vmatpush3.msra.mxu0 %v11395_v30 }
 0xc82   :  { %9395 = vmatprep.subr.mxu0 %v12108_v20 }
 0xc83   :  { %9357 = vmatmul.mubr.f32.gmra.mxu0 %v5716_v47  ;;  %9387 = vmatmul.mubr.f32.vlgmr.msra.gmra.mxu1 %v5704_v39 }
 0xc84   :  { %9359 = vmatprep.mubr.msk.f32.mxu0 %vm9918_vm0, %v12108_v20  ;;  %9389 = vmatprep.mubr.msk.f32.mxu1 %vm9918_vm0, %v12108_v20 }
 0xc85   :  { %9407 = vmatpush3.msra.mxu1 %v11381_v8 }
 0xc86   :  { %9428 = vmatprep.subr.mxu1 %v12108_v20 }
 0xc87   :  { %9360 = vmatmul.mubr.f32.gmra.mxu0 %v5726_v6  ;;  %9390 = vmatmul.mubr.f32.gmra.mxu1 %v5714_v41 }
 0xc88   :  { %9375 = vmatprep.mubr.msk.f32.mxu0 %vm9918_vm0, %v12108_v20  ;;  %9392 = vmatprep.mubr.msk.f32.mxu1 %vm9918_vm0, %v12108_v20 }
 0xc8b   :  { %9376 = vmatmul.mubr.f32.vlgmr.msra.gmra.mxu0 %v5703_v1  ;;  %9393 = vmatmul.mubr.f32.gmra.mxu1 %v5724_v60 }
 0xc8c   :  { %9396 = vmatpush3.msra.mxu0 %v5765_v61  ;;  %9378 = vmatprep.mubr.msk.f32.mxu0 %vm9918_vm0, %v12108_v20 }
 0xc8d   :  { %9408 = vmatprep.mubr.msk.f32.mxu1 %vm9918_vm0, %v12108_v20  ;;  %9417 = vmatprep.subr.mxu0 %v12108_v20 }
 0xc8f   :  { %9379 = vmatmul.mubr.f32.gmra.mxu0 %v5713_v46  ;;  %9409 = vmatmul.mubr.f32.vlgmr.msra.gmra.mxu1 %v11429_v26 }
 0xc90   :  { %9381 = vmatprep.mubr.msk.f32.mxu0 %vm9918_vm0, %v12108_v20  ;;  %9411 = vmatprep.mubr.msk.f32.mxu1 %vm9918_vm0, %v12108_v20 }
 0xc93   :  { %9382 = vmatmul.mubr.f32.gmra.mxu0 %v5723_v13  ;;  %9412 = vmatmul.mubr.f32.gmra.mxu1 %v11439_v63 }
 0xc94   :  { %9397 = vmatprep.mubr.msk.f32.mxu0 %vm9918_vm0, %v12108_v20  ;;  %9414 = vmatprep.mubr.msk.f32.mxu1 %vm9918_vm0, %v12108_v20 }
 0xc97   :  { %9398 = vmatmul.mubr.f32.vlgmr.msra.gmra.mxu0 %v11429_v26  ;;  %9415 = vmatmul.mubr.f32.gmra.mxu1 %v5722_v15 }
 0xc98   :  { %9400 = vmatprep.mubr.msk.f32.mxu0 %vm9918_vm0, %v12108_v20  ;;  %9430 = vmatprep.mubr.msk.f32.mxu1 %vm9918_vm0, %v12108_v20 }
 0xc9b   :  { %9401 = vmatmul.mubr.f32.gmra.mxu0 %v11439_v63 }
 0xc9c   :  { %9403 = vmatprep.mubr.msk.f32.mxu0 %vm9918_vm0, %v12108_v20 }
 0xc9f   :  { %9404 = vmatmul.mubr.f32.gmra.mxu0 %v5722_v15 }
 0xca0   :  { %9419 = vmatprep.mubr.msk.f32.mxu0 %vm9918_vm0, %v12108_v20 }
 0xd13   :  { %v5255_v8 = vpop.f32.mrf.mxu1 }
 0xd15   :  { %v9300_v30 = vpop.f32.mrf.mxu1 }
 0xd17   :  { %v5261_v61 = vpop.f32.mrf.mxu1 }
 0xd19   :  { %v9303_v48 = vpop.f32.mrf.mxu1 }
 0xd1b   :  { %v5159_v36 = vpop.f32.mrf.mxu0  ;;  %v11508_v55 = vpop.f32.mrf.mxu1 }
 0xd1c   :  { %v5160_v1 = vadd.f32 %v11342_v21, %v5159_v36 }
 0xd1d   :  { %v9289_v38 = vpop.f32.mrf.mxu0  ;;  %v9306_v44 = vpop.f32.mrf.mxu1 }
 0xd1e   :  { %v5256_v15 = vadd.f32 %v5255_v8, %v5160_v1 }
 0xd1f   :  { %v5169_v11 = vpop.f32.mrf.mxu0  ;;  %v5429_v3 = vpop.f32.mrf.mxu1 }
 0xd20   :  { %v5170_v48 = vadd.f32 %v11342_v21, %v5169_v11 }
 0xd21   :  { %v9292_v12 = vpop.f32.mrf.mxu0  ;;  %v9322_v14 = vpop.f32.mrf.mxu1 }
 0xd22   :  { %v5262_v8 = vadd.f32 %v5261_v61, %v5170_v48 }
 0xd23   :  { %v5179_v5 = vpop.f32.mrf.mxu0  ;;  %v5437_v58 = vpop.f32.mrf.mxu1 }
 0xd25   :  { %v9295_v4 = vpop.f32.mrf.mxu0  ;;  %v9325_v26 = vpop.f32.mrf.mxu1 }
 0xd27   :  { %v5341_v17 = vpop.f32.mrf.mxu0  ;;  %v11510_v0 = vpop.f32.mrf.mxu1 }
 0xd28   :  { %v5342_v41 = vadd.f32 %v5341_v17, %v5256_v15 }
 0xd29   :  { %v9311_v63 = vpop.f32.mrf.mxu0  ;;  %v9328_v57 = vpop.f32.mrf.mxu1 }
 0xd2a   :  { %v5430_v35 = vadd.f32 %v5429_v3, %v5342_v41 }
 0xd2b   :  { %v5348_v46 = vpop.f32.mrf.mxu0  ;;  %v5603_v39 = vpop.f32.mrf.mxu1 }
 0xd2c   :  { %v5349_v3 = vadd.f32 %v5348_v46, %v5262_v8  ;;  %v5180_v46 = vadd.f32 %v11342_v21, %v5179_v5 }
 0xd2d   :  { %v9314_v19 = vpop.f32.mrf.mxu0  ;;  %v9344_v13 = vpop.f32.mrf.mxu1 }
 0xd2e   :  { %v5438_v41 = vadd.f32 %v5437_v58, %v5349_v3 }
 0xd2f   :  { %v5355_v50 = vpop.f32.mrf.mxu0  ;;  %v5609_v52 = vpop.f32.mrf.mxu1 }
 0xd31   :  { %v9317_v60 = vpop.f32.mrf.mxu0  ;;  %v9347_v47 = vpop.f32.mrf.mxu1 }
 0xd33   :  { %v5519_v6 = vpop.f32.mrf.mxu0  ;;  %v11513_v30 = vpop.f32.mrf.mxu1 }
 0xd34   :  { %v5520_v38 = vadd.f32 %v5519_v6, %v5430_v35 }
 0xd35   :  { %v9333_v36 = vpop.f32.mrf.mxu0  ;;  %v9350_v44 = vpop.f32.mrf.mxu1 }
 0xd36   :  { %v5604_v12 = vadd.f32 %v5603_v39, %v5520_v38  ;;  %v5268_v44 = vadd.f32 %v11508_v55, %v5180_v46 }
 0xd37   :  { %v5525_v14 = vpop.f32.mrf.mxu0  ;;  %v11516_v4 = vpop.f32.mrf.mxu1 }
 0xd38   :  { %v6217_v26 = vrot.slane %v5604_v12, %v10042_v22  ;;  %v6203_v17 = vrot.slane %v5604_v12, %v10034_v10  ;;  %v6231_v11 = vrot.slane %v5604_v12, %v10050_v31  ;;  %v6210_v39 = vrot.slane %v5604_v12, %v10037_v18 }
 0xd39   :  { %v9336_v1 = vpop.f32.mrf.mxu0  ;;  %v9366_v63 = vpop.f32.mrf.mxu1  ;;  %v5526_v47 = vadd.f32 %v5525_v14, %v5438_v41  ;;  %v6245_v35 = vrot.slane %v5604_v12, %v10058_v37  ;;  %v6224_v6 = vrot.slane %v5604_v12, %v10046_v27  ;;  %v6238_v21 = vrot.slane %v5604_v12, %v10054_v34 }
 0xd3a   :  { %6219 = vbcast.lane.b32.xlu0 %v6217_v26, 256  ;;  %6205 = vbcast.lane.b32.xlu1 %v6203_v17, 256  ;;  %v6252_v26 = vrot.slane %v5604_v12, %v10063_v42  ;;  %v5356_v17 = vadd.f32 %v5355_v50, %v5268_v44 }
 0xd3b   :  { %v5531_v57 = vpop.f32.mrf.mxu0  ;;  %v11520_v15 = vpop.f32.mrf.mxu1  ;;  %v5610_v8 = vadd.f32 %v5609_v52, %v5526_v47 }
 0xd3c   :  { %v5446_v55 = vadd.f32 %v11510_v0, %v5356_v17 }
 0xd3d   :  { %v9339_v19 = vpop.f32.mrf.mxu0  ;;  %v9369_v13 = vpop.f32.mrf.mxu1  ;;  %v6266_v3 = vrot.slane %v5610_v8, %v10037_v18  ;;  %v6273_v41 = vrot.slane %v5610_v8, %v10042_v22  ;;  %v6287_v50 = vrot.slane %v5610_v8, %v10050_v31  ;;  %v6301_v0 = vrot.slane %v5610_v8, %v10058_v37 }
 0xd3e   :  { %6233 = vbcast.lane.b32.xlu0 %v6231_v11, 256  ;;  %6212 = vbcast.lane.b32.xlu1 %v6210_v39, 256  ;;  %v6259_v11 = vrot.slane %v5610_v8, %v10034_v10  ;;  %v5532_v12 = vadd.f32 %v5531_v57, %v5446_v55  ;;  %v6294_v31 = vrot.slane %v5610_v8, %v10054_v34 }
 0xd3f   :  { %v11524_v61 = vpop.f32.mrf.mxu0  ;;  %v11526_v60 = vpop.f32.mrf.mxu1 }
 0xd41   :  { %v9355_v48 = vpop.f32.mrf.mxu0  ;;  %v9372_v38 = vpop.f32.mrf.mxu1 }
 0xd42   :  { %6247 = vbcast.lane.b32.xlu0 %v6245_v35, 256  ;;  %6226 = vbcast.lane.b32.xlu1 %v6224_v6, 256  ;;  %v5616_v48 = vadd.f32 %v11513_v30, %v5532_v12  ;;  %v6280_v38 = vrot.slane %v5610_v8, %v10046_v27 }
 0xd43   :  { %v11531_v36 = vpop.f32.mrf.mxu0  ;;  %v11533_v58 = vpop.f32.mrf.mxu1 }
 0xd44   :  { %v6329_v37 = vrot.slane %v5616_v48, %v10042_v22  ;;  %v6322_v12 = vrot.slane %v5616_v48, %v10037_v18 }
 0xd45   :  { %v9358_v5 = vpop.f32.mrf.mxu0  ;;  %v9388_v14 = vpop.f32.mrf.mxu1 }
 0xd46   :  { %6254 = vbcast.lane.b32.xlu0 %v6252_v26, 256  ;;  %6240 = vbcast.lane.b32.xlu1 %v6238_v21, 256  ;;  %v6315_v5 = vrot.slane %v5616_v48, %v10034_v10 }
 0xd47   :  { %v5728_v1 = vpop.f32.mrf.mxu0  ;;  %v5986_v63 = vpop.f32.mrf.mxu1 }
 0xd49   :  { %v9361_v39 = vpop.f32.mrf.mxu0  ;;  %v9391_v19 = vpop.f32.mrf.mxu1 }
 0xd4a   :  { %6268 = vbcast.lane.b32.xlu1 %v6266_v3, 256  ;;  %6261 = vbcast.lane.b32.xlu0 %v6259_v11, 256  ;;  %v6308_v11 = vrot.slane %v5610_v8, %v10063_v42 }
 0xd4b   :  { %v5890_v52 = vpop.f32.mrf.mxu0  ;;  %v5994_v13 = vpop.f32.mrf.mxu1 }
 0xd4d   :  { %v9377_v46 = vpop.f32.mrf.mxu0  ;;  %v9394_v47 = vpop.f32.mrf.mxu1 }
 0xd4e   :  { %6275 = vbcast.lane.b32.xlu1 %v6273_v41, 256  ;;  %6289 = vbcast.lane.b32.xlu0 %v6287_v50, 256  ;;  %v6336_v50 = vrot.slane %v5616_v48, %v10046_v27  ;;  %v5625_v47 = vpop.permute.xlu0 %5624 }
 0xd4f   :  { %v5897_v35 = vpop.f32.mrf.mxu0  ;;  %v6152_v6 = vpop.f32.mrf.mxu1  ;;  %v5719_v42 = vadd.f32 %v11531_v36, %v5625_v47 }
 0xd51   :  { %v9380_v44 = vpop.f32.mrf.mxu0  ;;  %v9410_v26 = vpop.f32.mrf.mxu1 }
 0xd52   :  { %6282 = vbcast.lane.b32.xlu1 %v6280_v38, 256  ;;  %6303 = vbcast.lane.b32.xlu0 %v6301_v0, 256  ;;  %v5709_v38 = vadd.f32 %v11524_v61, %v5625_v47  ;;  %v5729_v0 = vadd.f32 %v5728_v1, %v5625_v47  ;;  %v5811_v44 = vadd.f32 %v11520_v15, %v5719_v42 }
 0xd53   :  { %v5904_v57 = vpop.f32.mrf.mxu0  ;;  %v6158_v21 = vpop.f32.mrf.mxu1 }
 0xd54   :  { %v5805_v22 = vadd.f32 %v11516_v4, %v5709_v38  ;;  %v5898_v26 = vadd.f32 %v5897_v35, %v5811_v44 }
 0xd55   :  { %v9383_v14 = vpop.f32.mrf.mxu0  ;;  %v9413_v17 = vpop.f32.mrf.mxu1 }
 0xd56   :  { %6296 = vbcast.lane.b32.xlu1 %v6294_v31, 256  ;;  %6317 = vbcast.lane.b32.xlu0 %v6315_v5, 256  ;;  %v5891_v8 = vadd.f32 %v5890_v52, %v5805_v22  ;;  %v5817_v5 = vadd.f32 %v11526_v60, %v5729_v0  ;;  %v5987_v48 = vadd.f32 %v5986_v63, %v5898_v26 }
 0xd57   :  { %v6068_v3 = vpop.f32.mrf.mxu0  ;;  %v6164_v30 = vpop.f32.mrf.mxu1 }
 0xd58   :  { %v5979_v31 = vadd.f32 %v11533_v58, %v5891_v8  ;;  %v5905_v27 = vadd.f32 %v5904_v57, %v5817_v5 }
 0xd59   :  { %v9399_v39 = vpop.f32.mrf.mxu0  ;;  %v9416_v19 = vpop.f32.mrf.mxu1 }
 0xd5a   :  { %6310 = vbcast.lane.b32.xlu1 %v6308_v11, 256  ;;  %6331 = vbcast.lane.b32.xlu0 %v6329_v37, 256  ;;  %v6069_v14 = vadd.f32 %v6068_v3, %v5979_v31  ;;  %v5995_v37 = vadd.f32 %v5994_v13, %v5905_v27 }
 0xd5b   :  { %v6074_v55 = vpop.f32.mrf.mxu0 }
 0xd5c   :  { %v6153_v17 = vadd.f32 %v6152_v6, %v6069_v14  ;;  %v6075_v11 = vadd.f32 %v6074_v55, %v5987_v48 }
 0xd5d   :  { %v9402_v34 = vpop.f32.mrf.mxu0 }
 0xd5e   :  { %6324 = vbcast.lane.b32.xlu1 %v6322_v12, 256  ;;  %v6159_v61 = vadd.f32 %v6158_v21, %v6075_v11 }
 0xd5f   :  { %v6080_v41 = vpop.f32.mrf.mxu0 }
 0xd60   :  { %v6081_v36 = vadd.f32 %v6080_v41, %v5995_v37 }
 0xd61   :  { %v9405_v46 = vpop.f32.mrf.mxu0 }
 0xd62   :  { %6338 = vbcast.lane.b32.xlu1 %v6336_v50, 256  ;;  %v6165_v4 = vadd.f32 %v6164_v30, %v6081_v36 }
 0xd78   :  { %6168 = vxpose.xlu0.b32.start [1/3] (short) (narrow) %v6153_v17, 16 }
 0xd7c   :  { %6169 = vxpose.xlu0.b32.cont [2/3] (short) (narrow) %v6159_v61, 16 }
 0xd80   :  { %6170 = vxpose.xlu0.b32.end [3/3] (short) (narrow) %v6165_v4, 16 }
 0xdac   :  { %v6220_v1 = vpop.permute.xlu0 %6219  ;;  %v6206_v57 = vpop.permute.xlu1 %6205 }
 0xdb0   :  { %v6234_v52 = vpop.permute.xlu0 %6233  ;;  %v6213_v6 = vpop.permute.xlu1 %6212 }
 0xdb4   :  { %v6248_v15 = vpop.permute.xlu0 %6247  ;;  %v6227_v12 = vpop.permute.xlu1 %6226 }
 0xdb8   :  { %v6255_v35 = vpop.permute.xlu0 %6254 }
 0xdbc   :  { %v6262_v39 = vpop.permute.xlu0 %6261 }
 0xdc0   :  { %v11558_v58 = vpop.permute.xlu0 %6289 }
 0xdc4   :  { %v6304_v60 = vpop.permute.xlu0 %6303 }
 0xdc8   :  { %v6318_v3 = vpop.permute.xlu0 %6317 }
 0xdcc   :  { %v6332_v63 = vpop.permute.xlu0 %6331 }
 0xdf4   :  { %v11560_v19 = vpop.trf.xlu0 }
 0xdf5   :  { %v6342_v13 = vmul.f32 %v6220_v1, %v11560_v19  ;;  %v6340_v21 = vmul.f32 %v6206_v57, %v11560_v19  ;;  %v6354_v30 = vmul.f32 %v6304_v60, %v11560_v19  ;;  %v6341_v55 = vmul.f32 %v6213_v6, %v11560_v19 }
 0xdf6   :  { %v6356_v50 = vmul.f32 %v6318_v3, %v11560_v19  ;;  %v6343_v46 = vmul.f32 %v6227_v12, %v11560_v19  ;;  %v6346_v48 = vmul.f32 %v6248_v15, %v11560_v19  ;;  %v6347_v37 = vmul.f32 %v6255_v35, %v11560_v19 }
 0xdf7   :  { %v11567_v34 = vadd.f32 %v6342_v13, %v10149_v7  ;;  %v11570_v41 = vadd.f32 %v6340_v21, %v10122_v51  ;;  %v11579_v42 = vadd.f32 %v6354_v30, %v10283_v9  ;;  %v11582_v22 = vadd.f32 %v6341_v55, %v10131_v54  ;;  %v6241_v54 = vpop.permute.xlu1 %6240 }
 0xdf8   :  { %v6358_v51 = vmul.f32 %v6332_v63, %v11560_v19  ;;  %v6344_v7 = vmul.f32 %v6234_v52, %v11560_v19  ;;  %v11591_v44 = vadd.f32 %v6356_v50, %v10128_v53  ;;  %v11594_v9 = vadd.f32 %v6343_v46, %v10164_v29  ;;  %v12120_v46 = vld [vmem:[#allocation2_spill] sm:$0xff] }
 0xdf9   :  { %v6386_v47 = vsel %vm1083_vm4, %v11567_v34, -inf  ;;  %v6380_v38 = vsel %vm1083_vm4, %v11570_v41, -inf  ;;  %v6422_v8 = vsel %vm1083_vm4, %v11579_v42, -inf  ;;  %v6383_v0 = vsel %vm1083_vm4, %v11582_v22, -inf }
 0xdfa   :  { %6387 = vmax.xlane.f32.xlu0 %v6386_v47  ;;  %6381 = vmax.xlane.f32.xlu1 %v6380_v38  ;;  %v11597_v26 = vadd.f32 %v6358_v51, %v10145_v23  ;;  %v6428_v31 = vsel %vm1083_vm4, %v11591_v44, -inf  ;;  %v6389_v5 = vsel %vm1083_vm4, %v11594_v9, -inf  ;;  %v11604_v14 = vadd.f32 %v6344_v7, %v10179_v40  ;;  %v12121_v7 = vld [vmem:[#allocation3_spill] sm:$0xff] }
 0xdfb   :  { %v6345_v53 = vmul.f32 %v6241_v54, %v11560_v19  ;;  %v6269_v17 = vpop.permute.xlu1 %6268  ;;  %v11618_v11 = vadd.f32 %v6346_v48, %v10219_v24  ;;  %v6348_v36 = vmul.f32 %v6262_v39, %v11560_v19  ;;  %v12122_v54 = vld [vmem:[#allocation4_spill] sm:$0xff] }
 0xdfc   :  { %v6434_v29 = vsel %vm1083_vm4, %v11597_v26, -inf  ;;  %v6392_v23 = vsel %vm1083_vm4, %v11604_v14, -inf  ;;  %v6349_v24 = vmul.f32 %v6269_v17, %v11560_v19 }
 0xdfd   :  { %v11612_v27 = vadd.f32 %v6345_v53, %v10119_v49  ;;  %v6398_v61 = vsel %vm1083_vm4, %v11618_v11, -inf  ;;  %v11624_v49 = vadd.f32 %v6347_v37, %v10233_v45  ;;  %v11630_v52 = vadd.f32 %v6348_v36, %v10199_v56  ;;  %v11683_v53 = vpop.trf.xlu0 }
 0xdfe   :  { %6423 = vmax.xlane.f32.xlu0 %v6422_v8  ;;  %6384 = vmax.xlane.f32.xlu1 %v6383_v0  ;;  %v11636_v45 = vadd.f32 %v6349_v24, %v10209_v16  ;;  %v6352_v16 = vmul.f32 %v11558_v58, %v11560_v19 }
 0xdff   :  { %v6395_v40 = vsel %vm1083_vm4, %v11612_v27, -inf  ;;  %v6276_v4 = vpop.permute.xlu1 %6275  ;;  %v6401_v1 = vsel %vm1083_vm4, %v11624_v49, -inf  ;;  %v6404_v35 = vsel %vm1083_vm4, %v11630_v52, -inf }
 0xe00   :  { %v6350_v39 = vmul.f32 %v6276_v4, %v11560_v19  ;;  %v6407_v60 = vsel %vm1083_vm4, %v11636_v45, -inf }
 0xe02   :  { %6429 = vmax.xlane.f32.xlu0 %v6428_v31  ;;  %6390 = vmax.xlane.f32.xlu1 %v6389_v5  ;;  %v11642_v3 = vadd.f32 %v6350_v39, %v10230_v43  ;;  %v11655_v43 = vadd.f32 %v6352_v16, %v10261_v2 }
 0xe03   :  { %v6283_v15 = vpop.permute.xlu1 %6282 }
 0xe04   :  { %v6351_v56 = vmul.f32 %v6283_v15, %v11560_v19  ;;  %v6410_v63 = vsel %vm1083_vm4, %v11642_v3, -inf  ;;  %v6416_v55 = vsel %vm1083_vm4, %v11655_v43, -inf }
 0xe06   :  { %6435 = vmax.xlane.f32.xlu0 %v6434_v29  ;;  %6393 = vmax.xlane.f32.xlu1 %v6392_v23  ;;  %v11648_v6 = vadd.f32 %v6351_v56, %v10250_v59 }
 0xe07   :  { %v6297_v57 = vpop.permute.xlu1 %6296 }
 0xe08   :  { %v6413_v21 = vsel %vm1083_vm4, %v11648_v6, -inf  ;;  %v6353_v30 = vmul.f32 %v6297_v57, %v11560_v19 }
 0xe0a   :  { %6396 = vmax.xlane.f32.xlu1 %v6395_v40  ;;  %v11661_v59 = vadd.f32 %v6353_v30, %v10265_v33 }
 0xe0b   :  { %v6311_v13 = vpop.permute.xlu1 %6310 }
 0xe0c   :  { %v6355_v12 = vmul.f32 %v6311_v13, %v11560_v19  ;;  %v6419_v50 = vsel %vm1083_vm4, %v11661_v59, -inf }
 0xe0e   :  { %6399 = vmax.xlane.f32.xlu1 %v6398_v61  ;;  %v11667_v47 = vadd.f32 %v6355_v12, %v12120_v46 }
 0xe0f   :  { %v6325_v58 = vpop.permute.xlu1 %6324 }
 0xe10   :  { %v6357_v2 = vmul.f32 %v6325_v58, %v11560_v19  ;;  %v6425_v51 = vsel %vm1083_vm4, %v11667_v47, -inf }
 0xe12   :  { %6402 = vmax.xlane.f32.xlu1 %v6401_v1  ;;  %v11673_v33 = vadd.f32 %v6357_v2, %v12121_v7 }
 0xe13   :  { %v6339_v38 = vpop.permute.xlu1 %6338 }
 0xe14   :  { %v6359_v8 = vmul.f32 %v6339_v38, %v11560_v19  ;;  %v6431_v0 = vsel %vm1083_vm4, %v11673_v33, -inf }
 0xe16   :  { %6405 = vmax.xlane.f32.xlu1 %v6404_v35  ;;  %v11679_v31 = vadd.f32 %v6359_v8, %v12122_v54 }
 0xe18   :  { %v6437_v5 = vsel %vm1083_vm4, %v11679_v31, -inf }
 0xe1a   :  { %6408 = vmax.xlane.f32.xlu1 %v6407_v60 }
 0xe1e   :  { %6411 = vmax.xlane.f32.xlu1 %v6410_v63 }
 0xe22   :  { %6414 = vmax.xlane.f32.xlu1 %v6413_v21 }
 0xe26   :  { %6417 = vmax.xlane.f32.xlu1 %v6416_v55 }
 0xe2a   :  { %6420 = vmax.xlane.f32.xlu1 %v6419_v50 }
 0xe2e   :  { %6426 = vmax.xlane.f32.xlu1 %v6425_v51 }
 0xe32   :  { %6432 = vmax.xlane.f32.xlu1 %v6431_v0 }
 0xe36   :  { %6438 = vmax.xlane.f32.xlu1 %v6437_v5 }
 0xe83   :  { %v6382_v29 = vpop.xlane.xlu1 %6381  ;;  %v6388_v23 = vpop.xlane.xlu0 %6387 }
 0xe84   :  { %v6440_v48 = vsub.f32 %v11570_v41, %v6382_v29  ;;  %v6442_v19 = vsub.f32 %v11567_v34, %v6388_v23 }
 0xe86   :  { %v6460_v17 = vmul.f32 1.442695, %v6440_v48  ;;  %v6464_v40 = vmul.f32 1.442695, %v6442_v19 }
 0xe87   :  { %v6385_v37 = vpop.xlane.xlu1 %6384 }
 0xe88   :  { %9810 = vpow2.f32 %v6460_v17  ;;  %v6441_v61 = vsub.f32 %v11582_v22, %v6385_v37 }
 0xe89   :  { %9812 = vpow2.f32 %v6464_v40 }
 0xe8a   :  { %v6462_v36 = vmul.f32 1.442695, %v6441_v61 }
 0xe8b   :  { %v6391_v4 = vpop.xlane.xlu1 %6390 }
 0xe8c   :  { %9814 = vpow2.f32 %v6462_v36  ;;  %v6443_v1 = vsub.f32 %v11594_v9, %v6391_v4 }
 0xe8e   :  { %v6466_v24 = vmul.f32 1.442695, %v6443_v1 }
 0xe8f   :  { %v6394_v15 = vpop.xlane.xlu1 %6393 }
 0xe90   :  { %9816 = vpow2.f32 %v6466_v24  ;;  %v6444_v35 = vsub.f32 %v11604_v14, %v6394_v15 }
 0xe92   :  { %v6468_v41 = vmul.f32 1.442695, %v6444_v35  ;;  %v6424_v35 = vpop.xlane.xlu0 %6423 }
 0xe93   :  { %v6397_v39 = vpop.xlane.xlu1 %6396 }
 0xe94   :  { %9818 = vpow2.f32 %v6468_v41  ;;  %v6445_v34 = vsub.f32 %v11612_v27, %v6397_v39 }
 0xe95   :  { %v9811_v60 = vpop.eup %9810 }
 0xe96   :  { %v6470_v56 = vmul.f32 1.442695, %v6445_v34  ;;  %v6500_v22 = vsel %vm1083_vm4, %v9811_v60, 0.0  ;;  %v9813_v57 = vpop.eup %9812  ;;  %v6580_v61 = vmul.f32 %v9811_v60, %v11683_v53 }
 0xe97   :  { %6501 = vadd.xlane.f32.xlu0 %v6500_v22  ;;  %v6400_v63 = vpop.xlane.xlu1 %6399  ;;  %v6506_v14 = vsel %vm1083_vm4, %v9813_v57, 0.0  ;;  %v6582_v15 = vmul.f32 %v9813_v57, %v11683_v53  ;;  %v6454_v22 = vsub.f32 %v11579_v42, %v6424_v35 }
 0xe98   :  { %9820 = vpow2.f32 %v6470_v56  ;;  %v6446_v9 = vsub.f32 %v11618_v11, %v6400_v63  ;;  %v6600_v39 = vsel %vm1083_vm4, %v6580_v61, 0.0 }
 0xe99   :  { %v9815_v16 = vpop.eup %9814  ;;  %v6606_v63 = vsel %vm1083_vm4, %v6582_v15, 0.0 }
 0xe9a   :  { %v6472_v13 = vmul.f32 1.442695, %v6446_v9  ;;  %v6503_v21 = vsel %vm1083_vm4, %v9815_v16, 0.0 }
 0xe9b   :  { %6504 = vadd.xlane.f32.xlu1 %v6503_v21  ;;  %v6403_v30 = vpop.xlane.xlu1 %6402  ;;  %6507 = vadd.xlane.f32.xlu0 %v6506_v14  ;;  %v6430_v21 = vpop.xlane.xlu0 %6429 }
 0xe9c   :  { %9822 = vpow2.f32 %v6472_v13  ;;  %v6447_v27 = vsub.f32 %v11624_v49, %v6403_v30  ;;  %v6581_v49 = vmul.f32 %v9815_v16, %v11683_v53  ;;  %v6488_v30 = vmul.f32 1.442695, %v6454_v22 }
 0xe9d   :  { %v9817_v55 = vpop.eup %9816 }
 0xe9e   :  { %v6474_v12 = vmul.f32 1.442695, %v6447_v27  ;;  %v6509_v58 = vsel %vm1083_vm4, %v9817_v55, 0.0  ;;  %v6603_v23 = vsel %vm1083_vm4, %v6581_v49, 0.0  ;;  %v6583_v19 = vmul.f32 %v9817_v55, %v11683_v53 }
 0xe9f   :  { %6510 = vadd.xlane.f32.xlu1 %v6509_v58  ;;  %v6406_v50 = vpop.xlane.xlu1 %6405 }
 0xea0   :  { %9824 = vpow2.f32 %v6474_v12  ;;  %v6448_v37 = vsub.f32 %v11630_v52, %v6406_v50  ;;  %v6609_v36 = vsel %vm1083_vm4, %v6583_v19, 0.0  ;;  %v6456_v50 = vsub.f32 %v11591_v44, %v6430_v21 }
 0xea1   :  { %v9819_v11 = vpop.eup %9818 }
 0xea2   :  { %v6512_v46 = vsel %vm1083_vm4, %v9819_v11, 0.0  ;;  %v6584_v57 = vmul.f32 %v9819_v11, %v11683_v53 }
 0xea3   :  { %v6409_v2 = vpop.xlane.xlu1 %6408  ;;  %6513 = vadd.xlane.f32.xlu0 %v6512_v46  ;;  %v6436_v46 = vpop.xlane.xlu0 %6435 }
 0xea4   :  { %v6449_v38 = vsub.f32 %v11636_v45, %v6409_v2  ;;  %v6612_v42 = vsel %vm1083_vm4, %v6584_v57, 0.0 }
 0xea5   :  { %v9821_v51 = vpop.eup %9820 }
 0xea6   :  { %v6478_v7 = vmul.f32 1.442695, %v6449_v38  ;;  %v6515_v8 = vsel %vm1083_vm4, %v9821_v51, 0.0  ;;  %v6585_v1 = vmul.f32 %v9821_v51, %v11683_v53  ;;  %v6492_v51 = vmul.f32 1.442695, %v6456_v50 }
 0xea7   :  { %6516 = vadd.xlane.f32.xlu1 %v6515_v8  ;;  %v6412_v0 = vpop.xlane.xlu1 %6411 }
 0xea8   :  { %9826 = vpow2.f32 %v6478_v7  ;;  %v6450_v54 = vsub.f32 %v11642_v3, %v6412_v0  ;;  %v6615_v52 = vsel %vm1083_vm4, %v6585_v1, 0.0  ;;  %v6458_v7 = vsub.f32 %v11597_v26, %v6436_v46 }
 0xea9   :  { %v9823_v5 = vpop.eup %9822 }
 0xeaa   :  { %v6480_v29 = vmul.f32 1.442695, %v6450_v54  ;;  %v6518_v48 = vsel %vm1083_vm4, %v9823_v5, 0.0  ;;  %v6586_v12 = vmul.f32 %v9823_v5, %v11683_v53  ;;  %v6496_v5 = vmul.f32 1.442695, %v6458_v7 }
 0xeab   :  { %v6415_v45 = vpop.xlane.xlu1 %6414  ;;  %6604 = vadd.xlane.f32.xlu1 %v6603_v23  ;;  %6519 = vadd.xlane.f32.xlu0 %v6518_v48 }
 0xeac   :  { %9828 = vpow2.f32 %v6480_v29  ;;  %v6451_v17 = vsub.f32 %v11648_v6, %v6415_v45  ;;  %v6476_v6 = vmul.f32 1.442695, %v6448_v37  ;;  %v6618_v2 = vsel %vm1083_vm4, %v6586_v12, 0.0 }
 0xead   :  { %v9825_v40 = vpop.eup %9824 }
 0xeae   :  { %v6482_v3 = vmul.f32 1.442695, %v6451_v17  ;;  %v6521_v4 = vsel %vm1083_vm4, %v9825_v40, 0.0  ;;  %v6587_v38 = vmul.f32 %v9825_v40, %v11683_v53 }
 0xeaf   :  { %v6418_v24 = vpop.xlane.xlu1 %6417  ;;  %6610 = vadd.xlane.f32.xlu1 %v6609_v36  ;;  %6522 = vadd.xlane.f32.xlu0 %v6521_v4 }
 0xeb0   :  { %9830 = vpow2.f32 %v6482_v3  ;;  %v6452_v41 = vsub.f32 %v11655_v43, %v6418_v24  ;;  %v6621_v49 = vsel %vm1083_vm4, %v6587_v38, 0.0 }
 0xeb1   :  { %9832 = vpow2.f32 %v6476_v6  ;;  %v6680_v6 = vld [vmem:[%s12088_s2 + $0xa8] sm:$0xff] }
 0xeb2   :  { %v6484_v9 = vmul.f32 1.442695, %v6452_v41 }
 0xeb3   :  { %v6421_v34 = vpop.xlane.xlu1 %6420  ;;  %6616 = vadd.xlane.f32.xlu1 %v6615_v52  ;;  %6601 = vadd.xlane.f32.xlu0 %v6600_v39 }
 0xeb4   :  { %v6453_v60 = vsub.f32 %v11661_v59, %v6421_v34  ;;  %v11749_v34 = vand.u32 4294901760, %v6680_v6 }
 0xeb5   :  { %v9827_v56 = vpop.eup %9826 }
 0xeb6   :  { %v6486_v16 = vmul.f32 1.442695, %v6453_v60  ;;  %v6527_v43 = vsel %vm1083_vm4, %v9827_v56, 0.0  ;;  %9418 = vmatpush3.msra.mxu0 %v11749_v34 }
 0xeb7   :  { %v6427_v13 = vpop.xlane.xlu1 %6426  ;;  %6528 = vadd.xlane.f32.xlu1 %v6527_v43  ;;  %6607 = vadd.xlane.f32.xlu0 %v6606_v63 }
 0xeb8   :  { %9834 = vpow2.f32 %v6486_v16  ;;  %v6455_v14 = vsub.f32 %v11667_v47, %v6427_v13  ;;  %9439 = vmatprep.subr.mxu0 %v12108_v20 }
 0xeb9   :  { %v9829_v59 = vpop.eup %9828  ;;  %9836 = vpow2.f32 %v6484_v9 }
 0xeba   :  { %v6490_v27 = vmul.f32 1.442695, %v6455_v14  ;;  %v6530_v55 = vsel %vm1083_vm4, %v9829_v59, 0.0  ;;  %v6590_v36 = vmul.f32 %v9829_v59, %v11683_v53 }
 0xebb   :  { %6531 = vadd.xlane.f32.xlu1 %v6530_v55  ;;  %6613 = vadd.xlane.f32.xlu0 %v6612_v42  ;;  %v6433_v11 = vpop.xlane.xlu1 %6432 }
 0xebc   :  { %9838 = vpow2.f32 %v6490_v27  ;;  %v6457_v8 = vsub.f32 %v11673_v33, %v6433_v11  ;;  %v6589_v33 = vmul.f32 %v9827_v56, %v11683_v53  ;;  %v6630_v24 = vsel %vm1083_vm4, %v6590_v36, 0.0 }
 0xebd   :  { %v9831_v58 = vpop.eup %9830  ;;  %9840 = vpow2.f32 %v6488_v30  ;;  %v11752_v56 = vsub.f32 %v6680_v6, %v11749_v34 }
 0xebe   :  { %v6533_v47 = vsel %vm1083_vm4, %v9831_v58, 0.0  ;;  %v9833_v0 = vpop.eup %9832  ;;  %9842 = vpow2.f32 %v6492_v51  ;;  %v6494_v29 = vmul.f32 1.442695, %v6457_v8  ;;  %v6627_v3 = vsel %vm1083_vm4, %v6589_v33, 0.0 }
 0xebf   :  { %6534 = vadd.xlane.f32.xlu1 %v6533_v47  ;;  %6619 = vadd.xlane.f32.xlu0 %v6618_v2  ;;  %v6439_v54 = vpop.xlane.xlu1 %6438  ;;  %v6524_v19 = vsel %vm1083_vm4, %v9833_v0, 0.0  ;;  %9844 = vpow2.f32 %v6496_v5  ;;  %v6588_v4 = vmul.f32 %v9833_v0, %v11683_v53  ;;  %v6591_v35 = vmul.f32 %v9831_v58, %v11683_v53 }
 0xec0   :  { %v6459_v23 = vsub.f32 %v11679_v31, %v6439_v54  ;;  %9846 = vpow2.f32 %v6494_v29  ;;  %v6938_v9 = vand.u32 4294901760, %v11752_v56 }
 0xec1   :  { %v6624_v15 = vsel %vm1083_vm4, %v6588_v4, 0.0  ;;  %v6633_v52 = vsel %vm1083_vm4, %v6591_v35, 0.0 }
 0xec2   :  { %v6498_v40 = vmul.f32 1.442695, %v6459_v23  ;;  %v6939_v43 = vsub.f32 %v11752_v56, %v6938_v9 }
 0xec3   :  { %6622 = vadd.xlane.f32.xlu0 %v6621_v49 }
 0xec4   :  { %9848 = vpow2.f32 %v6498_v40  ;;  %v6940_v30 = vand.u32 4294901760, %v6939_v43 }
 0xec5   :  { %v9835_v44 = vpop.eup %9834 }
 0xec6   :  { %v6539_v48 = vsel %vm1083_vm4, %v9835_v44, 0.0  ;;  %v9837_v45 = vpop.eup %9836  ;;  %v6593_v59 = vmul.f32 %v9835_v44, %v11683_v53  ;;  %9429 = vmatpush3.msra.mxu1 %v6940_v30 }
 0xec7   :  { %6540 = vadd.xlane.f32.xlu1 %v6539_v48  ;;  %6525 = vadd.xlane.f32.xlu0 %v6524_v19  ;;  %v6536_v61 = vsel %vm1083_vm4, %v9837_v45, 0.0  ;;  %v6592_v57 = vmul.f32 %v9837_v45, %v11683_v53 }
 0xec8   :  { %9450 = vmatprep.subr.mxu1 %v12108_v20  ;;  %v6639_v42 = vsel %vm1083_vm4, %v6593_v59, 0.0 }
 0xec9   :  { %v9839_v26 = vpop.eup %9838  ;;  %v6636_v14 = vsel %vm1083_vm4, %v6592_v57, 0.0 }
 0xeca   :  { %v9841_v17 = vpop.eup %9840  ;;  %v6545_v37 = vsel %vm1083_vm4, %v9839_v26, 0.0  ;;  %v6595_v55 = vmul.f32 %v9839_v26, %v11683_v53 }
 0xecb   :  { %6546 = vadd.xlane.f32.xlu1 %v6545_v37  ;;  %6537 = vadd.xlane.f32.xlu0 %v6536_v61  ;;  %v6542_v31 = vsel %vm1083_vm4, %v9841_v17, 0.0  ;;  %v9843_v1 = vpop.eup %9842  ;;  %v6594_v13 = vmul.f32 %v9841_v17, %v11683_v53 }
 0xecc   :  { %v9845_v41 = vpop.eup %9844  ;;  %v6548_v39 = vsel %vm1083_vm4, %v9843_v1, 0.0  ;;  %v6596_v12 = vmul.f32 %v9843_v1, %v11683_v53  ;;  %v6645_v58 = vsel %vm1083_vm4, %v6595_v55, 0.0 }
 0xecd   :  { %v9847_v60 = vpop.eup %9846  ;;  %v6554_v63 = vsel %vm1083_vm4, %v9845_v41, 0.0  ;;  %v6642_v27 = vsel %vm1083_vm4, %v6594_v13, 0.0  ;;  %v6598_v46 = vmul.f32 %v9845_v41, %v11683_v53 }
 0xece   :  { %v6551_v22 = vsel %vm1083_vm4, %v9847_v60, 0.0  ;;  %v6648_v50 = vsel %vm1083_vm4, %v6596_v12, 0.0  ;;  %v6597_v11 = vmul.f32 %v9847_v60, %v11683_v53 }
 0xecf   :  { %6628 = vadd.xlane.f32.xlu1 %v6627_v3  ;;  %6543 = vadd.xlane.f32.xlu0 %v6542_v31  ;;  %v6654_v2 = vsel %vm1083_vm4, %v6598_v46, 0.0 }
 0xed0   :  { %v6651_v47 = vsel %vm1083_vm4, %v6597_v11, 0.0 }
 0xed1   :  { %v9849_v16 = vpop.eup %9848 }
 0xed2   :  { %v6557_v21 = vsel %vm1083_vm4, %v9849_v16, 0.0  ;;  %v6599_v38 = vmul.f32 %v9849_v16, %v11683_v53 }
 0xed3   :  { %6631 = vadd.xlane.f32.xlu1 %v6630_v24  ;;  %6625 = vadd.xlane.f32.xlu0 %v6624_v15 }
 0xed4   :  { %v6657_v51 = vsel %vm1083_vm4, %v6599_v38, 0.0 }
 0xed7   :  { %6634 = vadd.xlane.f32.xlu1 %v6633_v52  ;;  %6549 = vadd.xlane.f32.xlu0 %v6548_v39 }
 0xedb   :  { %6552 = vadd.xlane.f32.xlu1 %v6551_v22  ;;  %6555 = vadd.xlane.f32.xlu0 %v6554_v63 }
 0xedf   :  { %6558 = vadd.xlane.f32.xlu1 %v6557_v21  ;;  %6637 = vadd.xlane.f32.xlu0 %v6636_v14 }
 0xee3   :  { %6640 = vadd.xlane.f32.xlu1 %v6639_v42  ;;  %6643 = vadd.xlane.f32.xlu0 %v6642_v27 }
 0xee7   :  { %6646 = vadd.xlane.f32.xlu1 %v6645_v58  ;;  %6649 = vadd.xlane.f32.xlu0 %v6648_v50 }
 0xeeb   :  { %6652 = vadd.xlane.f32.xlu1 %v6651_v47  ;;  %6655 = vadd.xlane.f32.xlu0 %v6654_v2 }
 0xeef   :  { %6658 = vadd.xlane.f32.xlu1 %v6657_v51 }
 0xf20   :  { %v6502_v7 = vpop.xlane.xlu0 %6501 }
 0xf21   :  { %9850 = vrcp.f32 %v6502_v7 }
 0xf24   :  { %v6505_v8 = vpop.xlane.xlu1 %6504  ;;  %v6508_v49 = vpop.xlane.xlu0 %6507 }
 0xf25   :  { %9852 = vrcp.f32 %v6505_v8 }
 0xf26   :  { %9854 = vrcp.f32 %v6508_v49 }
 0xf28   :  { %v6511_v0 = vpop.xlane.xlu1 %6510 }
 0xf29   :  { %9856 = vrcp.f32 %v6511_v0 }
 0xf2c   :  { %v6514_v54 = vpop.xlane.xlu0 %6513 }
 0xf2d   :  { %9858 = vrcp.f32 %v6514_v54 }
 0xf2e   :  { %v9851_v45 = vpop.eup %9850 }
 0xf30   :  { %v6517_v44 = vpop.xlane.xlu1 %6516 }
 0xf31   :  { %9860 = vrcp.f32 %v6517_v44 }
 0xf32   :  { %v9853_v26 = vpop.eup %9852 }
 0xf33   :  { %v9855_v17 = vpop.eup %9854 }
 0xf34   :  { %v6605_v5 = vpop.xlane.xlu1 %6604  ;;  %v6520_v29 = vpop.xlane.xlu0 %6519 }
 0xf35   :  { %9862 = vrcp.f32 %v6520_v29  ;;  %v6661_v61 = vmul.f32 %v9853_v26, %v6605_v5 }
 0xf36   :  { %v9857_v3 = vpop.eup %9856 }
 0xf37   :  { %v6713_v15 = vrot.slane %v6661_v61, %v10479_v25 }
 0xf38   :  { %v6611_v23 = vpop.xlane.xlu1 %6610  ;;  %v6523_v53 = vpop.xlane.xlu0 %6522 }
 0xf39   :  { %9864 = vrcp.f32 %v6523_v53  ;;  %v6663_v35 = vmul.f32 %v9857_v3, %v6611_v23 }
 0xf3a   :  { %v9859_v4 = vpop.eup %9858 }
 0xf3b   :  { %v6721_v16 = vrot.slane %v6663_v35, %v10479_v25 }
 0xf3c   :  { %v6617_v48 = vpop.xlane.xlu1 %6616  ;;  %v6602_v19 = vpop.xlane.xlu0 %6601 }
 0xf3d   :  { %v6660_v33 = vmul.f32 %v9851_v45, %v6602_v19 }
 0xf3e   :  { %v9861_v41 = vpop.eup %9860 }
 0xf3f   :  { %v6709_v36 = vrot.slane %v6660_v33, %v10479_v25  ;;  %v6665_v43 = vmul.f32 %v9861_v41, %v6617_v48 }
 0xf40   :  { %v6529_v40 = vpop.xlane.xlu1 %6528  ;;  %v6608_v37 = vpop.xlane.xlu0 %6607 }
 0xf41   :  { %v6662_v31 = vmul.f32 %v9855_v17, %v6608_v37  ;;  %v6786_v39 = vsel %vm1490_vm6, %v6713_v15, %v6709_v36  ;;  %v6729_v55 = vrot.slane %v6665_v43, %v10479_v25 }
 0xf42   :  { %v9863_v60 = vpop.eup %9862 }
 0xf43   :  { %v6717_v1 = vrot.slane %v6662_v31, %v10479_v25 }
 0xf44   :  { %v6614_v24 = vpop.xlane.xlu0 %6613  ;;  %v6532_v52 = vpop.xlane.xlu1 %6531 }
 0xf45   :  { %v6664_v6 = vmul.f32 %v9859_v4, %v6614_v24  ;;  %v6787_v22 = vsel %vm1492_vm7, %v6717_v1, %v6786_v39 }
 0xf46   :  { %v6788_v21 = vsel %vm1494_vm8, %v6721_v16, %v6787_v22  ;;  %v9865_v14 = vpop.eup %9864 }
 0xf47   :  { %v6725_v63 = vrot.slane %v6664_v6, %v10479_v25 }
 0xf48   :  { %v6620_v57 = vpop.xlane.xlu0 %6619  ;;  %v6535_v30 = vpop.xlane.xlu1 %6534 }
 0xf49   :  { %v6666_v13 = vmul.f32 %v9863_v60, %v6620_v57  ;;  %v6789_v59 = vsel %vm1496_vm9, %v6725_v63, %v6788_v21 }
 0xf4a   :  { %v6790_v58 = vsel %vm1498_vm10, %v6729_v55, %v6789_v59 }
 0xf4b   :  { %v6733_v42 = vrot.slane %v6666_v13, %v10479_v25 }
 0xf4c   :  { %v6623_v27 = vpop.xlane.xlu0 %6622 }
 0xf4d   :  { %v6667_v12 = vmul.f32 %v9865_v14, %v6623_v27  ;;  %v6791_v11 = vsel %vm1500_vm11, %v6733_v42, %v6790_v58 }
 0xf4f   :  { %v6737_v50 = vrot.slane %v6667_v12, %v10479_v25 }
 0xf50   :  { %v6541_v46 = vpop.xlane.xlu1 %6540  ;;  %v6526_v47 = vpop.xlane.xlu0 %6525 }
 0xf51   :  { %v6792_v2 = vsel %vm1502_vm12, %v6737_v50, %v6791_v11  ;;  %9866 = vrcp.f32 %v6526_v47 }
 0xf52   :  { %v6803_v38 = vsel %vm217_vm1, %v6792_v2, 0  ;;  %9868 = vrcp.f32 %v6529_v40 }
 0xf53   :  { %v11796_v51 = vand.u32 4294901760, %v6803_v38  ;;  %9870 = vrcp.f32 %v6532_v52 }
 0xf54   :  { %v6547_v7 = vpop.xlane.xlu1 %6546  ;;  %v6538_v8 = vpop.xlane.xlu0 %6537  ;;  %9872 = vrcp.f32 %v6535_v30 }
 0xf55   :  { %v11799_v49 = vsub.f32 %v6803_v38, %v11796_v51  ;;  %9431 = vmatmul.mubr.f32.vlgmr.msra.gmra.mxu1 %v11796_v51  ;;  %9874 = vrcp.f32 %v6538_v8 }
 0xf56   :  { %9433 = vmatprep.mubr.msk.f32.mxu1 %vm9918_vm0, %v12108_v20  ;;  %9451 = vmatpush3.msra.mxu1 %v11749_v34  ;;  %9876 = vrcp.f32 %v6541_v46 }
 0xf57   :  { %v6877_v0 = vand.u32 4294901760, %v11799_v49  ;;  %9472 = vmatprep.subr.mxu1 %v12108_v20 }
 0xf58   :  { %v6629_v54 = vpop.xlane.xlu1 %6628  ;;  %v6544_v44 = vpop.xlane.xlu0 %6543 }
 0xf59   :  { %v6878_v5 = vsub.f32 %v11799_v49, %v6877_v0  ;;  %9878 = vrcp.f32 %v6544_v44 }
 0xf5a   :  { %9880 = vrcp.f32 %v6547_v7 }
 0xf5b   :  { %v6879_v29 = vand.u32 4294901760, %v6878_v5 }
 0xf5c   :  { %v6632_v23 = vpop.xlane.xlu1 %6631  ;;  %v6626_v53 = vpop.xlane.xlu0 %6625 }
 0xf5d   :  { %9420 = vmatmul.mubr.f32.vlgmr.msra.gmra.mxu0 %v6879_v29 }
 0xf5e   :  { %9422 = vmatprep.mubr.msk.f32.mxu0 %vm9918_vm0, %v12108_v20  ;;  %9440 = vmatpush3.msra.mxu0 %v11752_v56  ;;  %v9867_v48 = vpop.eup %9866 }
 0xf5f   :  { %9461 = vmatprep.subr.mxu0 %v12108_v20  ;;  %v6668_v26 = vmul.f32 %v9867_v48, %v6626_v53  ;;  %v9869_v33 = vpop.eup %9868 }
 0xf60   :  { %v6635_v19 = vpop.xlane.xlu1 %6634  ;;  %v6550_v45 = vpop.xlane.xlu0 %6549  ;;  %v6669_v17 = vmul.f32 %v9869_v33, %v6629_v54 }
 0xf61   :  { %v9871_v61 = vpop.eup %9870  ;;  %v6741_v31 = vrot.slane %v6668_v26, %v10479_v25  ;;  %9882 = vrcp.f32 %v6550_v45 }
 0xf62   :  { %v9873_v3 = vpop.eup %9872  ;;  %v6670_v36 = vmul.f32 %v9871_v61, %v6632_v23  ;;  %v6745_v4 = vrot.slane %v6669_v17, %v10479_v25 }
 0xf63   :  { %v6671_v1 = vmul.f32 %v9873_v3, %v6635_v19  ;;  %v9875_v24 = vpop.eup %9874 }
 0xf64   :  { %v6553_v40 = vpop.xlane.xlu1 %6552  ;;  %v6556_v37 = vpop.xlane.xlu0 %6555  ;;  %v6793_v6 = vsel %vm1490_vm6, %v6745_v4, %v6741_v31  ;;  %v6749_v52 = vrot.slane %v6670_v36, %v10479_v25 }
 0xf65   :  { %9884 = vrcp.f32 %v6553_v40  ;;  %v9877_v39 = vpop.eup %9876  ;;  %v6753_v60 = vrot.slane %v6671_v1, %v10479_v25 }
 0xf66   :  { %9886 = vrcp.f32 %v6556_v37  ;;  %v9879_v22 = vpop.eup %9878  ;;  %v6794_v63 = vsel %vm1492_vm7, %v6749_v52, %v6793_v6 }
 0xf67   :  { %v6795_v14 = vsel %vm1494_vm8, %v6753_v60, %v6794_v63  ;;  %v9881_v30 = vpop.eup %9880 }
 0xf68   :  { %v6559_v15 = vpop.xlane.xlu1 %6558  ;;  %v6638_v35 = vpop.xlane.xlu0 %6637 }
 0xf69   :  { %v6672_v41 = vmul.f32 %v9875_v24, %v6638_v35  ;;  %9888 = vrcp.f32 %v6559_v15 }
 0xf6b   :  { %v6757_v57 = vrot.slane %v6672_v41, %v10479_v25 }
 0xf6c   :  { %v6641_v16 = vpop.xlane.xlu1 %6640  ;;  %v6644_v43 = vpop.xlane.xlu0 %6643 }
 0xf6d   :  { %v6673_v13 = vmul.f32 %v9877_v39, %v6641_v16  ;;  %v6674_v21 = vmul.f32 %v9879_v22, %v6644_v43  ;;  %v6796_v42 = vsel %vm1496_vm9, %v6757_v57, %v6795_v14 }
 0xf6e   :  { %v9883_v11 = vpop.eup %9882 }
 0xf6f   :  { %v6761_v59 = vrot.slane %v6673_v13, %v10479_v25  ;;  %v6765_v27 = vrot.slane %v6674_v21, %v10479_v25  ;;  %v8598_v13 = vld [vmem:[%s12088_s2 + $0xb0] ss:$0 sm:$0xff] }
 0xf70   :  { %v6647_v55 = vpop.xlane.xlu1 %6646  ;;  %v6650_v12 = vpop.xlane.xlu0 %6649 }
 0xf71   :  { %v6797_v58 = vsel %vm1498_vm10, %v6761_v59, %v6796_v42  ;;  %v6675_v50 = vmul.f32 %v9881_v30, %v6647_v55  ;;  %v6676_v2 = vmul.f32 %v9883_v11, %v6650_v12 }
 0xf72   :  { %v9885_v46 = vpop.eup %9884  ;;  %v6798_v7 = vsel %vm1500_vm11, %v6765_v27, %v6797_v58 }
 0xf73   :  { %v6769_v47 = vrot.slane %v6675_v50, %v10479_v25  ;;  %v9887_v38 = vpop.eup %9886  ;;  %v6773_v53 = vrot.slane %v6676_v2, %v10479_v25 }
 0xf74   :  { %v6653_v8 = vpop.xlane.xlu1 %6652  ;;  %v6656_v54 = vpop.xlane.xlu0 %6655 }
 0xf75   :  { %v6799_v44 = vsel %vm1502_vm12, %v6769_v47, %v6798_v7  ;;  %v6677_v5 = vmul.f32 %v9885_v46, %v6653_v8  ;;  %v6678_v29 = vmul.f32 %v9887_v38, %v6656_v54 }
 0xf76   :  { %v6805_v23 = vsel %vm217_vm1, %v6799_v44, 0  ;;  %v9889_v45 = vpop.eup %9888 }
 0xf77   :  { %v6777_v48 = vrot.slane %v6677_v5, %v10479_v25  ;;  %v6885_v19 = vand.u32 4294901760, %v6805_v23  ;;  %v6781_v26 = vrot.slane %v6678_v29, %v10479_v25 }
 0xf78   :  { %v6659_v33 = vpop.xlane.xlu1 %6658 }
 0xf79   :  { %v6800_v17 = vsel %vm1490_vm6, %v6777_v48, %v6773_v53  ;;  %v6679_v40 = vmul.f32 %v9889_v45, %v6659_v33  ;;  %9434 = vmatmul.mubr.f32.gmra.mxu1 %v6885_v19  ;;  %v6886_v37 = vsub.f32 %v6805_v23, %v6885_v19 }
 0xf7a   :  { %9436 = vmatprep.mubr.msk.f32.mxu1 %vm9918_vm0, %v12108_v20  ;;  %v6801_v3 = vsel %vm1492_vm7, %v6781_v26, %v6800_v17 }
 0xf7b   :  { %v6785_v61 = vrot.slane %v6679_v40, %v10479_v25  ;;  %v6887_v31 = vand.u32 4294901760, %v6886_v37 }
 0xf7d   :  { %v6802_v36 = vsel %vm1494_vm8, %v6785_v61, %v6801_v3  ;;  %v6888_v4 = vsub.f32 %v6886_v37, %v6887_v31 }
 0xf7e   :  { %v6807_v1 = vsel %vm217_vm1, %v6802_v36, 0 }
 0xf7f   :  { %v6889_v24 = vand.u32 4294901760, %v6888_v4  ;;  %v6895_v15 = vand.u32 4294901760, %v6807_v1 }
 0xf81   :  { %9423 = vmatmul.mubr.f32.gmra.mxu0 %v6889_v24  ;;  %9437 = vmatmul.mubr.f32.gmra.mxu1 %v6895_v15  ;;  %v6896_v35 = vsub.f32 %v6807_v1, %v6895_v15 }
 0xf82   :  { %9452 = vmatprep.mubr.msk.f32.mxu1 %vm9918_vm0, %v12108_v20  ;;  %9425 = vmatprep.mubr.msk.f32.mxu0 %vm9918_vm0, %v12108_v20 }
 0xf83   :  { %v6897_v25 = vand.u32 4294901760, %v6896_v35 }
 0xf85   :  { %9453 = vmatmul.mubr.f32.vlgmr.msra.gmra.mxu1 %v6877_v0  ;;  %v6898_v6 = vsub.f32 %v6896_v35, %v6897_v25 }
 0xf86   :  { %9455 = vmatprep.mubr.msk.f32.mxu1 %vm9918_vm0, %v12108_v20  ;;  %9473 = vmatpush3.msra.mxu1 %v11749_v34 }
 0xf87   :  { %v6899_v41 = vand.u32 4294901760, %v6898_v6  ;;  %9494 = vmatprep.subr.mxu1 %v12108_v20 }
 0xf89   :  { %9426 = vmatmul.mubr.f32.gmra.mxu0 %v6899_v41  ;;  %9456 = vmatmul.mubr.f32.gmra.mxu1 %v6887_v31 }
 0xf8a   :  { %9441 = vmatprep.mubr.msk.f32.mxu0 %vm9918_vm0, %v12108_v20  ;;  %9458 = vmatprep.mubr.msk.f32.mxu1 %vm9918_vm0, %v12108_v20 }
 0xf8d   :  { %9442 = vmatmul.mubr.f32.vlgmr.msra.gmra.mxu0 %v11799_v49  ;;  %9459 = vmatmul.mubr.f32.gmra.mxu1 %v6897_v25 }
 0xf8e   :  { %9462 = vmatpush3.msra.mxu0 %v6938_v9  ;;  %9444 = vmatprep.mubr.msk.f32.mxu0 %vm9918_vm0, %v12108_v20 }
 0xf8f   :  { %9474 = vmatprep.mubr.msk.f32.mxu1 %vm9918_vm0, %v12108_v20  ;;  %9483 = vmatprep.subr.mxu0 %v12108_v20 }
 0xf91   :  { %9445 = vmatmul.mubr.f32.gmra.mxu0 %v6886_v37  ;;  %9475 = vmatmul.mubr.f32.vlgmr.msra.gmra.mxu1 %v11796_v51 }
 0xf92   :  { %9447 = vmatprep.mubr.msk.f32.mxu0 %vm9918_vm0, %v12108_v20  ;;  %9477 = vmatprep.mubr.msk.f32.mxu1 %vm9918_vm0, %v12108_v20 }
 0xf95   :  { %9448 = vmatmul.mubr.f32.gmra.mxu0 %v6896_v35  ;;  %9478 = vmatmul.mubr.f32.gmra.mxu1 %v6885_v19 }
 0xf96   :  { %9463 = vmatprep.mubr.msk.f32.mxu0 %vm9918_vm0, %v12108_v20  ;;  %9480 = vmatprep.mubr.msk.f32.mxu1 %vm9918_vm0, %v12108_v20 }
 0xf99   :  { %9464 = vmatmul.mubr.f32.vlgmr.msra.gmra.mxu0 %v11796_v51  ;;  %9481 = vmatmul.mubr.f32.gmra.mxu1 %v6895_v15 }
 0xf9a   :  { %9466 = vmatprep.mubr.msk.f32.mxu0 %vm9918_vm0, %v12108_v20  ;;  %9496 = vmatprep.mubr.msk.f32.mxu1 %vm9918_vm0, %v12108_v20 }
 0xf9d   :  { %9467 = vmatmul.mubr.f32.gmra.mxu0 %v6885_v19 }
 0xf9e   :  { %9469 = vmatprep.mubr.msk.f32.mxu0 %vm9918_vm0, %v12108_v20 }
 0xfa1   :  { %9470 = vmatmul.mubr.f32.gmra.mxu0 %v6895_v15 }
 0xfa2   :  { %9485 = vmatprep.mubr.msk.f32.mxu0 %vm9918_vm0, %v12108_v20 }
0x1015   :  { %v6977_v34 = vpop.f32.mrf.mxu1 }
0x1017   :  { %v9432_v56 = vpop.f32.mrf.mxu1 }
0x101d   :  { %v6881_v9 = vpop.f32.mrf.mxu0 }
0x101e   :  { %v6882_v42 = vadd.f32 %v8598_v13, %v6881_v9 }
0x101f   :  { %v9421_v49 = vpop.f32.mrf.mxu0 }
0x1020   :  { %v6978_v11 = vadd.f32 %v6977_v34, %v6882_v42 }
0x1039   :  { %v6983_v51 = vpop.f32.mrf.mxu1 }
0x103b   :  { %v9435_v0 = vpop.f32.mrf.mxu1 }
0x1041   :  { %v6891_v52 = vpop.f32.mrf.mxu0  ;;  %v6989_v39 = vpop.f32.mrf.mxu1 }
0x1042   :  { %v6892_v50 = vadd.f32 %v8598_v13, %v6891_v52 }
0x1043   :  { %v9424_v60 = vpop.f32.mrf.mxu0  ;;  %v9438_v22 = vpop.f32.mrf.mxu1 }
0x1044   :  { %v6984_v54 = vadd.f32 %v6983_v51, %v6892_v50 }
0x1045   :  { %v7151_v63 = vpop.f32.mrf.mxu1 }
0x1047   :  { %v9454_v57 = vpop.f32.mrf.mxu1 }
0x1049   :  { %v6901_v16 = vpop.f32.mrf.mxu0  ;;  %v7159_v43 = vpop.f32.mrf.mxu1 }
0x104a   :  { %v6902_v8 = vadd.f32 %v8598_v13, %v6901_v16 }
0x104b   :  { %v9427_v21 = vpop.f32.mrf.mxu0  ;;  %v9457_v14 = vpop.f32.mrf.mxu1 }
0x104c   :  { %v6990_v19 = vadd.f32 %v6989_v39, %v6902_v8  ;;  %v7398_v21 = vld [vmem:[%s12088_s2 + $0xc0] sm:$0xff] }
0x104d   :  { %v7063_v59 = vpop.f32.mrf.mxu0  ;;  %v7167_v30 = vpop.f32.mrf.mxu1  ;;  %v11895_v14 = vand.u32 4294901760, %v7398_v21 }
0x104e   :  { %v7064_v2 = vadd.f32 %v7063_v59, %v6978_v11 }
0x104f   :  { %v9443_v27 = vpop.f32.mrf.mxu0  ;;  %v9460_v55 = vpop.f32.mrf.mxu1  ;;  %9484 = vmatpush3.msra.mxu0 %v11895_v14  ;;  %v11899_v59 = vsub.f32 %v7398_v21, %v11895_v14 }
0x1050   :  { %v7152_v23 = vadd.f32 %v7151_v63, %v7064_v2  ;;  %9505 = vmatprep.subr.mxu0 %v12108_v20 }
0x1051   :  { %v7070_v12 = vpop.f32.mrf.mxu0  ;;  %v7325_v58 = vpop.f32.mrf.mxu1 }
0x1052   :  { %v7071_v29 = vadd.f32 %v7070_v12, %v6984_v54 }
0x1053   :  { %v9446_v46 = vpop.f32.mrf.mxu0  ;;  %v9476_v47 = vpop.f32.mrf.mxu1 }
0x1054   :  { %v7160_v37 = vadd.f32 %v7159_v43, %v7071_v29 }
0x1055   :  { %v7077_v38 = vpop.f32.mrf.mxu0  ;;  %v7331_v7 = vpop.f32.mrf.mxu1 }
0x1056   :  { %v7078_v17 = vadd.f32 %v7077_v38, %v6990_v19 }
0x1057   :  { %v9449_v44 = vpop.f32.mrf.mxu0  ;;  %v9479_v5 = vpop.f32.mrf.mxu1 }
0x1058   :  { %v7168_v24 = vadd.f32 %v7167_v30, %v7078_v17  ;;  %v7542_v30 = vand.u32 4294901760, %v11899_v59 }
0x1059   :  { %v7241_v53 = vpop.f32.mrf.mxu0  ;;  %v7337_v48 = vpop.f32.mrf.mxu1 }
0x105a   :  { %v7242_v45 = vadd.f32 %v7241_v53, %v7152_v23  ;;  %v7543_v42 = vsub.f32 %v11899_v59, %v7542_v30 }
0x105b   :  { %v9465_v26 = vpop.f32.mrf.mxu0  ;;  %v9482_v33 = vpop.f32.mrf.mxu1 }
0x105c   :  { %v7326_v40 = vadd.f32 %v7325_v58, %v7242_v45  ;;  %v7544_v27 = vand.u32 4294901760, %v7543_v42 }
0x105d   :  { %v7247_v61 = vpop.f32.mrf.mxu0 }
0x105e   :  { %v7248_v31 = vadd.f32 %v7247_v61, %v7160_v37  ;;  %v7341_v3 = vadd.f32 %v7326_v40, %v11351_v62  ;;  %9495 = vmatpush3.msra.mxu1 %v7544_v27 }
0x105f   :  { %v9468_v36 = vpop.f32.mrf.mxu0  ;;  %9516 = vmatprep.subr.mxu1 %v12108_v20 }
0x1060   :  { %v7332_v4 = vadd.f32 %v7331_v7, %v7248_v31  ;;  %v7345_v1 = vsel %vm217_vm1, %v7341_v3, 0.0  ;;  %v7344_v7 = vld [vmem:[%s12088_s2 + $0xb8] sm:$0x3] }
0x1061   :  { %7346 = vadd.xlane.f32.xlu0 %v7345_v1  ;;  %v7253_v15 = vpop.f32.mrf.mxu0  ;;  %v7387_v8 = vrot.slane %v7344_v7, %v10034_v10  ;;  %v7394_v44 = vrot.slane %v7344_v7, %v10037_v18 }
0x1062   :  { %v7254_v35 = vadd.f32 %v7253_v15, %v7168_v24  ;;  %v7342_v25 = vadd.f32 %v7332_v4, %v11358_v32 }
0x1063   :  { %v9471_v6 = vpop.f32.mrf.mxu0 }
0x1064   :  { %v7338_v41 = vadd.f32 %v7337_v48, %v7254_v35  ;;  %v7348_v34 = vsel %vm217_vm1, %v7342_v25, 0.0 }
0x1065   :  { %7349 = vadd.xlane.f32.xlu1 %v7348_v34 }
0x1066   :  { %v7343_v56 = vadd.f32 %v7338_v41, %v11372_v28 }
0x1068   :  { %v7351_v9 = vsel %vm2062_vm13, %v7343_v56, 0.0 }
0x1069   :  { %7352 = vadd.xlane.f32.xlu0 %v7351_v9 }
0x10ea   :  { %v7347_v62 = vpop.xlane.xlu0 %7346 }
0x10eb   :  { %v7354_v49 = vmul.f32 0.125, %v7347_v62 }
0x10ed   :  { %v7357_v51 = vsub.f32 %v7341_v3, %v7354_v49 }
0x10ee   :  { %v7350_v0 = vpop.xlane.xlu1 %7349 }
0x10ef   :  { %v7355_v52 = vmul.f32 0.125, %v7350_v0  ;;  %v7360_v39 = vmul.f32 %v7357_v51, %v7357_v51 }
0x10f1   :  { %v7358_v60 = vsub.f32 %v7342_v25, %v7355_v52  ;;  %v7363_v22 = vsel %vm217_vm1, %v7360_v39, 0.0  ;;  %v7948_v52 = vld [vmem:[%s12088_s2 + $0xd0] sm:$0xff] }
0x10f2   :  { %7364 = vadd.xlane.f32.xlu1 %v7363_v22  ;;  %v7353_v32 = vpop.xlane.xlu0 %7352 }
0x10f3   :  { %v7356_v63 = vmul.f32 0.125, %v7353_v32  ;;  %v7361_v57 = vmul.f32 %v7358_v60, %v7358_v60 }
0x10f5   :  { %v7359_v16 = vsub.f32 %v7343_v56, %v7356_v63  ;;  %v7366_v43 = vsel %vm217_vm1, %v7361_v57, 0.0 }
0x10f6   :  { %7367 = vadd.xlane.f32.xlu0 %v7366_v43 }
0x10f7   :  { %v7362_v28 = vmul.f32 %v7359_v16, %v7359_v16 }
0x10f9   :  { %v7369_v13 = vsel %vm2062_vm13, %v7362_v28, 0.0 }
0x10fa   :  { %7370 = vadd.xlane.f32.xlu1 %v7369_v13 }
0x117b   :  { %v7365_v55 = vpop.xlane.xlu1 %7364 }
0x117c   :  { %v7372_v12 = vmul.f32 0.125, %v7365_v55 }
0x117e   :  { %v7375_v58 = vadd.f32 1e-05, %v7372_v12 }
0x117f   :  { %v7368_v50 = vpop.xlane.xlu0 %7367 }
0x1180   :  { %9890 = vrsqrt.f32 %v7375_v58  ;;  %v7373_v11 = vmul.f32 0.125, %v7368_v50 }
0x1182   :  { %v7376_v46 = vadd.f32 1e-05, %v7373_v11 }
0x1183   :  { %v7371_v47 = vpop.xlane.xlu1 %7370 }
0x1184   :  { %9892 = vrsqrt.f32 %v7376_v46  ;;  %v7374_v2 = vmul.f32 0.125, %v7371_v47 }
0x1186   :  { %v7377_v38 = vadd.f32 1e-05, %v7374_v2  ;;  %v8599_v2 = vld [vmem:[%s12088_s2 + $0xc8] ss:$0 sm:$0xff] }
0x1188   :  { %9894 = vrsqrt.f32 %v7377_v38 }
0x118d   :  { %v9891_v54 = vpop.eup %9890 }
0x118e   :  { %v7381_v5 = vmul.f32 %v9891_v54, %v7357_v51  ;;  %v7949_v51 = vld [vmem:[%s12088_s2 + $0xd8] sm:$0xff] }
0x118f   :  { %v11972_v0 = vand.u32 4294901760, %v7949_v51 }
0x1190   :  { %v7388_v29 = vmul.f32 %v7387_v8, %v7381_v5 }
0x1191   :  { %v9893_v23 = vpop.eup %9892  ;;  %v11979_v39 = vsub.f32 %v7949_v51, %v11972_v0 }
0x1192   :  { %v11912_v53 = vadd.f32 %v7394_v44, %v7388_v29  ;;  %v7382_v48 = vmul.f32 %v9893_v23, %v7358_v60  ;;  %v11981_v60 = vand.u32 4294901760, %v7948_v52 }
0x1193   :  { %v8092_v22 = vand.u32 4294901760, %v11979_v39 }
0x1194   :  { %v7405_v19 = vsel %vm217_vm1, %v11912_v53, 0  ;;  %v7389_v45 = vmul.f32 %v7387_v8, %v7382_v48  ;;  %v11986_v32 = vsub.f32 %v7948_v52, %v11981_v60 }
0x1195   :  { %v9895_v26 = vpop.eup %9894  ;;  %v7479_v33 = vand.u32 4294901760, %v7405_v19  ;;  %v8093_v63 = vsub.f32 %v11979_v39, %v8092_v22 }
0x1196   :  { %v11916_v17 = vadd.f32 %v7394_v44, %v7389_v45  ;;  %v7383_v40 = vmul.f32 %v9895_v26, %v7359_v16  ;;  %v8099_v57 = vand.u32 4294901760, %v11986_v32 }
0x1197   :  { %v7480_v37 = vsub.f32 %v7405_v19, %v7479_v33  ;;  %9497 = vmatmul.mubr.f32.vlgmr.msra.gmra.mxu1 %v7479_v33  ;;  %v8094_v16 = vand.u32 4294901760, %v8093_v63 }
0x1198   :  { %9499 = vmatprep.mubr.msk.f32.mxu1 %vm9918_vm0, %v12108_v20  ;;  %v7408_v61 = vsel %vm217_vm1, %v11916_v17, 0  ;;  %v7390_v31 = vmul.f32 %v7387_v8, %v7383_v40  ;;  %9517 = vmatpush3.msra.mxu1 %v11895_v14  ;;  %v8100_v43 = vsub.f32 %v11986_v32, %v8099_v57 }
0x1199   :  { %v7489_v3 = vand.u32 4294901760, %v7408_v61  ;;  %v7481_v36 = vand.u32 4294901760, %v7480_v37  ;;  %9538 = vmatprep.subr.mxu1 %v12108_v20 }
0x119a   :  { %v11924_v4 = vadd.f32 %v7394_v44, %v7390_v31  ;;  %v8101_v28 = vand.u32 4294901760, %v8100_v43 }
0x119b   :  { %v7490_v1 = vsub.f32 %v7408_v61, %v7489_v3  ;;  %9500 = vmatmul.mubr.f32.gmra.mxu1 %v7489_v3  ;;  %v7482_v24 = vsub.f32 %v7480_v37, %v7481_v36 }
0x119c   :  { %9502 = vmatprep.mubr.msk.f32.mxu1 %vm9918_vm0, %v12108_v20  ;;  %v7411_v15 = vsel %vm217_vm1, %v11924_v4, 0 }
0x119d   :  { %v7483_v35 = vand.u32 4294901760, %v7482_v24  ;;  %v7499_v25 = vand.u32 4294901760, %v7411_v15  ;;  %v7491_v6 = vand.u32 4294901760, %v7490_v1 }
0x119f   :  { %9486 = vmatmul.mubr.f32.vlgmr.msra.gmra.mxu0 %v7483_v35  ;;  %v7500_v41 = vsub.f32 %v7411_v15, %v7499_v25  ;;  %9503 = vmatmul.mubr.f32.gmra.mxu1 %v7499_v25  ;;  %v7492_v34 = vsub.f32 %v7490_v1, %v7491_v6 }
0x11a0   :  { %9506 = vmatpush3.msra.mxu0 %v11899_v59  ;;  %9488 = vmatprep.mubr.msk.f32.mxu0 %vm9918_vm0, %v12108_v20 }
0x11a1   :  { %9518 = vmatprep.mubr.msk.f32.mxu1 %vm9918_vm0, %v12108_v20  ;;  %v7493_v56 = vand.u32 4294901760, %v7492_v34  ;;  %v7501_v9 = vand.u32 4294901760, %v7500_v41  ;;  %9527 = vmatprep.subr.mxu0 %v12108_v20 }
0x11a3   :  { %9489 = vmatmul.mubr.f32.gmra.mxu0 %v7493_v56  ;;  %9519 = vmatmul.mubr.f32.vlgmr.msra.gmra.mxu1 %v7481_v36  ;;  %v7502_v62 = vsub.f32 %v7500_v41, %v7501_v9 }
0x11a4   :  { %9491 = vmatprep.mubr.msk.f32.mxu0 %vm9918_vm0, %v12108_v20  ;;  %9521 = vmatprep.mubr.msk.f32.mxu1 %vm9918_vm0, %v12108_v20 }
0x11a5   :  { %v7503_v49 = vand.u32 4294901760, %v7502_v62  ;;  %9539 = vmatpush3.msra.mxu1 %v11895_v14 }
0x11a6   :  { %9562 = vmatprep.subr.mxu1 %v12108_v20 }
0x11a7   :  { %9492 = vmatmul.mubr.f32.gmra.mxu0 %v7503_v49  ;;  %9522 = vmatmul.mubr.f32.gmra.mxu1 %v7491_v6 }
0x11a8   :  { %9507 = vmatprep.mubr.msk.f32.mxu0 %vm9918_vm0, %v12108_v20  ;;  %9524 = vmatprep.mubr.msk.f32.mxu1 %vm9918_vm0, %v12108_v20 }
0x11ab   :  { %9508 = vmatmul.mubr.f32.vlgmr.msra.gmra.mxu0 %v7480_v37  ;;  %9525 = vmatmul.mubr.f32.gmra.mxu1 %v7501_v9 }
0x11ac   :  { %9528 = vmatpush3.msra.mxu0 %v7542_v30  ;;  %9510 = vmatprep.mubr.msk.f32.mxu0 %vm9918_vm0, %v12108_v20 }
0x11ad   :  { %9540 = vmatprep.mubr.msk.f32.mxu1 %vm9918_vm0, %v12108_v20  ;;  %9549 = vmatprep.subr.mxu0 %v12108_v20 }
0x11af   :  { %9511 = vmatmul.mubr.f32.gmra.mxu0 %v7490_v1  ;;  %9541 = vmatmul.mubr.f32.vlgmr.msra.gmra.mxu1 %v7479_v33 }
0x11b0   :  { %9513 = vmatprep.mubr.msk.f32.mxu0 %vm9918_vm0, %v12108_v20  ;;  %9543 = vmatprep.mubr.msk.f32.mxu1 %vm9918_vm0, %v12108_v20 }
0x11b1   :  { %9563 = vmatpush3.msra.mxu1 %v8094_v16 }
0x11b2   :  { %9564 = vmatprep.subr.mxu1 %v12108_v20 }
0x11b3   :  { %9514 = vmatmul.mubr.f32.gmra.mxu0 %v7500_v41  ;;  %9544 = vmatmul.mubr.f32.gmra.mxu1 %v7489_v3 }
0x11b4   :  { %9529 = vmatprep.mubr.msk.f32.mxu0 %vm9918_vm0, %v12108_v20  ;;  %9546 = vmatprep.mubr.msk.f32.mxu1 %vm9918_vm0, %v12108_v20 }
0x11b5   :  { %9565 = vmatpush3.msra.mxu1 %v8101_v28 }
0x11b6   :  { %9588 = vmatprep.subr.mxu1 %v12108_v20 }
0x11b7   :  { %9530 = vmatmul.mubr.f32.vlgmr.msra.gmra.mxu0 %v7479_v33  ;;  %9547 = vmatmul.mubr.f32.gmra.mxu1 %v7499_v25 }
0x11b8   :  { %9532 = vmatprep.mubr.msk.f32.mxu0 %vm9918_vm0, %v12108_v20  ;;  %9566 = vmatprep.mubr.msk.f32.mxu1 %vm9918_vm0, %v12108_v20 }
0x11b9   :  { %9550 = vmatpush3.msra.mxu0 %v11972_v0 }
0x11ba   :  { %9551 = vmatprep.subr.mxu0 %v12108_v20 }
0x11bb   :  { %9533 = vmatmul.mubr.f32.gmra.mxu0 %v7489_v3 }
0x11bc   :  { %9535 = vmatprep.mubr.msk.f32.mxu0 %vm9918_vm0, %v12108_v20  ;;  %9552 = vmatpush3.msra.mxu0 %v11981_v60 }
0x11bd   :  { %9575 = vmatprep.subr.mxu0 %v12108_v20 }
0x11bf   :  { %9536 = vmatmul.mubr.f32.gmra.mxu0 %v7499_v25 }
0x11c0   :  { %9553 = vmatprep.mubr.msk.f32.mxu0 %vm9918_vm0, %v12108_v20 }
0x1257   :  { %v7581_v13 = vpop.f32.mrf.mxu1 }
0x1259   :  { %v9498_v21 = vpop.f32.mrf.mxu1 }
0x125b   :  { %v7587_v14 = vpop.f32.mrf.mxu1 }
0x125d   :  { %v9501_v59 = vpop.f32.mrf.mxu1 }
0x125f   :  { %v7485_v30 = vpop.f32.mrf.mxu0  ;;  %v7593_v42 = vpop.f32.mrf.mxu1 }
0x1260   :  { %v7486_v44 = vadd.f32 %v8599_v2, %v7485_v30 }
0x1261   :  { %v9487_v27 = vpop.f32.mrf.mxu0  ;;  %v9504_v55 = vpop.f32.mrf.mxu1 }
0x1262   :  { %v7582_v45 = vadd.f32 %v7581_v13, %v7486_v44 }
0x1263   :  { %v7495_v12 = vpop.f32.mrf.mxu0  ;;  %v7755_v58 = vpop.f32.mrf.mxu1 }
0x1264   :  { %v7496_v19 = vadd.f32 %v8599_v2, %v7495_v12 }
0x1265   :  { %v9490_v50 = vpop.f32.mrf.mxu0  ;;  %v9520_v11 = vpop.f32.mrf.mxu1 }
0x1266   :  { %v7588_v3 = vadd.f32 %v7587_v14, %v7496_v19 }
0x1267   :  { %v7505_v46 = vpop.f32.mrf.mxu0  ;;  %v7763_v47 = vpop.f32.mrf.mxu1 }
0x1268   :  { %v7506_v31 = vadd.f32 %v8599_v2, %v7505_v46 }
0x1269   :  { %v9493_v38 = vpop.f32.mrf.mxu0  ;;  %v9523_v7 = vpop.f32.mrf.mxu1 }
0x126a   :  { %v7594_v6 = vadd.f32 %v7593_v42, %v7506_v31 }
0x126b   :  { %v7667_v8 = vpop.f32.mrf.mxu0  ;;  %v7771_v54 = vpop.f32.mrf.mxu1 }
0x126c   :  { %v7668_v40 = vadd.f32 %v7667_v8, %v7582_v45 }
0x126d   :  { %v9509_v5 = vpop.f32.mrf.mxu0  ;;  %v9526_v29 = vpop.f32.mrf.mxu1 }
0x126e   :  { %v7756_v15 = vadd.f32 %v7755_v58, %v7668_v40 }
0x126f   :  { %v7674_v23 = vpop.f32.mrf.mxu0  ;;  %v7929_v48 = vpop.f32.mrf.mxu1 }
0x1270   :  { %v7675_v24 = vadd.f32 %v7674_v23, %v7588_v3  ;;  %v8600_v3 = vld [vmem:[%s12088_s2 + $0xe0] ss:$0 sm:$0xff] }
0x1271   :  { %v9512_v26 = vpop.f32.mrf.mxu0  ;;  %v9542_v33 = vpop.f32.mrf.mxu1 }
0x1272   :  { %v7764_v49 = vadd.f32 %v7763_v47, %v7675_v24 }
0x1273   :  { %v7681_v37 = vpop.f32.mrf.mxu0  ;;  %v7935_v61 = vpop.f32.mrf.mxu1 }
0x1274   :  { %v7682_v9 = vadd.f32 %v7681_v37, %v7594_v6 }
0x1275   :  { %v9515_v36 = vpop.f32.mrf.mxu0  ;;  %v9545_v1 = vpop.f32.mrf.mxu1 }
0x1276   :  { %v7772_v13 = vadd.f32 %v7771_v54, %v7682_v9 }
0x1277   :  { %v7845_v35 = vpop.f32.mrf.mxu0  ;;  %v7941_v25 = vpop.f32.mrf.mxu1 }
0x1278   :  { %v7846_v41 = vadd.f32 %v7845_v35, %v7756_v15 }
0x1279   :  { %v9531_v34 = vpop.f32.mrf.mxu0  ;;  %v9548_v56 = vpop.f32.mrf.mxu1 }
0x127a   :  { %v7930_v62 = vadd.f32 %v7929_v48, %v7846_v41 }
0x127b   :  { %v7851_v51 = vpop.f32.mrf.mxu0 }
0x127c   :  { %v7945_v52 = vmax.f32 %v7930_v62, 0.0  ;;  %v7852_v63 = vadd.f32 %v7851_v51, %v7764_v49 }
0x127d   :  { %v9534_v16 = vpop.f32.mrf.mxu0 }
0x127e   :  { %v7956_v43 = vsel %vm2668_vm14, %v7945_v52, 0  ;;  %v7936_v28 = vadd.f32 %v7935_v61, %v7852_v63 }
0x127f   :  { %v12003_v21 = vand.u32 4294901760, %v7956_v43  ;;  %v7857_v14 = vpop.f32.mrf.mxu0 }
0x1280   :  { %v7946_v59 = vmax.f32 %v7936_v28, 0.0  ;;  %v7858_v30 = vadd.f32 %v7857_v14, %v7772_v13 }
0x1281   :  { %v8032_v42 = vsub.f32 %v7956_v43, %v12003_v21  ;;  %v9537_v27 = vpop.f32.mrf.mxu0  ;;  %9567 = vmatmul.mubr.f32.vlgmr.msra.gmra.mxu1 %v12003_v21 }
0x1282   :  { %v7959_v55 = vsel %vm2668_vm14, %v7946_v59, 0  ;;  %v7942_v12 = vadd.f32 %v7941_v25, %v7858_v30  ;;  %9569 = vmatprep.mubr.msk.f32.mxu1 %vm9918_vm0, %v12108_v20  ;;  %9589 = vmatpush3.msra.mxu1 %v11972_v0 }
0x1283   :  { %v8033_v58 = vand.u32 4294901760, %v8032_v42  ;;  %v8041_v50 = vand.u32 4294901760, %v7959_v55  ;;  %9590 = vmatprep.subr.mxu1 %v12108_v20 }
0x1284   :  { %v7947_v11 = vmax.f32 %v7942_v12, 0.0  ;;  %9591 = vmatpush3.msra.mxu1 %v11981_v60 }
0x1285   :  { %v8034_v46 = vsub.f32 %v8032_v42, %v8033_v58  ;;  %v8042_v47 = vsub.f32 %v7959_v55, %v8041_v50  ;;  %9570 = vmatmul.mubr.f32.gmra.mxu1 %v8041_v50  ;;  %9614 = vmatprep.subr.mxu1 %v12108_v20 }
0x1286   :  { %v7962_v2 = vsel %vm2668_vm14, %v7947_v11, 0  ;;  %9572 = vmatprep.mubr.msk.f32.mxu1 %vm9918_vm0, %v12108_v20 }
0x1287   :  { %v8035_v38 = vand.u32 4294901760, %v8034_v46  ;;  %v8051_v7 = vand.u32 4294901760, %v7962_v2  ;;  %v8043_v8 = vand.u32 4294901760, %v8042_v47 }
0x1289   :  { %v8052_v54 = vsub.f32 %v7962_v2, %v8051_v7  ;;  %9554 = vmatmul.mubr.f32.vlgmr.msra.gmra.mxu0 %v8035_v38  ;;  %9573 = vmatmul.mubr.f32.gmra.mxu1 %v8051_v7  ;;  %v8044_v44 = vsub.f32 %v8042_v47, %v8043_v8 }
0x128a   :  { %9576 = vmatpush3.msra.mxu0 %v11979_v39  ;;  %9556 = vmatprep.mubr.msk.f32.mxu0 %vm9918_vm0, %v12108_v20 }
0x128b   :  { %9592 = vmatprep.mubr.msk.f32.mxu1 %vm9918_vm0, %v12108_v20  ;;  %v8045_v5 = vand.u32 4294901760, %v8044_v44  ;;  %9577 = vmatprep.subr.mxu0 %v12108_v20  ;;  %v8053_v29 = vand.u32 4294901760, %v8052_v54 }
0x128c   :  { %9578 = vmatpush3.msra.mxu0 %v11986_v32 }
0x128d   :  { %9557 = vmatmul.mubr.f32.gmra.mxu0 %v8045_v5  ;;  %9593 = vmatmul.mubr.f32.vlgmr.msra.gmra.mxu1 %v8033_v58  ;;  %v8054_v23 = vsub.f32 %v8052_v54, %v8053_v29 }
0x128e   :  { %9559 = vmatprep.mubr.msk.f32.mxu0 %vm9918_vm0, %v12108_v20  ;;  %9595 = vmatprep.mubr.msk.f32.mxu1 %vm9918_vm0, %v12108_v20 }
0x128f   :  { %v8055_v48 = vand.u32 4294901760, %v8054_v23  ;;  %9601 = vmatprep.subr.mxu0 %v12108_v20  ;;  %9615 = vmatpush3.msra.mxu1 %v11972_v0 }
0x1290   :  { %9616 = vmatprep.subr.mxu1 %v12108_v20 }
0x1291   :  { %9560 = vmatmul.mubr.f32.gmra.mxu0 %v8055_v48  ;;  %9596 = vmatmul.mubr.f32.gmra.mxu1 %v8043_v8 }
0x1292   :  { %9579 = vmatprep.mubr.msk.f32.mxu0 %vm9918_vm0, %v12108_v20  ;;  %9598 = vmatprep.mubr.msk.f32.mxu1 %vm9918_vm0, %v12108_v20 }
0x1293   :  { %9617 = vmatpush3.msra.mxu1 %v11981_v60 }
0x1295   :  { %9580 = vmatmul.mubr.f32.vlgmr.msra.gmra.mxu0 %v8032_v42  ;;  %9599 = vmatmul.mubr.f32.gmra.mxu1 %v8053_v29 }
0x1296   :  { %9602 = vmatpush3.msra.mxu0 %v8092_v22  ;;  %9582 = vmatprep.mubr.msk.f32.mxu0 %vm9918_vm0, %v12108_v20 }
0x1297   :  { %9618 = vmatprep.mubr.msk.f32.mxu1 %vm9918_vm0, %v12108_v20  ;;  %9603 = vmatprep.subr.mxu0 %v12108_v20 }
0x1298   :  { %9604 = vmatpush3.msra.mxu0 %v8099_v57 }
0x1299   :  { %9583 = vmatmul.mubr.f32.gmra.mxu0 %v8042_v47  ;;  %9619 = vmatmul.mubr.f32.vlgmr.msra.gmra.mxu1 %v12003_v21 }
0x129a   :  { %9585 = vmatprep.mubr.msk.f32.mxu0 %vm9918_vm0, %v12108_v20  ;;  %9621 = vmatprep.mubr.msk.f32.mxu1 %vm9918_vm0, %v12108_v20 }
0x129d   :  { %9586 = vmatmul.mubr.f32.gmra.mxu0 %v8052_v54  ;;  %9622 = vmatmul.mubr.f32.gmra.mxu1 %v8041_v50 }
0x129e   :  { %9605 = vmatprep.mubr.msk.f32.mxu0 %vm9918_vm0, %v12108_v20  ;;  %9624 = vmatprep.mubr.msk.f32.mxu1 %vm9918_vm0, %v12108_v20 }
0x12a1   :  { %9606 = vmatmul.mubr.f32.vlgmr.msra.gmra.mxu0 %v12003_v21  ;;  %9625 = vmatmul.mubr.f32.gmra.mxu1 %v8051_v7 }
0x12a2   :  { %9608 = vmatprep.mubr.msk.f32.mxu0 %vm9918_vm0, %v12108_v20 }
0x12a5   :  { %9609 = vmatmul.mubr.f32.gmra.mxu0 %v8041_v50 }
0x12a6   :  { %9611 = vmatprep.mubr.msk.f32.mxu0 %vm9918_vm0, %v12108_v20 }
0x12a9   :  { %9612 = vmatmul.mubr.f32.gmra.mxu0 %v8051_v7 }
0x1341   :  { %v8138_v0 = vpop.f32.mrf.mxu1 }
0x1343   :  { %v9568_v39 = vpop.f32.mrf.mxu1 }
0x1345   :  { %v8144_v60 = vpop.f32.mrf.mxu1 }
0x1347   :  { %v9571_v22 = vpop.f32.mrf.mxu1 }
0x1349   :  { %v8037_v32 = vpop.f32.mrf.mxu0  ;;  %v8150_v57 = vpop.f32.mrf.mxu1 }
0x134a   :  { %v8038_v15 = vadd.f32 %v8600_v3, %v8037_v32 }
0x134b   :  { %v9555_v19 = vpop.f32.mrf.mxu0  ;;  %v9574_v45 = vpop.f32.mrf.mxu1 }
0x134c   :  { %v8139_v56 = vadd.f32 %v8138_v0, %v8038_v15 }
0x134d   :  { %v8047_v26 = vpop.f32.mrf.mxu0  ;;  %v8315_v33 = vpop.f32.mrf.mxu1 }
0x134e   :  { %v8048_v34 = vadd.f32 %v8600_v3, %v8047_v26 }
0x134f   :  { %v9558_v40 = vpop.f32.mrf.mxu0  ;;  %v9594_v37 = vpop.f32.mrf.mxu1 }
0x1350   :  { %v8145_v16 = vadd.f32 %v8144_v60, %v8048_v34 }
0x1351   :  { %v8057_v61 = vpop.f32.mrf.mxu0  ;;  %v8323_v31 = vpop.f32.mrf.mxu1 }
0x1352   :  { %v8058_v63 = vadd.f32 %v8600_v3, %v8057_v61 }
0x1353   :  { %v9561_v20 = vpop.f32.mrf.mxu0  ;;  %v9597_v36 = vpop.f32.mrf.mxu1 }
0x1354   :  { %v8151_v30 = vadd.f32 %v8150_v57, %v8058_v63 }
0x1355   :  { %v8226_v1 = vpop.f32.mrf.mxu0  ;;  %v8331_v24 = vpop.f32.mrf.mxu1 }
0x1356   :  { %v8227_v49 = vadd.f32 %v8226_v1, %v8139_v56 }
0x1357   :  { %v9581_v35 = vpop.f32.mrf.mxu0  ;;  %v9600_v25 = vpop.f32.mrf.mxu1 }
0x1358   :  { %v8316_v21 = vadd.f32 %v8315_v33, %v8227_v49 }
0x1359   :  { %v8233_v6 = vpop.f32.mrf.mxu0  ;;  %v8493_v41 = vpop.f32.mrf.mxu1 }
0x135a   :  { %v8234_v13 = vadd.f32 %v8233_v6, %v8145_v16 }
0x135b   :  { %v9584_v9 = vpop.f32.mrf.mxu0  ;;  %v9620_v62 = vpop.f32.mrf.mxu1 }
0x135c   :  { %v8324_v50 = vadd.f32 %v8323_v31, %v8234_v13 }
0x135d   :  { %v8240_v51 = vpop.f32.mrf.mxu0  ;;  %v8499_v52 = vpop.f32.mrf.mxu1 }
0x135e   :  { %v8241_v12 = vadd.f32 %v8240_v51, %v8151_v30 }
0x135f   :  { %v9587_v43 = vpop.f32.mrf.mxu0  ;;  %v9623_v28 = vpop.f32.mrf.mxu1 }
0x1360   :  { %v8332_v8 = vadd.f32 %v8331_v24, %v8241_v12 }
0x1361   :  { %v8408_v14 = vpop.f32.mrf.mxu0  ;;  %v8505_v59 = vpop.f32.mrf.mxu1 }
0x1362   :  { %v8409_v42 = vadd.f32 %v8408_v14, %v8316_v21 }
0x1363   :  { %v9607_v27 = vpop.f32.mrf.mxu0  ;;  %v9626_v55 = vpop.f32.mrf.mxu1 }
0x1364   :  { %v8494_v58 = vadd.f32 %v8493_v41, %v8409_v42  ;;  %v8512_v41 = vld [vmem:[%s12088_s2 + $0xe8] sm:$0x3] }
0x1365   :  { %v8414_v11 = vpop.f32.mrf.mxu0  ;;  %v8555_v34 = vrot.slane %v8512_v41, %v10034_v10  ;;  %v8562_v9 = vrot.slane %v8512_v41, %v10037_v18 }
0x1366   :  { %v8415_v46 = vadd.f32 %v8414_v11, %v8324_v50  ;;  %v8509_v47 = vadd.f32 %v8494_v58, %v11912_v53 }
0x1367   :  { %v9610_v2 = vpop.f32.mrf.mxu0 }
0x1368   :  { %v8500_v38 = vadd.f32 %v8499_v52, %v8415_v46  ;;  %v8513_v7 = vsel %vm217_vm1, %v8509_v47, 0.0 }
0x1369   :  { %8514 = vadd.xlane.f32.xlu0 %v8513_v7  ;;  %v8420_v54 = vpop.f32.mrf.mxu0 }
0x136a   :  { %v8421_v44 = vadd.f32 %v8420_v54, %v8332_v8  ;;  %v8510_v5 = vadd.f32 %v8500_v38, %v11916_v17 }
0x136b   :  { %v9613_v29 = vpop.f32.mrf.mxu0 }
0x136c   :  { %v8506_v23 = vadd.f32 %v8505_v59, %v8421_v44  ;;  %v8516_v48 = vsel %vm217_vm1, %v8510_v5, 0.0 }
0x136d   :  { %8517 = vadd.xlane.f32.xlu1 %v8516_v48 }
0x136e   :  { %v8511_v0 = vadd.f32 %v8506_v23, %v11924_v4 }
0x1370   :  { %v8519_v39 = vsel %vm2062_vm13, %v8511_v0, 0.0 }
0x1371   :  { %8520 = vadd.xlane.f32.xlu0 %v8519_v39 }
0x13f2   :  { %v8515_v53 = vpop.xlane.xlu0 %8514 }
0x13f3   :  { %v8522_v60 = vmul.f32 0.125, %v8515_v53 }
0x13f5   :  { %v8525_v22 = vsub.f32 %v8509_v47, %v8522_v60 }
0x13f6   :  { %v8518_v32 = vpop.xlane.xlu1 %8517 }
0x13f7   :  { %v8523_v57 = vmul.f32 0.125, %v8518_v32  ;;  %v8528_v19 = vmul.f32 %v8525_v22, %v8525_v22 }
0x13f9   :  { %v8526_v45 = vsub.f32 %v8510_v5, %v8523_v57  ;;  %v8531_v26 = vsel %vm217_vm1, %v8528_v19, 0.0 }
0x13fa   :  { %8532 = vadd.xlane.f32.xlu1 %v8531_v26  ;;  %v8521_v17 = vpop.xlane.xlu0 %8520 }
0x13fb   :  { %v8524_v33 = vmul.f32 0.125, %v8521_v17  ;;  %v8529_v40 = vmul.f32 %v8526_v45, %v8526_v45 }
0x13fd   :  { %v8527_v37 = vsub.f32 %v8511_v0, %v8524_v33  ;;  %v8534_v61 = vsel %vm217_vm1, %v8529_v40, 0.0 }
0x13fe   :  { %8535 = vadd.xlane.f32.xlu0 %v8534_v61 }
0x13ff   :  { %v8530_v4 = vmul.f32 %v8527_v37, %v8527_v37 }
0x1401   :  { %v8537_v31 = vsel %vm2062_vm13, %v8530_v4, 0.0 }
0x1402   :  { %8538 = vadd.xlane.f32.xlu1 %v8537_v31 }
0x1483   :  { %v8533_v3 = vpop.xlane.xlu1 %8532 }
0x1484   :  { %v8540_v20 = vmul.f32 0.125, %v8533_v3 }
0x1486   :  { %v8543_v36 = vadd.f32 1e-05, %v8540_v20 }
0x1487   :  { %v8536_v1 = vpop.xlane.xlu0 %8535 }
0x1488   :  { %9896 = vrsqrt.f32 %v8543_v36  ;;  %v8541_v24 = vmul.f32 0.125, %v8536_v1 }
0x148a   :  { %v8544_v15 = vadd.f32 1e-05, %v8541_v24 }
0x148b   :  { %v8539_v35 = vpop.xlane.xlu1 %8538 }
0x148c   :  { %9898 = vrsqrt.f32 %v8544_v15  ;;  %v8542_v25 = vmul.f32 0.125, %v8539_v35 }
0x148e   :  { %v8545_v6 = vadd.f32 1e-05, %v8542_v25 }
0x1490   :  { %9900 = vrsqrt.f32 %v8545_v6 }
0x1495   :  { %v9897_v56 = vpop.eup %9896 }
0x1496   :  { %v8549_v62 = vmul.f32 %v9897_v56, %v8525_v22 }
0x1498   :  { %v8556_v49 = vmul.f32 %v8555_v34, %v8549_v62 }
0x1499   :  { %v9899_v51 = vpop.eup %9898 }
0x149a   :  { %v8563_v52 = vadd.f32 %v8562_v9, %v8556_v49  ;;  %v8550_v63 = vmul.f32 %v9899_v51, %v8526_v45 }
0x149c   :  { %v8566_v16 = vsub.f32 0.0, %v8563_v52  ;;  %v8557_v43 = vmul.f32 %v8555_v34, %v8550_v63 }
0x149d   :  { %v9901_v28 = vpop.eup %9900 }
0x149e   :  { %v8569_v13 = vmul.f32 1.442695, %v8566_v16  ;;  %v8564_v21 = vadd.f32 %v8562_v9, %v8557_v43  ;;  %v8551_v14 = vmul.f32 %v9901_v28, %v8527_v37 }
0x14a0   :  { %9902 = vpow2.f32 %v8569_v13  ;;  %v8567_v59 = vsub.f32 0.0, %v8564_v21  ;;  %v8558_v30 = vmul.f32 %v8555_v34, %v8551_v14 }
0x14a2   :  { %v8571_v42 = vmul.f32 1.442695, %v8567_v59  ;;  %v8565_v27 = vadd.f32 %v8562_v9, %v8558_v30 }
0x14a4   :  { %9904 = vpow2.f32 %v8571_v42  ;;  %v8568_v10 = vsub.f32 0.0, %v8565_v27 }
0x14a6   :  { %v8573_v55 = vmul.f32 1.442695, %v8568_v10 }
0x14a8   :  { %9906 = vpow2.f32 %v8573_v55 }
0x14ad   :  { %v9903_v18 = vpop.eup %9902 }
0x14ae   :  { %v8575_v12 = vadd.f32 1.0, %v9903_v18 }
0x14b0   :  { %9908 = vrcp.f32 %v8575_v12 }
0x14b1   :  { %v9905_v58 = vpop.eup %9904 }
0x14b2   :  { %v8576_v50 = vadd.f32 1.0, %v9905_v58 }
0x14b4   :  { %9910 = vrcp.f32 %v8576_v50 }
0x14b5   :  { %v9907_v11 = vpop.eup %9906 }
0x14b6   :  { %v8577_v46 = vadd.f32 1.0, %v9907_v11 }
0x14b8   :  { %9912 = vrcp.f32 %v8577_v46 }
0x14bd   :  { %v9909_v47 = vpop.eup %9908 }
0x14be   :  { %8584 = vst.msk [vmem:[%s12091_s3] sm:$0xff] %vm217_vm1, %v9909_v47 }
0x14c1   :  { %v9911_v2 = vpop.eup %9910 }
0x14c2   :  { %8585 = vst.msk [vmem:[%s12091_s3 + $0x8] sm:$0xff] %vm217_vm1, %v9911_v2 }
0x14c5   :  { %v9913_v38 = vpop.eup %9912 }
0x14c6   :  { %8586 = vst.msk [vmem:[%s12091_s3 + $0x10] sm:$0xf] %vm2062_vm13, %v9913_v38 }

</bundles_post_ra>
